<compile_context>
chip_gen: v7x
topology: tpu7x:2x2x1
jax: 0.10.0
libtpu: 0.0.40
codegen_flags: <defaults>
</compile_context>

<pallas_src>
import jax
import jax.numpy as jnp
from jax.experimental import pallas as pl
from jax.experimental.pallas import tpu as pltpu


def _make_kernel(C, Td, SLAB, Wf, Lr):
    """Build the conv kernel for one (batch, depth-tile) grid point."""

    def kernel(x_ref, xh_ref, wA_ref, wB_ref, b_ref, o_ref):
        # x_ref : (2, 2, Td, SLAB, 2C) bf16  main depth-pair slabs, laid out as
        #         [pd, ph, depth-pair, hp*Wf + wp, pw*C + c]
        # xh_ref: (2, 2, 1, SLAB, 2C)  bf16  halo slab (next depth pair)
        # wA_ref: (9, C, 2C) bf16  rows (kd*3+kh), cols (kw in {0,1})*C + c_in
        # wB_ref: (9, C, C)  bf16  kw = 2 tap
        # b_ref : (C, 1) f32
        # o_ref : (C, Td*SLAB)     column = od*SLAB + oh*Wf + ow  (lane-dense)
        bias = b_ref[...]
        for od in range(Td):                      # static unroll, Td is small
            acc = jnp.zeros((C, Lr), jnp.float32)
            for kd in range(3):
                dd, pd = divmod(kd, 2)
                for kh in range(3):
                    dh, ph = divmod(kh, 2)
                    g = kd * 3 + kh
                    off = dh * Wf
                    if od + dd < Td:              # source slab inside main block
                        a = x_ref[pd, ph, od + dd, off:off + Lr, :]
                        a2 = x_ref[pd, ph, od + dd, off + 1:off + 1 + Lr, 0:C]
                    else:                         # last output row, kd=2 -> halo
                        a = xh_ref[pd, ph, 0, off:off + Lr, :]
                        a2 = xh_ref[pd, ph, 0, off + 1:off + 1 + Lr, 0:C]
                    # kw in {0,1}: both W-parities live in lanes [0, 2C) -> K=2C
                    acc += jnp.einsum('ck,lk->cl', wA_ref[g], a,
                                      preferred_element_type=jnp.float32)
                    # kw = 2: next W-pair, parity 0 -> lanes [0, C), K=C
                    acc += jnp.einsum('ck,lk->cl', wB_ref[g], a2,
                                      preferred_element_type=jnp.float32)
            # lane-dense (C, Lr) store; columns [Lr, SLAB) of this row are junk
            # that the wrapper slices away.
            o_ref[:, od * SLAB: od * SLAB + Lr] = (acc + bias).astype(o_ref.dtype)

    return kernel


@jax.jit
def downsample_forward(x, w, b):
    """x: (B,C,D,H,W); w: (C,C,3,3,3) OIDHW; b: (C,) -> (B,C,Do,Ho,Wo)."""
    B, C, D, H, W = x.shape
    Do = (D - 2) // 2 + 1
    Ho = (H - 2) // 2 + 1
    Wo = (W - 2) // 2 + 1
    Hf, Wf = Ho + 1, Wo + 1
    SLAB = Hf * Wf                       # flattened (hp, wp) extent per depth pair
    Lr = (Ho - 1) * Wf + Wo              # flattened (oh, ow) span actually computed

    # ---- choose the output-depth tile Td (per-step VMEM + v7x 2-TC parallelism)
    blk_cap = 8 * 1024 * 1024            # main activation block (bf16), per buffer
    Td = 1
    for t in range(1, min(Do, 8) + 1):
        if Do % t == 0 and 16 * C * t * SLAB <= blk_cap:
            Td = t
    if Do > 1 and Do // Td < 2:          # keep >= 2 depth tiles when possible
        smaller = [t for t in range(1, Td) if Do % t == 0]
        if smaller:
            Td = smaller[-1]
    n_dt = Do // Td
    Dfp = Do + (Td if Td > 1 else 1)     # >= Do+1 halo slab, and Td | Dfp

    # ---- single fused host prep pass: pad + channels-last parity split + bf16
    De, He, We = 2 * Dfp, 2 * Hf, 2 * Wf
    xk = jnp.pad(x, ((0, 0), (0, 0), (0, De - D), (0, He - H), (0, We - W)))
    xk = xk.reshape(B, C, Dfp, 2, Hf, 2, Wf, 2)
    xk = jnp.transpose(xk, (0, 3, 5, 2, 4, 6, 7, 1))   # (B,pd,ph,Dp,Hp,Wp,pw,C)
    xk = xk.reshape(B, 2, 2, Dfp, SLAB, 2 * C).astype(jnp.bfloat16)

    # ---- weights: (kd,kh) groups; kw in {0,1} fused along the 2C lane axis
    wt = jnp.transpose(w, (2, 3, 4, 0, 1))             # (3,3,3,Cout,Cin)
    wA = jnp.transpose(wt[:, :, 0:2], (0, 1, 3, 2, 4)).reshape(9, C, 2 * C)
    wA = wA.astype(jnp.bfloat16)
    wB = wt[:, :, 2].reshape(9, C, C).astype(jnp.bfloat16)
    bm = b.reshape(C, 1).astype(jnp.float32)

    # ---- right-size the scoped VMEM limit from the actual per-step footprint
    out_item = jnp.dtype(x.dtype).itemsize
    main_b = 16 * C * Td * SLAB                        # (2,2,Td,SLAB,2C) bf16
    halo_b = 16 * C * SLAB
    out_b = C * Td * SLAB * out_item
    w_b = (9 * C * 2 * C + 9 * C * C) * 2 + C * 4
    per_step = 2 * (main_b + halo_b + out_b) + w_b     # double-buffered pipeline
    vmem_limit = int(min(max(2 * per_step + (8 << 20), 32 << 20), 64 << 20))

    kernel = _make_kernel(C, Td, SLAB, Wf, Lr)
    out = pl.pallas_call(
        kernel,
        out_shape=jax.ShapeDtypeStruct((B * n_dt, C, Td * SLAB), x.dtype),
        grid=(B, n_dt),
        in_specs=[
            # main depth-pair slabs [di*Td, di*Td+Td)
            pl.BlockSpec((None, 2, 2, Td, SLAB, 2 * C),
                         lambda bi, di: (bi, 0, 0, di, 0, 0)),
            # halo: the single next depth-pair slab (same array, second view)
            pl.BlockSpec((None, 2, 2, 1, SLAB, 2 * C),
                         lambda bi, di: (bi, 0, 0, di * Td + Td, 0, 0)),
            pl.BlockSpec((9, C, 2 * C), lambda bi, di: (0, 0, 0)),
            pl.BlockSpec((9, C, C), lambda bi, di: (0, 0, 0)),
            pl.BlockSpec((C, 1), lambda bi, di: (0, 0)),
        ],
        out_specs=pl.BlockSpec((None, C, Td * SLAB),
                               lambda bi, di: (bi * n_dt + di, 0, 0)),
        compiler_params=pltpu.CompilerParams(
            dimension_semantics=("parallel", "parallel"),
            vmem_limit_bytes=vmem_limit,
        ),
    )(xk, xk, wA, wB, bm)

    # free-ish extraction: drop the garbage columns, restore NCDHW
    out = out.reshape(B, n_dt, C, Td, Hf, Wf)
    out = jnp.transpose(out, (0, 2, 1, 3, 4, 5)).reshape(B, C, Do, Hf, Wf)
    return out[:, :, :, :Ho, :Wo]


def downsample_reference(x, w, b):
    """Pure-JAX mirror of the PyTorch forward (f32 math)."""
    xp = jnp.pad(x, ((0, 0), (0, 0), (0, 1), (0, 1), (0, 1)))
    y = jax.lax.conv_general_dilated(
        xp.astype(jnp.float32), w.astype(jnp.float32),
        window_strides=(2, 2, 2), padding='VALID',
        dimension_numbers=('NCDHW', 'OIDHW', 'NCDHW'))
    return y + b[None, :, None, None, None]


if __name__ == "__main__":
    B, C, D, H, W = 2, 32, 8, 16, 16

    key = jax.random.PRNGKey(0)
    k1, k2, k3 = jax.random.split(key, 3)
    x = jax.random.normal(k1, (B, C, D, H, W), jnp.float32)
    w = jax.random.normal(k2, (C, C, 3, 3, 3), jnp.float32) / jnp.sqrt(27.0 * C)
    b = 0.1 * jax.random.normal(k3, (C,), jnp.float32)

    y = jax.block_until_ready(downsample_forward(x, w, b))

    # Reference with identically bf16-rounded operands: the kernel accumulates
    # in f32, so any remaining mismatch would indicate an indexing bug.
    xq = x.astype(jnp.bfloat16).astype(jnp.float32)
    wq = w.astype(jnp.bfloat16).astype(jnp.float32)
    y_ref = jax.block_until_ready(downsample_reference(xq, wq, b))

    Do, Ho, Wo = (D - 2) // 2 + 1, (H - 2) // 2 + 1, (W - 2) // 2 + 1
    assert y.shape == (B, C, Do, Ho, Wo), y.shape
    abs_err = float(jnp.max(jnp.abs(y.astype(jnp.float32) - y_ref)))
    scale = float(jnp.max(jnp.abs(y_ref))) + 1e-6
    assert abs_err / scale < 1e-3, f"mismatch vs reference: abs={abs_err} rel={abs_err / scale}"
    print("KERNEL_OK")
</pallas_src>

<mosaic_0001>
module attributes {stable_mosaic.version = 11 : i64} {
  func.func @kernel(%arg0: i32, %arg1: i32, %arg2: memref<1x2x2x2x81x64xbf16, #tpu.memory_space<vmem>>, %arg3: memref<1x2x2x1x81x64xbf16, #tpu.memory_space<vmem>>, %arg4: memref<9x32x64xbf16, #tpu.memory_space<vmem>>, %arg5: memref<9x32x32xbf16, #tpu.memory_space<vmem>>, %arg6: memref<32x1xf32, #tpu.memory_space<vmem>>, %arg7: memref<1x32x162xf32, #tpu.memory_space<vmem>>) attributes {dimension_semantics = [#tpu.dimension_semantics<parallel>, #tpu.dimension_semantics<parallel>], iteration_bounds = array<i64: 2, 2>, scalar_prefetch = 0 : i64, scratch_operands = 0 : i64, tpu.core_type = #tpu.core_type<tc>, window_params = [{transform_indices = @transform_0, window_bounds = array<i64: 1, 2, 2, 2, 81, 64>}, {transform_indices = @transform_1, window_bounds = array<i64: 1, 2, 2, 1, 81, 64>}, {pipeline_mode = #tpu.pipeline_mode<synchronous>, transform_indices = @transform_2, window_bounds = array<i64: 9, 32, 64>}, {pipeline_mode = #tpu.pipeline_mode<synchronous>, transform_indices = @transform_3, window_bounds = array<i64: 9, 32, 32>}, {pipeline_mode = #tpu.pipeline_mode<synchronous>, transform_indices = @transform_4, window_bounds = array<i64: 32, 1>}, {transform_indices = @transform_5, window_bounds = array<i64: 1, 32, 162>}]} {
    %c0 = arith.constant 0 : index
    %c0_0 = arith.constant 0 : index
    %0 = vector.load %arg6[%c0, %c0_0] : memref<32x1xf32, #tpu.memory_space<vmem>>, vector<32x1xf32>
    %cst = arith.constant 0.000000e+00 : f32
    %1 = vector.broadcast %cst : f32 to vector<32x71xf32>
    %c0_1 = arith.constant 0 : index
    %c0_2 = arith.constant 0 : index
    %c0_3 = arith.constant 0 : index
    %c0_4 = arith.constant 0 : index
    %c0_5 = arith.constant 0 : index
    %c0_6 = arith.constant 0 : index
    %2 = vector.load %arg2[%c0_1, %c0_2, %c0_3, %c0_4, %c0_5, %c0_6] : memref<1x2x2x2x81x64xbf16, #tpu.memory_space<vmem>>, vector<1x1x1x1x71x64xbf16>
    %3 = vector.shape_cast %2 : vector<1x1x1x1x71x64xbf16> to vector<71x64xbf16>
    %c0_7 = arith.constant 0 : index
    %c0_8 = arith.constant 0 : index
    %c0_9 = arith.constant 0 : index
    %c0_10 = arith.constant 0 : index
    %c1 = arith.constant 1 : index
    %c0_11 = arith.constant 0 : index
    %4 = vector.load %arg2[%c0_7, %c0_8, %c0_9, %c0_10, %c1, %c0_11] : memref<1x2x2x2x81x64xbf16, #tpu.memory_space<vmem>>, vector<1x1x1x1x71x32xbf16>
    %5 = vector.shape_cast %4 : vector<1x1x1x1x71x32xbf16> to vector<71x32xbf16>
    %c0_12 = arith.constant 0 : index
    %c0_13 = arith.constant 0 : index
    %c0_14 = arith.constant 0 : index
    %6 = vector.load %arg4[%c0_12, %c0_13, %c0_14] : memref<9x32x64xbf16, #tpu.memory_space<vmem>>, vector<1x32x64xbf16>
    %7 = vector.shape_cast %6 : vector<1x32x64xbf16> to vector<32x64xbf16>
    "tpu.trace_start"() <{level = 10 : i32, message = "ck,lk->cl"}> : () -> ()
    %cst_15 = arith.constant dense<0.000000e+00> : vector<32x71xf32>
    %8 = tpu.matmul %7, %3, %cst_15 {dimension_numbers = #tpu.dot_dimension_numbers<[1], [1], [0], [0], [0, 0, 1, 0], [], []>} : vector<32x64xbf16>, vector<71x64xbf16>, vector<32x71xf32> -> vector<32x71xf32>
    "tpu.trace_stop"() : () -> ()
    %9 = arith.addf %1, %8 : vector<32x71xf32>
    %c0_16 = arith.constant 0 : index
    %c0_17 = arith.constant 0 : index
    %c0_18 = arith.constant 0 : index
    %10 = vector.load %arg5[%c0_16, %c0_17, %c0_18] : memref<9x32x32xbf16, #tpu.memory_space<vmem>>, vector<1x32x32xbf16>
    %11 = vector.shape_cast %10 : vector<1x32x32xbf16> to vector<32x32xbf16>
    "tpu.trace_start"() <{level = 10 : i32, message = "ck,lk->cl"}> : () -> ()
    %cst_19 = arith.constant dense<0.000000e+00> : vector<32x71xf32>
    %12 = tpu.matmul %11, %5, %cst_19 {dimension_numbers = #tpu.dot_dimension_numbers<[1], [1], [0], [0], [0, 0, 1, 0], [], []>} : vector<32x32xbf16>, vector<71x32xbf16>, vector<32x71xf32> -> vector<32x71xf32>
    "tpu.trace_stop"() : () -> ()
    %13 = arith.addf %9, %12 : vector<32x71xf32>
    %c0_20 = arith.constant 0 : index
    %c0_21 = arith.constant 0 : index
    %c1_22 = arith.constant 1 : index
    %c0_23 = arith.constant 0 : index
    %c0_24 = arith.constant 0 : index
    %c0_25 = arith.constant 0 : index
    %14 = vector.load %arg2[%c0_20, %c0_21, %c1_22, %c0_23, %c0_24, %c0_25] : memref<1x2x2x2x81x64xbf16, #tpu.memory_space<vmem>>, vector<1x1x1x1x71x64xbf16>
    %15 = vector.shape_cast %14 : vector<1x1x1x1x71x64xbf16> to vector<71x64xbf16>
    %c0_26 = arith.constant 0 : index
    %c0_27 = arith.constant 0 : index
    %c1_28 = arith.constant 1 : index
    %c0_29 = arith.constant 0 : index
    %c1_30 = arith.constant 1 : index
    %c0_31 = arith.constant 0 : index
    %16 = vector.load %arg2[%c0_26, %c0_27, %c1_28, %c0_29, %c1_30, %c0_31] : memref<1x2x2x2x81x64xbf16, #tpu.memory_space<vmem>>, vector<1x1x1x1x71x32xbf16>
    %17 = vector.shape_cast %16 : vector<1x1x1x1x71x32xbf16> to vector<71x32xbf16>
    %c1_32 = arith.constant 1 : index
    %c0_33 = arith.constant 0 : index
    %c0_34 = arith.constant 0 : index
    %18 = vector.load %arg4[%c1_32, %c0_33, %c0_34] : memref<9x32x64xbf16, #tpu.memory_space<vmem>>, vector<1x32x64xbf16>
    %19 = vector.shape_cast %18 : vector<1x32x64xbf16> to vector<32x64xbf16>
    "tpu.trace_start"() <{level = 10 : i32, message = "ck,lk->cl"}> : () -> ()
    %cst_35 = arith.constant dense<0.000000e+00> : vector<32x71xf32>
    %20 = tpu.matmul %19, %15, %cst_35 {dimension_numbers = #tpu.dot_dimension_numbers<[1], [1], [0], [0], [0, 0, 1, 0], [], []>} : vector<32x64xbf16>, vector<71x64xbf16>, vector<32x71xf32> -> vector<32x71xf32>
    "tpu.trace_stop"() : () -> ()
    %21 = arith.addf %13, %20 : vector<32x71xf32>
    %c1_36 = arith.constant 1 : index
    %c0_37 = arith.constant 0 : index
    %c0_38 = arith.constant 0 : index
    %22 = vector.load %arg5[%c1_36, %c0_37, %c0_38] : memref<9x32x32xbf16, #tpu.memory_space<vmem>>, vector<1x32x32xbf16>
    %23 = vector.shape_cast %22 : vector<1x32x32xbf16> to vector<32x32xbf16>
    "tpu.trace_start"() <{level = 10 : i32, message = "ck,lk->cl"}> : () -> ()
    %cst_39 = arith.constant dense<0.000000e+00> : vector<32x71xf32>
    %24 = tpu.matmul %23, %17, %cst_39 {dimension_numbers = #tpu.dot_dimension_numbers<[1], [1], [0], [0], [0, 0, 1, 0], [], []>} : vector<32x32xbf16>, vector<71x32xbf16>, vector<32x71xf32> -> vector<32x71xf32>
    "tpu.trace_stop"() : () -> ()
    %25 = arith.addf %21, %24 : vector<32x71xf32>
    %c0_40 = arith.constant 0 : index
    %c0_41 = arith.constant 0 : index
    %c0_42 = arith.constant 0 : index
    %c0_43 = arith.constant 0 : index
    %c9 = arith.constant 9 : index
    %c0_44 = arith.constant 0 : index
    %26 = vector.load %arg2[%c0_40, %c0_41, %c0_42, %c0_43, %c9, %c0_44] : memref<1x2x2x2x81x64xbf16, #tpu.memory_space<vmem>>, vector<1x1x1x1x71x64xbf16>
    %27 = vector.shape_cast %26 : vector<1x1x1x1x71x64xbf16> to vector<71x64xbf16>
    %c0_45 = arith.constant 0 : index
    %c0_46 = arith.constant 0 : index
    %c0_47 = arith.constant 0 : index
    %c0_48 = arith.constant 0 : index
    %c10 = arith.constant 10 : index
    %c0_49 = arith.constant 0 : index
    %28 = vector.load %arg2[%c0_45, %c0_46, %c0_47, %c0_48, %c10, %c0_49] : memref<1x2x2x2x81x64xbf16, #tpu.memory_space<vmem>>, vector<1x1x1x1x71x32xbf16>
    %29 = vector.shape_cast %28 : vector<1x1x1x1x71x32xbf16> to vector<71x32xbf16>
    %c2 = arith.constant 2 : index
    %c0_50 = arith.constant 0 : index
    %c0_51 = arith.constant 0 : index
    %30 = vector.load %arg4[%c2, %c0_50, %c0_51] : memref<9x32x64xbf16, #tpu.memory_space<vmem>>, vector<1x32x64xbf16>
    %31 = vector.shape_cast %30 : vector<1x32x64xbf16> to vector<32x64xbf16>
    "tpu.trace_start"() <{level = 10 : i32, message = "ck,lk->cl"}> : () -> ()
    %cst_52 = arith.constant dense<0.000000e+00> : vector<32x71xf32>
    %32 = tpu.matmul %31, %27, %cst_52 {dimension_numbers = #tpu.dot_dimension_numbers<[1], [1], [0], [0], [0, 0, 1, 0], [], []>} : vector<32x64xbf16>, vector<71x64xbf16>, vector<32x71xf32> -> vector<32x71xf32>
    "tpu.trace_stop"() : () -> ()
    %33 = arith.addf %25, %32 : vector<32x71xf32>
    %c2_53 = arith.constant 2 : index
    %c0_54 = arith.constant 0 : index
    %c0_55 = arith.constant 0 : index
    %34 = vector.load %arg5[%c2_53, %c0_54, %c0_55] : memref<9x32x32xbf16, #tpu.memory_space<vmem>>, vector<1x32x32xbf16>
    %35 = vector.shape_cast %34 : vector<1x32x32xbf16> to vector<32x32xbf16>
    "tpu.trace_start"() <{level = 10 : i32, message = "ck,lk->cl"}> : () -> ()
    %cst_56 = arith.constant dense<0.000000e+00> : vector<32x71xf32>
    %36 = tpu.matmul %35, %29, %cst_56 {dimension_numbers = #tpu.dot_dimension_numbers<[1], [1], [0], [0], [0, 0, 1, 0], [], []>} : vector<32x32xbf16>, vector<71x32xbf16>, vector<32x71xf32> -> vector<32x71xf32>
    "tpu.trace_stop"() : () -> ()
    %37 = arith.addf %33, %36 : vector<32x71xf32>
    %c0_57 = arith.constant 0 : index
    %c1_58 = arith.constant 1 : index
    %c0_59 = arith.constant 0 : index
    %c0_60 = arith.constant 0 : index
    %c0_61 = arith.constant 0 : index
    %c0_62 = arith.constant 0 : index
    %38 = vector.load %arg2[%c0_57, %c1_58, %c0_59, %c0_60, %c0_61, %c0_62] : memref<1x2x2x2x81x64xbf16, #tpu.memory_space<vmem>>, vector<1x1x1x1x71x64xbf16>
    %39 = vector.shape_cast %38 : vector<1x1x1x1x71x64xbf16> to vector<71x64xbf16>
    %c0_63 = arith.constant 0 : index
    %c1_64 = arith.constant 1 : index
    %c0_65 = arith.constant 0 : index
    %c0_66 = arith.constant 0 : index
    %c1_67 = arith.constant 1 : index
    %c0_68 = arith.constant 0 : index
    %40 = vector.load %arg2[%c0_63, %c1_64, %c0_65, %c0_66, %c1_67, %c0_68] : memref<1x2x2x2x81x64xbf16, #tpu.memory_space<vmem>>, vector<1x1x1x1x71x32xbf16>
    %41 = vector.shape_cast %40 : vector<1x1x1x1x71x32xbf16> to vector<71x32xbf16>
    %c3 = arith.constant 3 : index
    %c0_69 = arith.constant 0 : index
    %c0_70 = arith.constant 0 : index
    %42 = vector.load %arg4[%c3, %c0_69, %c0_70] : memref<9x32x64xbf16, #tpu.memory_space<vmem>>, vector<1x32x64xbf16>
    %43 = vector.shape_cast %42 : vector<1x32x64xbf16> to vector<32x64xbf16>
    "tpu.trace_start"() <{level = 10 : i32, message = "ck,lk->cl"}> : () -> ()
    %cst_71 = arith.constant dense<0.000000e+00> : vector<32x71xf32>
    %44 = tpu.matmul %43, %39, %cst_71 {dimension_numbers = #tpu.dot_dimension_numbers<[1], [1], [0], [0], [0, 0, 1, 0], [], []>} : vector<32x64xbf16>, vector<71x64xbf16>, vector<32x71xf32> -> vector<32x71xf32>
    "tpu.trace_stop"() : () -> ()
    %45 = arith.addf %37, %44 : vector<32x71xf32>
    %c3_72 = arith.constant 3 : index
    %c0_73 = arith.constant 0 : index
    %c0_74 = arith.constant 0 : index
    %46 = vector.load %arg5[%c3_72, %c0_73, %c0_74] : memref<9x32x32xbf16, #tpu.memory_space<vmem>>, vector<1x32x32xbf16>
    %47 = vector.shape_cast %46 : vector<1x32x32xbf16> to vector<32x32xbf16>
    "tpu.trace_start"() <{level = 10 : i32, message = "ck,lk->cl"}> : () -> ()
    %cst_75 = arith.constant dense<0.000000e+00> : vector<32x71xf32>
    %48 = tpu.matmul %47, %41, %cst_75 {dimension_numbers = #tpu.dot_dimension_numbers<[1], [1], [0], [0], [0, 0, 1, 0], [], []>} : vector<32x32xbf16>, vector<71x32xbf16>, vector<32x71xf32> -> vector<32x71xf32>
    "tpu.trace_stop"() : () -> ()
    %49 = arith.addf %45, %48 : vector<32x71xf32>
    %c0_76 = arith.constant 0 : index
    %c1_77 = arith.constant 1 : index
    %c1_78 = arith.constant 1 : index
    %c0_79 = arith.constant 0 : index
    %c0_80 = arith.constant 0 : index
    %c0_81 = arith.constant 0 : index
    %50 = vector.load %arg2[%c0_76, %c1_77, %c1_78, %c0_79, %c0_80, %c0_81] : memref<1x2x2x2x81x64xbf16, #tpu.memory_space<vmem>>, vector<1x1x1x1x71x64xbf16>
    %51 = vector.shape_cast %50 : vector<1x1x1x1x71x64xbf16> to vector<71x64xbf16>
    %c0_82 = arith.constant 0 : index
    %c1_83 = arith.constant 1 : index
    %c1_84 = arith.constant 1 : index
    %c0_85 = arith.constant 0 : index
    %c1_86 = arith.constant 1 : index
    %c0_87 = arith.constant 0 : index
    %52 = vector.load %arg2[%c0_82, %c1_83, %c1_84, %c0_85, %c1_86, %c0_87] : memref<1x2x2x2x81x64xbf16, #tpu.memory_space<vmem>>, vector<1x1x1x1x71x32xbf16>
    %53 = vector.shape_cast %52 : vector<1x1x1x1x71x32xbf16> to vector<71x32xbf16>
    %c4 = arith.constant 4 : index
    %c0_88 = arith.constant 0 : index
    %c0_89 = arith.constant 0 : index
    %54 = vector.load %arg4[%c4, %c0_88, %c0_89] : memref<9x32x64xbf16, #tpu.memory_space<vmem>>, vector<1x32x64xbf16>
    %55 = vector.shape_cast %54 : vector<1x32x64xbf16> to vector<32x64xbf16>
    "tpu.trace_start"() <{level = 10 : i32, message = "ck,lk->cl"}> : () -> ()
    %cst_90 = arith.constant dense<0.000000e+00> : vector<32x71xf32>
    %56 = tpu.matmul %55, %51, %cst_90 {dimension_numbers = #tpu.dot_dimension_numbers<[1], [1], [0], [0], [0, 0, 1, 0], [], []>} : vector<32x64xbf16>, vector<71x64xbf16>, vector<32x71xf32> -> vector<32x71xf32>
    "tpu.trace_stop"() : () -> ()
    %57 = arith.addf %49, %56 : vector<32x71xf32>
    %c4_91 = arith.constant 4 : index
    %c0_92 = arith.constant 0 : index
    %c0_93 = arith.constant 0 : index
    %58 = vector.load %arg5[%c4_91, %c0_92, %c0_93] : memref<9x32x32xbf16, #tpu.memory_space<vmem>>, vector<1x32x32xbf16>
    %59 = vector.shape_cast %58 : vector<1x32x32xbf16> to vector<32x32xbf16>
    "tpu.trace_start"() <{level = 10 : i32, message = "ck,lk->cl"}> : () -> ()
    %cst_94 = arith.constant dense<0.000000e+00> : vector<32x71xf32>
    %60 = tpu.matmul %59, %53, %cst_94 {dimension_numbers = #tpu.dot_dimension_numbers<[1], [1], [0], [0], [0, 0, 1, 0], [], []>} : vector<32x32xbf16>, vector<71x32xbf16>, vector<32x71xf32> -> vector<32x71xf32>
    "tpu.trace_stop"() : () -> ()
    %61 = arith.addf %57, %60 : vector<32x71xf32>
    %c0_95 = arith.constant 0 : index
    %c1_96 = arith.constant 1 : index
    %c0_97 = arith.constant 0 : index
    %c0_98 = arith.constant 0 : index
    %c9_99 = arith.constant 9 : index
    %c0_100 = arith.constant 0 : index
    %62 = vector.load %arg2[%c0_95, %c1_96, %c0_97, %c0_98, %c9_99, %c0_100] : memref<1x2x2x2x81x64xbf16, #tpu.memory_space<vmem>>, vector<1x1x1x1x71x64xbf16>
    %63 = vector.shape_cast %62 : vector<1x1x1x1x71x64xbf16> to vector<71x64xbf16>
    %c0_101 = arith.constant 0 : index
    %c1_102 = arith.constant 1 : index
    %c0_103 = arith.constant 0 : index
    %c0_104 = arith.constant 0 : index
    %c10_105 = arith.constant 10 : index
    %c0_106 = arith.constant 0 : index
    %64 = vector.load %arg2[%c0_101, %c1_102, %c0_103, %c0_104, %c10_105, %c0_106] : memref<1x2x2x2x81x64xbf16, #tpu.memory_space<vmem>>, vector<1x1x1x1x71x32xbf16>
    %65 = vector.shape_cast %64 : vector<1x1x1x1x71x32xbf16> to vector<71x32xbf16>
    %c5 = arith.constant 5 : index
    %c0_107 = arith.constant 0 : index
    %c0_108 = arith.constant 0 : index
    %66 = vector.load %arg4[%c5, %c0_107, %c0_108] : memref<9x32x64xbf16, #tpu.memory_space<vmem>>, vector<1x32x64xbf16>
    %67 = vector.shape_cast %66 : vector<1x32x64xbf16> to vector<32x64xbf16>
    "tpu.trace_start"() <{level = 10 : i32, message = "ck,lk->cl"}> : () -> ()
    %cst_109 = arith.constant dense<0.000000e+00> : vector<32x71xf32>
    %68 = tpu.matmul %67, %63, %cst_109 {dimension_numbers = #tpu.dot_dimension_numbers<[1], [1], [0], [0], [0, 0, 1, 0], [], []>} : vector<32x64xbf16>, vector<71x64xbf16>, vector<32x71xf32> -> vector<32x71xf32>
    "tpu.trace_stop"() : () -> ()
    %69 = arith.addf %61, %68 : vector<32x71xf32>
    %c5_110 = arith.constant 5 : index
    %c0_111 = arith.constant 0 : index
    %c0_112 = arith.constant 0 : index
    %70 = vector.load %arg5[%c5_110, %c0_111, %c0_112] : memref<9x32x32xbf16, #tpu.memory_space<vmem>>, vector<1x32x32xbf16>
    %71 = vector.shape_cast %70 : vector<1x32x32xbf16> to vector<32x32xbf16>
    "tpu.trace_start"() <{level = 10 : i32, message = "ck,lk->cl"}> : () -> ()
    %cst_113 = arith.constant dense<0.000000e+00> : vector<32x71xf32>
    %72 = tpu.matmul %71, %65, %cst_113 {dimension_numbers = #tpu.dot_dimension_numbers<[1], [1], [0], [0], [0, 0, 1, 0], [], []>} : vector<32x32xbf16>, vector<71x32xbf16>, vector<32x71xf32> -> vector<32x71xf32>
    "tpu.trace_stop"() : () -> ()
    %73 = arith.addf %69, %72 : vector<32x71xf32>
    %c0_114 = arith.constant 0 : index
    %c0_115 = arith.constant 0 : index
    %c0_116 = arith.constant 0 : index
    %c1_117 = arith.constant 1 : index
    %c0_118 = arith.constant 0 : index
    %c0_119 = arith.constant 0 : index
    %74 = vector.load %arg2[%c0_114, %c0_115, %c0_116, %c1_117, %c0_118, %c0_119] : memref<1x2x2x2x81x64xbf16, #tpu.memory_space<vmem>>, vector<1x1x1x1x71x64xbf16>
    %75 = vector.shape_cast %74 : vector<1x1x1x1x71x64xbf16> to vector<71x64xbf16>
    %c0_120 = arith.constant 0 : index
    %c0_121 = arith.constant 0 : index
    %c0_122 = arith.constant 0 : index
    %c1_123 = arith.constant 1 : index
    %c1_124 = arith.constant 1 : index
    %c0_125 = arith.constant 0 : index
    %76 = vector.load %arg2[%c0_120, %c0_121, %c0_122, %c1_123, %c1_124, %c0_125] : memref<1x2x2x2x81x64xbf16, #tpu.memory_space<vmem>>, vector<1x1x1x1x71x32xbf16>
    %77 = vector.shape_cast %76 : vector<1x1x1x1x71x32xbf16> to vector<71x32xbf16>
    %c6 = arith.constant 6 : index
    %c0_126 = arith.constant 0 : index
    %c0_127 = arith.constant 0 : index
    %78 = vector.load %arg4[%c6, %c0_126, %c0_127] : memref<9x32x64xbf16, #tpu.memory_space<vmem>>, vector<1x32x64xbf16>
    %79 = vector.shape_cast %78 : vector<1x32x64xbf16> to vector<32x64xbf16>
    "tpu.trace_start"() <{level = 10 : i32, message = "ck,lk->cl"}> : () -> ()
    %cst_128 = arith.constant dense<0.000000e+00> : vector<32x71xf32>
    %80 = tpu.matmul %79, %75, %cst_128 {dimension_numbers = #tpu.dot_dimension_numbers<[1], [1], [0], [0], [0, 0, 1, 0], [], []>} : vector<32x64xbf16>, vector<71x64xbf16>, vector<32x71xf32> -> vector<32x71xf32>
    "tpu.trace_stop"() : () -> ()
    %81 = arith.addf %73, %80 : vector<32x71xf32>
    %c6_129 = arith.constant 6 : index
    %c0_130 = arith.constant 0 : index
    %c0_131 = arith.constant 0 : index
    %82 = vector.load %arg5[%c6_129, %c0_130, %c0_131] : memref<9x32x32xbf16, #tpu.memory_space<vmem>>, vector<1x32x32xbf16>
    %83 = vector.shape_cast %82 : vector<1x32x32xbf16> to vector<32x32xbf16>
    "tpu.trace_start"() <{level = 10 : i32, message = "ck,lk->cl"}> : () -> ()
    %cst_132 = arith.constant dense<0.000000e+00> : vector<32x71xf32>
    %84 = tpu.matmul %83, %77, %cst_132 {dimension_numbers = #tpu.dot_dimension_numbers<[1], [1], [0], [0], [0, 0, 1, 0], [], []>} : vector<32x32xbf16>, vector<71x32xbf16>, vector<32x71xf32> -> vector<32x71xf32>
    "tpu.trace_stop"() : () -> ()
    %85 = arith.addf %81, %84 : vector<32x71xf32>
    %c0_133 = arith.constant 0 : index
    %c0_134 = arith.constant 0 : index
    %c1_135 = arith.constant 1 : index
    %c1_136 = arith.constant 1 : index
    %c0_137 = arith.constant 0 : index
    %c0_138 = arith.constant 0 : index
    %86 = vector.load %arg2[%c0_133, %c0_134, %c1_135, %c1_136, %c0_137, %c0_138] : memref<1x2x2x2x81x64xbf16, #tpu.memory_space<vmem>>, vector<1x1x1x1x71x64xbf16>
    %87 = vector.shape_cast %86 : vector<1x1x1x1x71x64xbf16> to vector<71x64xbf16>
    %c0_139 = arith.constant 0 : index
    %c0_140 = arith.constant 0 : index
    %c1_141 = arith.constant 1 : index
    %c1_142 = arith.constant 1 : index
    %c1_143 = arith.constant 1 : index
    %c0_144 = arith.constant 0 : index
    %88 = vector.load %arg2[%c0_139, %c0_140, %c1_141, %c1_142, %c1_143, %c0_144] : memref<1x2x2x2x81x64xbf16, #tpu.memory_space<vmem>>, vector<1x1x1x1x71x32xbf16>
    %89 = vector.shape_cast %88 : vector<1x1x1x1x71x32xbf16> to vector<71x32xbf16>
    %c7 = arith.constant 7 : index
    %c0_145 = arith.constant 0 : index
    %c0_146 = arith.constant 0 : index
    %90 = vector.load %arg4[%c7, %c0_145, %c0_146] : memref<9x32x64xbf16, #tpu.memory_space<vmem>>, vector<1x32x64xbf16>
    %91 = vector.shape_cast %90 : vector<1x32x64xbf16> to vector<32x64xbf16>
    "tpu.trace_start"() <{level = 10 : i32, message = "ck,lk->cl"}> : () -> ()
    %cst_147 = arith.constant dense<0.000000e+00> : vector<32x71xf32>
    %92 = tpu.matmul %91, %87, %cst_147 {dimension_numbers = #tpu.dot_dimension_numbers<[1], [1], [0], [0], [0, 0, 1, 0], [], []>} : vector<32x64xbf16>, vector<71x64xbf16>, vector<32x71xf32> -> vector<32x71xf32>
    "tpu.trace_stop"() : () -> ()
    %93 = arith.addf %85, %92 : vector<32x71xf32>
    %c7_148 = arith.constant 7 : index
    %c0_149 = arith.constant 0 : index
    %c0_150 = arith.constant 0 : index
    %94 = vector.load %arg5[%c7_148, %c0_149, %c0_150] : memref<9x32x32xbf16, #tpu.memory_space<vmem>>, vector<1x32x32xbf16>
    %95 = vector.shape_cast %94 : vector<1x32x32xbf16> to vector<32x32xbf16>
    "tpu.trace_start"() <{level = 10 : i32, message = "ck,lk->cl"}> : () -> ()
    %cst_151 = arith.constant dense<0.000000e+00> : vector<32x71xf32>
    %96 = tpu.matmul %95, %89, %cst_151 {dimension_numbers = #tpu.dot_dimension_numbers<[1], [1], [0], [0], [0, 0, 1, 0], [], []>} : vector<32x32xbf16>, vector<71x32xbf16>, vector<32x71xf32> -> vector<32x71xf32>
    "tpu.trace_stop"() : () -> ()
    %97 = arith.addf %93, %96 : vector<32x71xf32>
    %c0_152 = arith.constant 0 : index
    %c0_153 = arith.constant 0 : index
    %c0_154 = arith.constant 0 : index
    %c1_155 = arith.constant 1 : index
    %c9_156 = arith.constant 9 : index
    %c0_157 = arith.constant 0 : index
    %98 = vector.load %arg2[%c0_152, %c0_153, %c0_154, %c1_155, %c9_156, %c0_157] : memref<1x2x2x2x81x64xbf16, #tpu.memory_space<vmem>>, vector<1x1x1x1x71x64xbf16>
    %99 = vector.shape_cast %98 : vector<1x1x1x1x71x64xbf16> to vector<71x64xbf16>
    %c0_158 = arith.constant 0 : index
    %c0_159 = arith.constant 0 : index
    %c0_160 = arith.constant 0 : index
    %c1_161 = arith.constant 1 : index
    %c10_162 = arith.constant 10 : index
    %c0_163 = arith.constant 0 : index
    %100 = vector.load %arg2[%c0_158, %c0_159, %c0_160, %c1_161, %c10_162, %c0_163] : memref<1x2x2x2x81x64xbf16, #tpu.memory_space<vmem>>, vector<1x1x1x1x71x32xbf16>
    %101 = vector.shape_cast %100 : vector<1x1x1x1x71x32xbf16> to vector<71x32xbf16>
    %c8 = arith.constant 8 : index
    %c0_164 = arith.constant 0 : index
    %c0_165 = arith.constant 0 : index
    %102 = vector.load %arg4[%c8, %c0_164, %c0_165] : memref<9x32x64xbf16, #tpu.memory_space<vmem>>, vector<1x32x64xbf16>
    %103 = vector.shape_cast %102 : vector<1x32x64xbf16> to vector<32x64xbf16>
    "tpu.trace_start"() <{level = 10 : i32, message = "ck,lk->cl"}> : () -> ()
    %cst_166 = arith.constant dense<0.000000e+00> : vector<32x71xf32>
    %104 = tpu.matmul %103, %99, %cst_166 {dimension_numbers = #tpu.dot_dimension_numbers<[1], [1], [0], [0], [0, 0, 1, 0], [], []>} : vector<32x64xbf16>, vector<71x64xbf16>, vector<32x71xf32> -> vector<32x71xf32>
    "tpu.trace_stop"() : () -> ()
    %105 = arith.addf %97, %104 : vector<32x71xf32>
    %c8_167 = arith.constant 8 : index
    %c0_168 = arith.constant 0 : index
    %c0_169 = arith.constant 0 : index
    %106 = vector.load %arg5[%c8_167, %c0_168, %c0_169] : memref<9x32x32xbf16, #tpu.memory_space<vmem>>, vector<1x32x32xbf16>
    %107 = vector.shape_cast %106 : vector<1x32x32xbf16> to vector<32x32xbf16>
    "tpu.trace_start"() <{level = 10 : i32, message = "ck,lk->cl"}> : () -> ()
    %cst_170 = arith.constant dense<0.000000e+00> : vector<32x71xf32>
    %108 = tpu.matmul %107, %101, %cst_170 {dimension_numbers = #tpu.dot_dimension_numbers<[1], [1], [0], [0], [0, 0, 1, 0], [], []>} : vector<32x32xbf16>, vector<71x32xbf16>, vector<32x71xf32> -> vector<32x71xf32>
    "tpu.trace_stop"() : () -> ()
    %109 = arith.addf %105, %108 : vector<32x71xf32>
    %110 = vector.broadcast %0 : vector<32x1xf32> to vector<32x71xf32>
    %111 = arith.addf %109, %110 : vector<32x71xf32>
    %c0_171 = arith.constant 0 : index
    %c0_172 = arith.constant 0 : index
    %c0_173 = arith.constant 0 : index
    %112 = vector.load %arg7[%c0_171, %c0_172, %c0_173] : memref<1x32x162xf32, #tpu.memory_space<vmem>>, vector<1x32x71xf32>
    %113 = vector.shape_cast %112 : vector<1x32x71xf32> to vector<32x71xf32>
    %114 = vector.shape_cast %111 : vector<32x71xf32> to vector<1x32x71xf32>
    tpu.vector_store %arg7[%c0_171, %c0_172, %c0_173], %114 {strides = array<i32>} : memref<1x32x162xf32, #tpu.memory_space<vmem>>, vector<1x32x71xf32>,
    %cst_174 = arith.constant 0.000000e+00 : f32
    %115 = vector.broadcast %cst_174 : f32 to vector<32x71xf32>
    %c0_175 = arith.constant 0 : index
    %c0_176 = arith.constant 0 : index
    %c0_177 = arith.constant 0 : index
    %c1_178 = arith.constant 1 : index
    %c0_179 = arith.constant 0 : index
    %c0_180 = arith.constant 0 : index
    %116 = vector.load %arg2[%c0_175, %c0_176, %c0_177, %c1_178, %c0_179, %c0_180] : memref<1x2x2x2x81x64xbf16, #tpu.memory_space<vmem>>, vector<1x1x1x1x71x64xbf16>
    %117 = vector.shape_cast %116 : vector<1x1x1x1x71x64xbf16> to vector<71x64xbf16>
    %c0_181 = arith.constant 0 : index
    %c0_182 = arith.constant 0 : index
    %c0_183 = arith.constant 0 : index
    %c1_184 = arith.constant 1 : index
    %c1_185 = arith.constant 1 : index
    %c0_186 = arith.constant 0 : index
    %118 = vector.load %arg2[%c0_181, %c0_182, %c0_183, %c1_184, %c1_185, %c0_186] : memref<1x2x2x2x81x64xbf16, #tpu.memory_space<vmem>>, vector<1x1x1x1x71x32xbf16>
    %119 = vector.shape_cast %118 : vector<1x1x1x1x71x32xbf16> to vector<71x32xbf16>
    %c0_187 = arith.constant 0 : index
    %c0_188 = arith.constant 0 : index
    %c0_189 = arith.constant 0 : index
    %120 = vector.load %arg4[%c0_187, %c0_188, %c0_189] : memref<9x32x64xbf16, #tpu.memory_space<vmem>>, vector<1x32x64xbf16>
    %121 = vector.shape_cast %120 : vector<1x32x64xbf16> to vector<32x64xbf16>
    "tpu.trace_start"() <{level = 10 : i32, message = "ck,lk->cl"}> : () -> ()
    %cst_190 = arith.constant dense<0.000000e+00> : vector<32x71xf32>
    %122 = tpu.matmul %121, %117, %cst_190 {dimension_numbers = #tpu.dot_dimension_numbers<[1], [1], [0], [0], [0, 0, 1, 0], [], []>} : vector<32x64xbf16>, vector<71x64xbf16>, vector<32x71xf32> -> vector<32x71xf32>
    "tpu.trace_stop"() : () -> ()
    %123 = arith.addf %115, %122 : vector<32x71xf32>
    %c0_191 = arith.constant 0 : index
    %c0_192 = arith.constant 0 : index
    %c0_193 = arith.constant 0 : index
    %124 = vector.load %arg5[%c0_191, %c0_192, %c0_193] : memref<9x32x32xbf16, #tpu.memory_space<vmem>>, vector<1x32x32xbf16>
    %125 = vector.shape_cast %124 : vector<1x32x32xbf16> to vector<32x32xbf16>
    "tpu.trace_start"() <{level = 10 : i32, message = "ck,lk->cl"}> : () -> ()
    %cst_194 = arith.constant dense<0.000000e+00> : vector<32x71xf32>
    %126 = tpu.matmul %125, %119, %cst_194 {dimension_numbers = #tpu.dot_dimension_numbers<[1], [1], [0], [0], [0, 0, 1, 0], [], []>} : vector<32x32xbf16>, vector<71x32xbf16>, vector<32x71xf32> -> vector<32x71xf32>
    "tpu.trace_stop"() : () -> ()
    %127 = arith.addf %123, %126 : vector<32x71xf32>
    %c0_195 = arith.constant 0 : index
    %c0_196 = arith.constant 0 : index
    %c1_197 = arith.constant 1 : index
    %c1_198 = arith.constant 1 : index
    %c0_199 = arith.constant 0 : index
    %c0_200 = arith.constant 0 : index
    %128 = vector.load %arg2[%c0_195, %c0_196, %c1_197, %c1_198, %c0_199, %c0_200] : memref<1x2x2x2x81x64xbf16, #tpu.memory_space<vmem>>, vector<1x1x1x1x71x64xbf16>
    %129 = vector.shape_cast %128 : vector<1x1x1x1x71x64xbf16> to vector<71x64xbf16>
    %c0_201 = arith.constant 0 : index
    %c0_202 = arith.constant 0 : index
    %c1_203 = arith.constant 1 : index
    %c1_204 = arith.constant 1 : index
    %c1_205 = arith.constant 1 : index
    %c0_206 = arith.constant 0 : index
    %130 = vector.load %arg2[%c0_201, %c0_202, %c1_203, %c1_204, %c1_205, %c0_206] : memref<1x2x2x2x81x64xbf16, #tpu.memory_space<vmem>>, vector<1x1x1x1x71x32xbf16>
    %131 = vector.shape_cast %130 : vector<1x1x1x1x71x32xbf16> to vector<71x32xbf16>
    %c1_207 = arith.constant 1 : index
    %c0_208 = arith.constant 0 : index
    %c0_209 = arith.constant 0 : index
    %132 = vector.load %arg4[%c1_207, %c0_208, %c0_209] : memref<9x32x64xbf16, #tpu.memory_space<vmem>>, vector<1x32x64xbf16>
    %133 = vector.shape_cast %132 : vector<1x32x64xbf16> to vector<32x64xbf16>
    "tpu.trace_start"() <{level = 10 : i32, message = "ck,lk->cl"}> : () -> ()
    %cst_210 = arith.constant dense<0.000000e+00> : vector<32x71xf32>
    %134 = tpu.matmul %133, %129, %cst_210 {dimension_numbers = #tpu.dot_dimension_numbers<[1], [1], [0], [0], [0, 0, 1, 0], [], []>} : vector<32x64xbf16>, vector<71x64xbf16>, vector<32x71xf32> -> vector<32x71xf32>
    "tpu.trace_stop"() : () -> ()
    %135 = arith.addf %127, %134 : vector<32x71xf32>
    %c1_211 = arith.constant 1 : index
    %c0_212 = arith.constant 0 : index
    %c0_213 = arith.constant 0 : index
    %136 = vector.load %arg5[%c1_211, %c0_212, %c0_213] : memref<9x32x32xbf16, #tpu.memory_space<vmem>>, vector<1x32x32xbf16>
    %137 = vector.shape_cast %136 : vector<1x32x32xbf16> to vector<32x32xbf16>
    "tpu.trace_start"() <{level = 10 : i32, message = "ck,lk->cl"}> : () -> ()
    %cst_214 = arith.constant dense<0.000000e+00> : vector<32x71xf32>
    %138 = tpu.matmul %137, %131, %cst_214 {dimension_numbers = #tpu.dot_dimension_numbers<[1], [1], [0], [0], [0, 0, 1, 0], [], []>} : vector<32x32xbf16>, vector<71x32xbf16>, vector<32x71xf32> -> vector<32x71xf32>
    "tpu.trace_stop"() : () -> ()
    %139 = arith.addf %135, %138 : vector<32x71xf32>
    %c0_215 = arith.constant 0 : index
    %c0_216 = arith.constant 0 : index
    %c0_217 = arith.constant 0 : index
    %c1_218 = arith.constant 1 : index
    %c9_219 = arith.constant 9 : index
    %c0_220 = arith.constant 0 : index
    %140 = vector.load %arg2[%c0_215, %c0_216, %c0_217, %c1_218, %c9_219, %c0_220] : memref<1x2x2x2x81x64xbf16, #tpu.memory_space<vmem>>, vector<1x1x1x1x71x64xbf16>
    %141 = vector.shape_cast %140 : vector<1x1x1x1x71x64xbf16> to vector<71x64xbf16>
    %c0_221 = arith.constant 0 : index
    %c0_222 = arith.constant 0 : index
    %c0_223 = arith.constant 0 : index
    %c1_224 = arith.constant 1 : index
    %c10_225 = arith.constant 10 : index
    %c0_226 = arith.constant 0 : index
    %142 = vector.load %arg2[%c0_221, %c0_222, %c0_223, %c1_224, %c10_225, %c0_226] : memref<1x2x2x2x81x64xbf16, #tpu.memory_space<vmem>>, vector<1x1x1x1x71x32xbf16>
    %143 = vector.shape_cast %142 : vector<1x1x1x1x71x32xbf16> to vector<71x32xbf16>
    %c2_227 = arith.constant 2 : index
    %c0_228 = arith.constant 0 : index
    %c0_229 = arith.constant 0 : index
    %144 = vector.load %arg4[%c2_227, %c0_228, %c0_229] : memref<9x32x64xbf16, #tpu.memory_space<vmem>>, vector<1x32x64xbf16>
    %145 = vector.shape_cast %144 : vector<1x32x64xbf16> to vector<32x64xbf16>
    "tpu.trace_start"() <{level = 10 : i32, message = "ck,lk->cl"}> : () -> ()
    %cst_230 = arith.constant dense<0.000000e+00> : vector<32x71xf32>
    %146 = tpu.matmul %145, %141, %cst_230 {dimension_numbers = #tpu.dot_dimension_numbers<[1], [1], [0], [0], [0, 0, 1, 0], [], []>} : vector<32x64xbf16>, vector<71x64xbf16>, vector<32x71xf32> -> vector<32x71xf32>
    "tpu.trace_stop"() : () -> ()
    %147 = arith.addf %139, %146 : vector<32x71xf32>
    %c2_231 = arith.constant 2 : index
    %c0_232 = arith.constant 0 : index
    %c0_233 = arith.constant 0 : index
    %148 = vector.load %arg5[%c2_231, %c0_232, %c0_233] : memref<9x32x32xbf16, #tpu.memory_space<vmem>>, vector<1x32x32xbf16>
    %149 = vector.shape_cast %148 : vector<1x32x32xbf16> to vector<32x32xbf16>
    "tpu.trace_start"() <{level = 10 : i32, message = "ck,lk->cl"}> : () -> ()
    %cst_234 = arith.constant dense<0.000000e+00> : vector<32x71xf32>
    %150 = tpu.matmul %149, %143, %cst_234 {dimension_numbers = #tpu.dot_dimension_numbers<[1], [1], [0], [0], [0, 0, 1, 0], [], []>} : vector<32x32xbf16>, vector<71x32xbf16>, vector<32x71xf32> -> vector<32x71xf32>
    "tpu.trace_stop"() : () -> ()
    %151 = arith.addf %147, %150 : vector<32x71xf32>
    %c0_235 = arith.constant 0 : index
    %c1_236 = arith.constant 1 : index
    %c0_237 = arith.constant 0 : index
    %c1_238 = arith.constant 1 : index
    %c0_239 = arith.constant 0 : index
    %c0_240 = arith.constant 0 : index
    %152 = vector.load %arg2[%c0_235, %c1_236, %c0_237, %c1_238, %c0_239, %c0_240] : memref<1x2x2x2x81x64xbf16, #tpu.memory_space<vmem>>, vector<1x1x1x1x71x64xbf16>
    %153 = vector.shape_cast %152 : vector<1x1x1x1x71x64xbf16> to vector<71x64xbf16>
    %c0_241 = arith.constant 0 : index
    %c1_242 = arith.constant 1 : index
    %c0_243 = arith.constant 0 : index
    %c1_244 = arith.constant 1 : index
    %c1_245 = arith.constant 1 : index
    %c0_246 = arith.constant 0 : index
    %154 = vector.load %arg2[%c0_241, %c1_242, %c0_243, %c1_244, %c1_245, %c0_246] : memref<1x2x2x2x81x64xbf16, #tpu.memory_space<vmem>>, vector<1x1x1x1x71x32xbf16>
    %155 = vector.shape_cast %154 : vector<1x1x1x1x71x32xbf16> to vector<71x32xbf16>
    %c3_247 = arith.constant 3 : index
    %c0_248 = arith.constant 0 : index
    %c0_249 = arith.constant 0 : index
    %156 = vector.load %arg4[%c3_247, %c0_248, %c0_249] : memref<9x32x64xbf16, #tpu.memory_space<vmem>>, vector<1x32x64xbf16>
    %157 = vector.shape_cast %156 : vector<1x32x64xbf16> to vector<32x64xbf16>
    "tpu.trace_start"() <{level = 10 : i32, message = "ck,lk->cl"}> : () -> ()
    %cst_250 = arith.constant dense<0.000000e+00> : vector<32x71xf32>
    %158 = tpu.matmul %157, %153, %cst_250 {dimension_numbers = #tpu.dot_dimension_numbers<[1], [1], [0], [0], [0, 0, 1, 0], [], []>} : vector<32x64xbf16>, vector<71x64xbf16>, vector<32x71xf32> -> vector<32x71xf32>
    "tpu.trace_stop"() : () -> ()
    %159 = arith.addf %151, %158 : vector<32x71xf32>
    %c3_251 = arith.constant 3 : index
    %c0_252 = arith.constant 0 : index
    %c0_253 = arith.constant 0 : index
    %160 = vector.load %arg5[%c3_251, %c0_252, %c0_253] : memref<9x32x32xbf16, #tpu.memory_space<vmem>>, vector<1x32x32xbf16>
    %161 = vector.shape_cast %160 : vector<1x32x32xbf16> to vector<32x32xbf16>
    "tpu.trace_start"() <{level = 10 : i32, message = "ck,lk->cl"}> : () -> ()
    %cst_254 = arith.constant dense<0.000000e+00> : vector<32x71xf32>
    %162 = tpu.matmul %161, %155, %cst_254 {dimension_numbers = #tpu.dot_dimension_numbers<[1], [1], [0], [0], [0, 0, 1, 0], [], []>} : vector<32x32xbf16>, vector<71x32xbf16>, vector<32x71xf32> -> vector<32x71xf32>
    "tpu.trace_stop"() : () -> ()
    %163 = arith.addf %159, %162 : vector<32x71xf32>
    %c0_255 = arith.constant 0 : index
    %c1_256 = arith.constant 1 : index
    %c1_257 = arith.constant 1 : index
    %c1_258 = arith.constant 1 : index
    %c0_259 = arith.constant 0 : index
    %c0_260 = arith.constant 0 : index
    %164 = vector.load %arg2[%c0_255, %c1_256, %c1_257, %c1_258, %c0_259, %c0_260] : memref<1x2x2x2x81x64xbf16, #tpu.memory_space<vmem>>, vector<1x1x1x1x71x64xbf16>
    %165 = vector.shape_cast %164 : vector<1x1x1x1x71x64xbf16> to vector<71x64xbf16>
    %c0_261 = arith.constant 0 : index
    %c1_262 = arith.constant 1 : index
    %c1_263 = arith.constant 1 : index
    %c1_264 = arith.constant 1 : index
    %c1_265 = arith.constant 1 : index
    %c0_266 = arith.constant 0 : index
    %166 = vector.load %arg2[%c0_261, %c1_262, %c1_263, %c1_264, %c1_265, %c0_266] : memref<1x2x2x2x81x64xbf16, #tpu.memory_space<vmem>>, vector<1x1x1x1x71x32xbf16>
    %167 = vector.shape_cast %166 : vector<1x1x1x1x71x32xbf16> to vector<71x32xbf16>
    %c4_267 = arith.constant 4 : index
    %c0_268 = arith.constant 0 : index
    %c0_269 = arith.constant 0 : index
    %168 = vector.load %arg4[%c4_267, %c0_268, %c0_269] : memref<9x32x64xbf16, #tpu.memory_space<vmem>>, vector<1x32x64xbf16>
    %169 = vector.shape_cast %168 : vector<1x32x64xbf16> to vector<32x64xbf16>
    "tpu.trace_start"() <{level = 10 : i32, message = "ck,lk->cl"}> : () -> ()
    %cst_270 = arith.constant dense<0.000000e+00> : vector<32x71xf32>
    %170 = tpu.matmul %169, %165, %cst_270 {dimension_numbers = #tpu.dot_dimension_numbers<[1], [1], [0], [0], [0, 0, 1, 0], [], []>} : vector<32x64xbf16>, vector<71x64xbf16>, vector<32x71xf32> -> vector<32x71xf32>
    "tpu.trace_stop"() : () -> ()
    %171 = arith.addf %163, %170 : vector<32x71xf32>
    %c4_271 = arith.constant 4 : index
    %c0_272 = arith.constant 0 : index
    %c0_273 = arith.constant 0 : index
    %172 = vector.load %arg5[%c4_271, %c0_272, %c0_273] : memref<9x32x32xbf16, #tpu.memory_space<vmem>>, vector<1x32x32xbf16>
    %173 = vector.shape_cast %172 : vector<1x32x32xbf16> to vector<32x32xbf16>
    "tpu.trace_start"() <{level = 10 : i32, message = "ck,lk->cl"}> : () -> ()
    %cst_274 = arith.constant dense<0.000000e+00> : vector<32x71xf32>
    %174 = tpu.matmul %173, %167, %cst_274 {dimension_numbers = #tpu.dot_dimension_numbers<[1], [1], [0], [0], [0, 0, 1, 0], [], []>} : vector<32x32xbf16>, vector<71x32xbf16>, vector<32x71xf32> -> vector<32x71xf32>
    "tpu.trace_stop"() : () -> ()
    %175 = arith.addf %171, %174 : vector<32x71xf32>
    %c0_275 = arith.constant 0 : index
    %c1_276 = arith.constant 1 : index
    %c0_277 = arith.constant 0 : index
    %c1_278 = arith.constant 1 : index
    %c9_279 = arith.constant 9 : index
    %c0_280 = arith.constant 0 : index
    %176 = vector.load %arg2[%c0_275, %c1_276, %c0_277, %c1_278, %c9_279, %c0_280] : memref<1x2x2x2x81x64xbf16, #tpu.memory_space<vmem>>, vector<1x1x1x1x71x64xbf16>
    %177 = vector.shape_cast %176 : vector<1x1x1x1x71x64xbf16> to vector<71x64xbf16>
    %c0_281 = arith.constant 0 : index
    %c1_282 = arith.constant 1 : index
    %c0_283 = arith.constant 0 : index
    %c1_284 = arith.constant 1 : index
    %c10_285 = arith.constant 10 : index
    %c0_286 = arith.constant 0 : index
    %178 = vector.load %arg2[%c0_281, %c1_282, %c0_283, %c1_284, %c10_285, %c0_286] : memref<1x2x2x2x81x64xbf16, #tpu.memory_space<vmem>>, vector<1x1x1x1x71x32xbf16>
    %179 = vector.shape_cast %178 : vector<1x1x1x1x71x32xbf16> to vector<71x32xbf16>
    %c5_287 = arith.constant 5 : index
    %c0_288 = arith.constant 0 : index
    %c0_289 = arith.constant 0 : index
    %180 = vector.load %arg4[%c5_287, %c0_288, %c0_289] : memref<9x32x64xbf16, #tpu.memory_space<vmem>>, vector<1x32x64xbf16>
    %181 = vector.shape_cast %180 : vector<1x32x64xbf16> to vector<32x64xbf16>
    "tpu.trace_start"() <{level = 10 : i32, message = "ck,lk->cl"}> : () -> ()
    %cst_290 = arith.constant dense<0.000000e+00> : vector<32x71xf32>
    %182 = tpu.matmul %181, %177, %cst_290 {dimension_numbers = #tpu.dot_dimension_numbers<[1], [1], [0], [0], [0, 0, 1, 0], [], []>} : vector<32x64xbf16>, vector<71x64xbf16>, vector<32x71xf32> -> vector<32x71xf32>
    "tpu.trace_stop"() : () -> ()
    %183 = arith.addf %175, %182 : vector<32x71xf32>
    %c5_291 = arith.constant 5 : index
    %c0_292 = arith.constant 0 : index
    %c0_293 = arith.constant 0 : index
    %184 = vector.load %arg5[%c5_291, %c0_292, %c0_293] : memref<9x32x32xbf16, #tpu.memory_space<vmem>>, vector<1x32x32xbf16>
    %185 = vector.shape_cast %184 : vector<1x32x32xbf16> to vector<32x32xbf16>
    "tpu.trace_start"() <{level = 10 : i32, message = "ck,lk->cl"}> : () -> ()
    %cst_294 = arith.constant dense<0.000000e+00> : vector<32x71xf32>
    %186 = tpu.matmul %185, %179, %cst_294 {dimension_numbers = #tpu.dot_dimension_numbers<[1], [1], [0], [0], [0, 0, 1, 0], [], []>} : vector<32x32xbf16>, vector<71x32xbf16>, vector<32x71xf32> -> vector<32x71xf32>
    "tpu.trace_stop"() : () -> ()
    %187 = arith.addf %183, %186 : vector<32x71xf32>
    %c0_295 = arith.constant 0 : index
    %c0_296 = arith.constant 0 : index
    %c0_297 = arith.constant 0 : index
    %c0_298 = arith.constant 0 : index
    %c0_299 = arith.constant 0 : index
    %c0_300 = arith.constant 0 : index
    %188 = vector.load %arg3[%c0_295, %c0_296, %c0_297, %c0_298, %c0_299, %c0_300] : memref<1x2x2x1x81x64xbf16, #tpu.memory_space<vmem>>, vector<1x1x1x1x71x64xbf16>
    %189 = vector.shape_cast %188 : vector<1x1x1x1x71x64xbf16> to vector<71x64xbf16>
    %c0_301 = arith.constant 0 : index
    %c0_302 = arith.constant 0 : index
    %c0_303 = arith.constant 0 : index
    %c0_304 = arith.constant 0 : index
    %c1_305 = arith.constant 1 : index
    %c0_306 = arith.constant 0 : index
    %190 = vector.load %arg3[%c0_301, %c0_302, %c0_303, %c0_304, %c1_305, %c0_306] : memref<1x2x2x1x81x64xbf16, #tpu.memory_space<vmem>>, vector<1x1x1x1x71x32xbf16>
    %191 = vector.shape_cast %190 : vector<1x1x1x1x71x32xbf16> to vector<71x32xbf16>
    %c6_307 = arith.constant 6 : index
    %c0_308 = arith.constant 0 : index
    %c0_309 = arith.constant 0 : index
    %192 = vector.load %arg4[%c6_307, %c0_308, %c0_309] : memref<9x32x64xbf16, #tpu.memory_space<vmem>>, vector<1x32x64xbf16>
    %193 = vector.shape_cast %192 : vector<1x32x64xbf16> to vector<32x64xbf16>
    "tpu.trace_start"() <{level = 10 : i32, message = "ck,lk->cl"}> : () -> ()
    %cst_310 = arith.constant dense<0.000000e+00> : vector<32x71xf32>
    %194 = tpu.matmul %193, %189, %cst_310 {dimension_numbers = #tpu.dot_dimension_numbers<[1], [1], [0], [0], [0, 0, 1, 0], [], []>} : vector<32x64xbf16>, vector<71x64xbf16>, vector<32x71xf32> -> vector<32x71xf32>
    "tpu.trace_stop"() : () -> ()
    %195 = arith.addf %187, %194 : vector<32x71xf32>
    %c6_311 = arith.constant 6 : index
    %c0_312 = arith.constant 0 : index
    %c0_313 = arith.constant 0 : index
    %196 = vector.load %arg5[%c6_311, %c0_312, %c0_313] : memref<9x32x32xbf16, #tpu.memory_space<vmem>>, vector<1x32x32xbf16>
    %197 = vector.shape_cast %196 : vector<1x32x32xbf16> to vector<32x32xbf16>
    "tpu.trace_start"() <{level = 10 : i32, message = "ck,lk->cl"}> : () -> ()
    %cst_314 = arith.constant dense<0.000000e+00> : vector<32x71xf32>
    %198 = tpu.matmul %197, %191, %cst_314 {dimension_numbers = #tpu.dot_dimension_numbers<[1], [1], [0], [0], [0, 0, 1, 0], [], []>} : vector<32x32xbf16>, vector<71x32xbf16>, vector<32x71xf32> -> vector<32x71xf32>
    "tpu.trace_stop"() : () -> ()
    %199 = arith.addf %195, %198 : vector<32x71xf32>
    %c0_315 = arith.constant 0 : index
    %c0_316 = arith.constant 0 : index
    %c1_317 = arith.constant 1 : index
    %c0_318 = arith.constant 0 : index
    %c0_319 = arith.constant 0 : index
    %c0_320 = arith.constant 0 : index
    %200 = vector.load %arg3[%c0_315, %c0_316, %c1_317, %c0_318, %c0_319, %c0_320] : memref<1x2x2x1x81x64xbf16, #tpu.memory_space<vmem>>, vector<1x1x1x1x71x64xbf16>
    %201 = vector.shape_cast %200 : vector<1x1x1x1x71x64xbf16> to vector<71x64xbf16>
    %c0_321 = arith.constant 0 : index
    %c0_322 = arith.constant 0 : index
    %c1_323 = arith.constant 1 : index
    %c0_324 = arith.constant 0 : index
    %c1_325 = arith.constant 1 : index
    %c0_326 = arith.constant 0 : index
    %202 = vector.load %arg3[%c0_321, %c0_322, %c1_323, %c0_324, %c1_325, %c0_326] : memref<1x2x2x1x81x64xbf16, #tpu.memory_space<vmem>>, vector<1x1x1x1x71x32xbf16>
    %203 = vector.shape_cast %202 : vector<1x1x1x1x71x32xbf16> to vector<71x32xbf16>
    %c7_327 = arith.constant 7 : index
    %c0_328 = arith.constant 0 : index
    %c0_329 = arith.constant 0 : index
    %204 = vector.load %arg4[%c7_327, %c0_328, %c0_329] : memref<9x32x64xbf16, #tpu.memory_space<vmem>>, vector<1x32x64xbf16>
    %205 = vector.shape_cast %204 : vector<1x32x64xbf16> to vector<32x64xbf16>
    "tpu.trace_start"() <{level = 10 : i32, message = "ck,lk->cl"}> : () -> ()
    %cst_330 = arith.constant dense<0.000000e+00> : vector<32x71xf32>
    %206 = tpu.matmul %205, %201, %cst_330 {dimension_numbers = #tpu.dot_dimension_numbers<[1], [1], [0], [0], [0, 0, 1, 0], [], []>} : vector<32x64xbf16>, vector<71x64xbf16>, vector<32x71xf32> -> vector<32x71xf32>
    "tpu.trace_stop"() : () -> ()
    %207 = arith.addf %199, %206 : vector<32x71xf32>
    %c7_331 = arith.constant 7 : index
    %c0_332 = arith.constant 0 : index
    %c0_333 = arith.constant 0 : index
    %208 = vector.load %arg5[%c7_331, %c0_332, %c0_333] : memref<9x32x32xbf16, #tpu.memory_space<vmem>>, vector<1x32x32xbf16>
    %209 = vector.shape_cast %208 : vector<1x32x32xbf16> to vector<32x32xbf16>
    "tpu.trace_start"() <{level = 10 : i32, message = "ck,lk->cl"}> : () -> ()
    %cst_334 = arith.constant dense<0.000000e+00> : vector<32x71xf32>
    %210 = tpu.matmul %209, %203, %cst_334 {dimension_numbers = #tpu.dot_dimension_numbers<[1], [1], [0], [0], [0, 0, 1, 0], [], []>} : vector<32x32xbf16>, vector<71x32xbf16>, vector<32x71xf32> -> vector<32x71xf32>
    "tpu.trace_stop"() : () -> ()
    %211 = arith.addf %207, %210 : vector<32x71xf32>
    %c0_335 = arith.constant 0 : index
    %c0_336 = arith.constant 0 : index
    %c0_337 = arith.constant 0 : index
    %c0_338 = arith.constant 0 : index
    %c9_339 = arith.constant 9 : index
    %c0_340 = arith.constant 0 : index
    %212 = vector.load %arg3[%c0_335, %c0_336, %c0_337, %c0_338, %c9_339, %c0_340] : memref<1x2x2x1x81x64xbf16, #tpu.memory_space<vmem>>, vector<1x1x1x1x71x64xbf16>
    %213 = vector.shape_cast %212 : vector<1x1x1x1x71x64xbf16> to vector<71x64xbf16>
    %c0_341 = arith.constant 0 : index
    %c0_342 = arith.constant 0 : index
    %c0_343 = arith.constant 0 : index
    %c0_344 = arith.constant 0 : index
    %c10_345 = arith.constant 10 : index
    %c0_346 = arith.constant 0 : index
    %214 = vector.load %arg3[%c0_341, %c0_342, %c0_343, %c0_344, %c10_345, %c0_346] : memref<1x2x2x1x81x64xbf16, #tpu.memory_space<vmem>>, vector<1x1x1x1x71x32xbf16>
    %215 = vector.shape_cast %214 : vector<1x1x1x1x71x32xbf16> to vector<71x32xbf16>
    %c8_347 = arith.constant 8 : index
    %c0_348 = arith.constant 0 : index
    %c0_349 = arith.constant 0 : index
    %216 = vector.load %arg4[%c8_347, %c0_348, %c0_349] : memref<9x32x64xbf16, #tpu.memory_space<vmem>>, vector<1x32x64xbf16>
    %217 = vector.shape_cast %216 : vector<1x32x64xbf16> to vector<32x64xbf16>
    "tpu.trace_start"() <{level = 10 : i32, message = "ck,lk->cl"}> : () -> ()
    %cst_350 = arith.constant dense<0.000000e+00> : vector<32x71xf32>
    %218 = tpu.matmul %217, %213, %cst_350 {dimension_numbers = #tpu.dot_dimension_numbers<[1], [1], [0], [0], [0, 0, 1, 0], [], []>} : vector<32x64xbf16>, vector<71x64xbf16>, vector<32x71xf32> -> vector<32x71xf32>
    "tpu.trace_stop"() : () -> ()
    %219 = arith.addf %211, %218 : vector<32x71xf32>
    %c8_351 = arith.constant 8 : index
    %c0_352 = arith.constant 0 : index
    %c0_353 = arith.constant 0 : index
    %220 = vector.load %arg5[%c8_351, %c0_352, %c0_353] : memref<9x32x32xbf16, #tpu.memory_space<vmem>>, vector<1x32x32xbf16>
    %221 = vector.shape_cast %220 : vector<1x32x32xbf16> to vector<32x32xbf16>
    "tpu.trace_start"() <{level = 10 : i32, message = "ck,lk->cl"}> : () -> ()
    %cst_354 = arith.constant dense<0.000000e+00> : vector<32x71xf32>
    %222 = tpu.matmul %221, %215, %cst_354 {dimension_numbers = #tpu.dot_dimension_numbers<[1], [1], [0], [0], [0, 0, 1, 0], [], []>} : vector<32x32xbf16>, vector<71x32xbf16>, vector<32x71xf32> -> vector<32x71xf32>
    "tpu.trace_stop"() : () -> ()
    %223 = arith.addf %219, %222 : vector<32x71xf32>
    %224 = vector.broadcast %0 : vector<32x1xf32> to vector<32x71xf32>
    %225 = arith.addf %223, %224 : vector<32x71xf32>
    %c0_355 = arith.constant 0 : index
    %c0_356 = arith.constant 0 : index
    %c81 = arith.constant 81 : index
    %226 = vector.load %arg7[%c0_355, %c0_356, %c81] : memref<1x32x162xf32, #tpu.memory_space<vmem>>, vector<1x32x71xf32>
    %227 = vector.shape_cast %226 : vector<1x32x71xf32> to vector<32x71xf32>
    %228 = vector.shape_cast %225 : vector<32x71xf32> to vector<1x32x71xf32>
    tpu.vector_store %arg7[%c0_355, %c0_356, %c81], %228 {strides = array<i32>} : memref<1x32x162xf32, #tpu.memory_space<vmem>>, vector<1x32x71xf32>,
    return
  }
  func.func @transform_0(%arg0: i32, %arg1: i32) -> (i32, i32, i32, i32, i32, i32) {
    %c0_i32 = arith.constant 0 : i32
    %c0_i32_0 = arith.constant 0 : i32
    %c0_i32_1 = arith.constant 0 : i32
    %c0_i32_2 = arith.constant 0 : i32
    %c0_i32_3 = arith.constant 0 : i32
    return %arg0, %c0_i32, %c0_i32_0, %arg1, %c0_i32_1, %c0_i32_2 : i32, i32, i32, i32, i32, i32
  }
  func.func @transform_1(%arg0: i32, %arg1: i32) -> (i32, i32, i32, i32, i32, i32) {
    %c2_i32 = arith.constant 2 : i32
    %0 = arith.muli %arg1, %c2_i32 : i32
    %c2_i32_0 = arith.constant 2 : i32
    %1 = arith.addi %0, %c2_i32_0 : i32
    %c0_i32 = arith.constant 0 : i32
    %c0_i32_1 = arith.constant 0 : i32
    %c0_i32_2 = arith.constant 0 : i32
    %c0_i32_3 = arith.constant 0 : i32
    %c0_i32_4 = arith.constant 0 : i32
    return %arg0, %c0_i32, %c0_i32_1, %1, %c0_i32_2, %c0_i32_3 : i32, i32, i32, i32, i32, i32
  }
  func.func @transform_2(%arg0: i32, %arg1: i32) -> (i32, i32, i32) {
    %c0_i32 = arith.constant 0 : i32
    %c0_i32_0 = arith.constant 0 : i32
    %c0_i32_1 = arith.constant 0 : i32
    %c0_i32_2 = arith.constant 0 : i32
    return %c0_i32, %c0_i32_0, %c0_i32_1 : i32, i32, i32
  }
  func.func @transform_3(%arg0: i32, %arg1: i32) -> (i32, i32, i32) {
    %c0_i32 = arith.constant 0 : i32
    %c0_i32_0 = arith.constant 0 : i32
    %c0_i32_1 = arith.constant 0 : i32
    %c0_i32_2 = arith.constant 0 : i32
    return %c0_i32, %c0_i32_0, %c0_i32_1 : i32, i32, i32
  }
  func.func @transform_4(%arg0: i32, %arg1: i32) -> (i32, i32) {
    %c0_i32 = arith.constant 0 : i32
    %c0_i32_0 = arith.constant 0 : i32
    %c0_i32_1 = arith.constant 0 : i32
    return %c0_i32, %c0_i32_0 : i32, i32
  }
  func.func @transform_5(%arg0: i32, %arg1: i32) -> (i32, i32, i32) {
    %c2_i32 = arith.constant 2 : i32
    %0 = arith.muli %arg0, %c2_i32 : i32
    %1 = arith.addi %0, %arg1 : i32
    %c0_i32 = arith.constant 0 : i32
    %c0_i32_0 = arith.constant 0 : i32
    %c0_i32_1 = arith.constant 0 : i32
    return %1, %c0_i32, %c0_i32_0 : i32, i32, i32
  }
}

</mosaic_0001>

<bundles_post_ra>
// kernel: downsample_forward.1
= control target key start
LH: loop header
LB: loop body
LE: loop exit
PB: predicated region body
PF: predicated region fallthrough
CT: control target
= control target key end

     0   :  { %s7563_s18 = smov 0   ;;  %s7565_s19 = smov 0   ;;  %s9143_s0 = inlined_call_operand.vmem [shape: bf16[2,2,2,6,81,64], index: 0, kind: input, shape index: {}, may-alias: {0,1}]   ;;  %s9144_s1 = inlined_call_operand.vmem [shape: bf16[2,2,2,6,81,64], index: 1, kind: input, shape index: {}, may-alias: {0,1}]   ;;  %s9145_s2 = inlined_call_operand.vmem [shape: bf16[9,32,64], index: 2, kind: input, shape index: {}]   ;;  %s9146_s3 = inlined_call_operand.vmem [shape: bf16[9,32,32], index: 3, kind: input, shape index: {}]   ;;  %s9147_s4 = inlined_call_operand.vmem [shape: f32[32,1], index: 4, kind: input, shape index: {}]   ;;  %s9148_s5 = inlined_call_operand.vmem [shape: f32[4,32,162], index: 5, kind: output, shape index: {}]  }
   0x1   :  { %s7567_s20 = smov 0   ;;  %s7569_s21 = smov 0  }
   0x2   :  { %s7571_s22 = smov 0   ;;  %s7573_s23 = smov 0  }
   0x3   :  { %s7575_s24 = smov 0   ;;  %s7577_s25 = smov 0  }
   0x4   :  { %s7579_s26 = smov 0  }
   0x5 LB: > { %s24_s27 = sadd.s32 1, %s7521_s24  ;;  %s27_s28 = sadd.s32 1, %s7525_s25  ;;  %s7529_s26 = sphi %s7579_s26, %s15_s26   ;;  %s7525_s25 = sphi %s7577_s25, %s9158_s25   ;;  %s7521_s24 = sphi %s7575_s24, %s9157_s24   ;;  %s7517_s23 = sphi %s7573_s23, %s9156_s23   ;;  %s7513_s22 = sphi %s7571_s22, %s9155_s22   ;;  %s7509_s21 = sphi %s7569_s21, %s9154_s21   ;;  %s7505_s20 = sphi %s7567_s20, %s9153_s20   ;;  %s7501_s19 = sphi %s7565_s19, %s9152_s19   ;;  %s7497_s18 = sphi %s7563_s18, %s9151_s18  }
   0x6   : > { %p25_p0 = scmp.ge.s32.totalorder %s24_s27, 2  ;;  %s36_s29 = sadd.s32 1, %s7509_s21 }
   0x7   : > { %p43_p1 = scmp.ne.s32.totalorder %s7509_s21, %s7505_s20  ;;  %p44_p2 = scmp.eq.s32.totalorder %s7529_s26, 0 }
   0x8   : > { %s9160_s27 = smov (%p25_p0, %s24_s27), 0  ;;  %s9162_s28 = smov (!%p25_p0, %s27_s28), %s7525_s25 }
   0x9   : > { %s32_s30 = ssub.s32 %s7521_s24, %s9160_s27  ;;  %p7621_p3 = por %p44_p2, %p43_p1 }
   0xa   : > { %p29_p4 = scmp.ge.s32.totalorder %s9162_s28, 2  ;;  %s5560_s7 = sshll.u32 %s7521_s24, 1 }
   0xb   : > { %s60_s8 = sadd.s32 2, %s5560_s7  ;;  %s5561_s9 = sshll.u32 %s9160_s27, 1 }
   0xc   : > { %s9164_s28 = smov (%p29_p4, %s9162_s28), 0  ;;  %s62_s10 = sadd.s32 2, %s5561_s9 }
   0xd   : > { %s68_s11 = sadd.s32 1, %s7501_s19  ;;  %s31_s12 = ssub.s32 %s7525_s25, %s9164_s28 }
   0xe   : > { %s64_s13 = ssub.s32 %s60_s8, %s62_s10  ;;  %s33_s14 = sor.u32 %s32_s30, %s31_s12 }
   0xf   : > { %s65_s15 = sor.u32 %s64_s13, %s31_s12  ;;  %p34_p5 = scmp.eq.s32.totalorder %s33_s14, 0 }
  0x10   : > { %p66_p6 = scmp.eq.s32.totalorder %s65_s15, 0  ;;  %p75_p7 = scmp.ne.s32.totalorder %s7501_s19, %s7497_s18 }
  0x11   : > { %s7635_s16 = scalar_select %p34_p5, %s7509_s21, %s36_s29  }
  0x12   : > { %s7638_s17 = scalar_select %p66_p6, %s7501_s19, %s68_s11  }
  0x13   : > { %p7642_p8 = por %p75_p7, %p44_p2  ;;  %p5565_p9 = scmp.ge.s32.totalorder %s7529_s26, 4 }
  0x15   : > { %203 = sbr.rel (%p5565_p9) target bundleno = 80 (0x50), region = 28 }
  0x1c   : > { %206 = sbr.rel (!%p7621_p3) target bundleno = 59 (0x3b), region = 32  ;;  %s208_s30 = sand.u32 (%p7621_p3), 1, %s7509_s21  }
  0x1d   : > { %s7204_s8 = smul.u32 (%p7621_p3), 22, %s7521_s24 }
  0x1e   : > { %s7203_s29 = smul.u32 (%p7621_p3), 352, %s208_s30 }
  0x1f   : > { %s7205_s9 = smul.u32 (%p7621_p3), 264, %s7525_s25 }
  0x20   : > { %s7660_s6 = scalar_lea.vmem (%p7621_p3), [#allocation2], %s7203_s29 }
  0x21   : > { %s214_s10 = sadd.s32 (%p7621_p3), %s7205_s9, %s7204_s8 }
  0x22   : > { %s5568_s11 = sshll.u32 (%p7621_p3), %s214_s10, 2 }
  0x23   : > { %s7655_s14 = scalar_lea.vmem %s9143_s0, %s5568_s11 }
  0x24   : > { %v232_v0 = vld [vmem:[%s7655_s14] sm:$0xff]   ;;  %v236_v1 = vld [vmem:[%s7655_s14 + $0x8] sm:$0xff]   ;;  %v240_v2 = vld [vmem:[%s7655_s14 + $0x10] sm:$0xff]  }
  0x25   : > { %233 = vst [vmem:[%s7660_s6] sm:$0xff] %v232_v0   ;;  %237 = vst [vmem:[%s7660_s6 + $0x8] sm:$0xff] %v236_v1   ;;  %v244_v3 = vld [vmem:[%s7655_s14 + $0x18] sm:$0xff]   ;;  %v248_v4 = vld [vmem:[%s7655_s14 + $0x20] sm:$0xff]  }
  0x26   : > { %241 = vst [vmem:[%s7660_s6 + $0x10] sm:$0xff] %v240_v2   ;;  %v252_v5 = vld [vmem:[%s7655_s14 + $0x28] sm:$0xff]   ;;  %245 = vst [vmem:[%s7660_s6 + $0x18] sm:$0xff] %v244_v3   ;;  %v256_v6 = vld [vmem:[%s7655_s14 + $0x30] sm:$0xff]  }
  0x27   : > { %249 = vst [vmem:[%s7660_s6 + $0x20] sm:$0xff] %v248_v4   ;;  %253 = vst [vmem:[%s7660_s6 + $0x28] sm:$0xff] %v252_v5   ;;  %v260_v7 = vld [vmem:[%s7655_s14 + $0x38] sm:$0xff]   ;;  %v264_v8 = vld [vmem:[%s7655_s14 + $0x40] sm:$0xff]  }
  0x28   : > { %257 = vst [vmem:[%s7660_s6 + $0x30] sm:$0xff] %v256_v6   ;;  %261 = vst [vmem:[%s7660_s6 + $0x38] sm:$0xff] %v260_v7   ;;  %v268_v9 = vld [vmem:[%s7655_s14 + $0x48] sm:$0xff]   ;;  %v272_v10 = vld [vmem:[%s7655_s14 + $0x50] sm:$0xff]  }
  0x29   : > { %265 = vst [vmem:[%s7660_s6 + $0x40] sm:$0xff] %v264_v8   ;;  %v276_v11 = vld [vmem:[%s7655_s14 + $0x108] sm:$0xff]   ;;  %269 = vst [vmem:[%s7660_s6 + $0x48] sm:$0xff] %v268_v9   ;;  %v280_v12 = vld [vmem:[%s7655_s14 + $0x110] sm:$0xff]  }
  0x2a   : > { %273 = vst [vmem:[%s7660_s6 + $0x50] sm:$0xff] %v272_v10   ;;  %277 = vst [vmem:[%s7660_s6 + $0x58] sm:$0xff] %v276_v11   ;;  %v284_v13 = vld [vmem:[%s7655_s14 + $0x118] sm:$0xff]   ;;  %v288_v14 = vld [vmem:[%s7655_s14 + $0x120] sm:$0xff]  }
  0x2b   : > { %281 = vst [vmem:[%s7660_s6 + $0x60] sm:$0xff] %v280_v12   ;;  %285 = vst [vmem:[%s7660_s6 + $0x68] sm:$0xff] %v284_v13   ;;  %v292_v15 = vld [vmem:[%s7655_s14 + $0x128] sm:$0xff]   ;;  %v296_v16 = vld [vmem:[%s7655_s14 + $0x130] sm:$0xff]  }
  0x2c   : > { %289 = vst [vmem:[%s7660_s6 + $0x70] sm:$0xff] %v288_v14   ;;  %v300_v17 = vld [vmem:[%s7655_s14 + $0x138] sm:$0xff]   ;;  %293 = vst [vmem:[%s7660_s6 + $0x78] sm:$0xff] %v292_v15   ;;  %v304_v18 = vld [vmem:[%s7655_s14 + $0x140] sm:$0xff]  }
  0x2d   : > { %297 = vst [vmem:[%s7660_s6 + $0x80] sm:$0xff] %v296_v16   ;;  %301 = vst [vmem:[%s7660_s6 + $0x88] sm:$0xff] %v300_v17   ;;  %v308_v19 = vld [vmem:[%s7655_s14 + $0x148] sm:$0xff]   ;;  %v312_v20 = vld [vmem:[%s7655_s14 + $0x150] sm:$0xff]  }
  0x2e   : > { %305 = vst [vmem:[%s7660_s6 + $0x90] sm:$0xff] %v304_v18   ;;  %309 = vst [vmem:[%s7660_s6 + $0x98] sm:$0xff] %v308_v19   ;;  %v316_v21 = vld [vmem:[%s7655_s14 + $0x158] sm:$0xff]   ;;  %v320_v22 = vld [vmem:[%s7655_s14 + $0x210] sm:$0xff]  }
  0x2f   : > { %313 = vst [vmem:[%s7660_s6 + $0xa0] sm:$0xff] %v312_v20   ;;  %v324_v23 = vld [vmem:[%s7655_s14 + $0x218] sm:$0xff]   ;;  %317 = vst [vmem:[%s7660_s6 + $0xa8] sm:$0xff] %v316_v21   ;;  %v328_v24 = vld [vmem:[%s7655_s14 + $0x220] sm:$0xff]  }
  0x30   : > { %321 = vst [vmem:[%s7660_s6 + $0xb0] sm:$0xff] %v320_v22   ;;  %325 = vst [vmem:[%s7660_s6 + $0xb8] sm:$0xff] %v324_v23   ;;  %v332_v25 = vld [vmem:[%s7655_s14 + $0x228] sm:$0xff]   ;;  %v336_v26 = vld [vmem:[%s7655_s14 + $0x230] sm:$0xff]  }
  0x31   : > { %329 = vst [vmem:[%s7660_s6 + $0xc0] sm:$0xff] %v328_v24   ;;  %333 = vst [vmem:[%s7660_s6 + $0xc8] sm:$0xff] %v332_v25   ;;  %v340_v27 = vld [vmem:[%s7655_s14 + $0x238] sm:$0xff]   ;;  %v344_v28 = vld [vmem:[%s7655_s14 + $0x240] sm:$0xff]  }
  0x32   : > { %337 = vst [vmem:[%s7660_s6 + $0xd0] sm:$0xff] %v336_v26   ;;  %v348_v29 = vld [vmem:[%s7655_s14 + $0x248] sm:$0xff]   ;;  %341 = vst [vmem:[%s7660_s6 + $0xd8] sm:$0xff] %v340_v27   ;;  %v352_v30 = vld [vmem:[%s7655_s14 + $0x250] sm:$0xff]  }
  0x33   : > { %345 = vst [vmem:[%s7660_s6 + $0xe0] sm:$0xff] %v344_v28   ;;  %349 = vst [vmem:[%s7660_s6 + $0xe8] sm:$0xff] %v348_v29   ;;  %v356_v31 = vld [vmem:[%s7655_s14 + $0x258] sm:$0xff]   ;;  %v360_v32 = vld [vmem:[%s7655_s14 + $0x260] sm:$0xff]  }
  0x34   : > { %353 = vst [vmem:[%s7660_s6 + $0xf0] sm:$0xff] %v352_v30   ;;  %357 = vst [vmem:[%s7660_s6 + $0xf8] sm:$0xff] %v356_v31   ;;  %v364_v33 = vld [vmem:[%s7655_s14 + $0x318] sm:$0xff]   ;;  %v368_v34 = vld [vmem:[%s7655_s14 + $0x320] sm:$0xff]  }
  0x35   : > { %361 = vst [vmem:[%s7660_s6 + $0x100] sm:$0xff] %v360_v32   ;;  %v372_v35 = vld [vmem:[%s7655_s14 + $0x328] sm:$0xff]   ;;  %365 = vst [vmem:[%s7660_s6 + $0x108] sm:$0xff] %v364_v33   ;;  %v376_v36 = vld [vmem:[%s7655_s14 + $0x330] sm:$0xff]  }
  0x36   : > { %369 = vst [vmem:[%s7660_s6 + $0x110] sm:$0xff] %v368_v34   ;;  %373 = vst [vmem:[%s7660_s6 + $0x118] sm:$0xff] %v372_v35   ;;  %v380_v37 = vld [vmem:[%s7655_s14 + $0x338] sm:$0xff]   ;;  %v384_v38 = vld [vmem:[%s7655_s14 + $0x340] sm:$0xff]  }
  0x37   : > { %377 = vst [vmem:[%s7660_s6 + $0x120] sm:$0xff] %v376_v36   ;;  %381 = vst [vmem:[%s7660_s6 + $0x128] sm:$0xff] %v380_v37   ;;  %v388_v39 = vld [vmem:[%s7655_s14 + $0x348] sm:$0xff]   ;;  %v392_v40 = vld [vmem:[%s7655_s14 + $0x350] sm:$0xff]  }
  0x38   : > { %385 = vst [vmem:[%s7660_s6 + $0x130] sm:$0xff] %v384_v38   ;;  %v396_v41 = vld [vmem:[%s7655_s14 + $0x358] sm:$0xff]   ;;  %389 = vst [vmem:[%s7660_s6 + $0x138] sm:$0xff] %v388_v39   ;;  %v400_v42 = vld [vmem:[%s7655_s14 + $0x360] sm:$0xff]  }
  0x39   : > { %393 = vst [vmem:[%s7660_s6 + $0x140] sm:$0xff] %v392_v40   ;;  %397 = vst [vmem:[%s7660_s6 + $0x148] sm:$0xff] %v396_v41   ;;  %v404_v43 = vld [vmem:[%s7655_s14 + $0x368] sm:$0xff]  }
  0x3a   : > { %401 = vst [vmem:[%s7660_s6 + $0x150] sm:$0xff] %v400_v42   ;;  %405 = vst [vmem:[%s7660_s6 + $0x158] sm:$0xff] %v404_v43  }
  0x3b PF: > { %606 = sbr.rel (!%p7642_p8) target bundleno = 80 (0x50), region = 73  ;;  %s608_s15 = sand.u32 (%p7642_p8), 1, %s7501_s19  }
  0x3c   : > { %s5570_s30 = smul.u32 (%p7642_p8), 22, %s7521_s24 }
  0x3d   : > { %s7206_s8 = smul.u32 (%p7642_p8), 176, %s608_s15 }
  0x3e   : > { %s5491_s29 = smul.u32 (%p7642_p8), 264, %s7525_s25 }
  0x3f   : > { %s7760_s7 = scalar_lea.vmem (%p7642_p8), [#allocation3], %s7206_s8 }
  0x40   : > { %s5492_s9 = sadd.s32 (%p7642_p8), %s5570_s30, %s5491_s29 }
  0x41   : > { %s5571_s10 = sshll.u32 (%p7642_p8), %s5492_s9, 2 }
  0x42   : > { %s7755_s13 = scalar_lea.vmem %s9144_s1, %s5571_s10 }
  0x43   : > { %v5572_v44 = vld [vmem:[%s7755_s13 + $0x58] sm:$0xff]   ;;  %v5574_v45 = vld [vmem:[%s7755_s13 + $0x60] sm:$0xff]   ;;  %v5576_v46 = vld [vmem:[%s7755_s13 + $0x68] sm:$0xff]  }
  0x44   : > { %634 = vst [vmem:[%s7760_s7] sm:$0xff] %v5572_v44   ;;  %638 = vst [vmem:[%s7760_s7 + $0x8] sm:$0xff] %v5574_v45   ;;  %v5578_v47 = vld [vmem:[%s7755_s13 + $0x70] sm:$0xff]   ;;  %v5580_v48 = vld [vmem:[%s7755_s13 + $0x78] sm:$0xff]  }
  0x45   : > { %642 = vst [vmem:[%s7760_s7 + $0x10] sm:$0xff] %v5576_v46   ;;  %v5582_v49 = vld [vmem:[%s7755_s13 + $0x80] sm:$0xf]  ;;  %646 = vst [vmem:[%s7760_s7 + $0x18] sm:$0xff] %v5578_v47   ;;  %v5585_v51 = vld [vmem:[%s7755_s13 + $0x168] sm:$0xff]  }
  0x46   : > { %650 = vst [vmem:[%s7760_s7 + $0x20] sm:$0xff] %v5580_v48   ;;  %654 = vst [vmem:[%s7760_s7 + $0x28] sm:$0xf] %v5582_v49  ;;  %v5583_v50 = vld [vmem:[%s7755_s13 + $0x160] sm:$0xff]   ;;  %v5587_v52 = vld [vmem:[%s7755_s13 + $0x170] sm:$0xff]  }
  0x47   : > { %656 = vst [vmem:[%s7760_s7 + $0x2c] sm:$0xff] %v5583_v50   ;;  %660 = vst [vmem:[%s7760_s7 + $0x34] sm:$0xff] %v5585_v51   ;;  %v5589_v53 = vld [vmem:[%s7755_s13 + $0x178] sm:$0xff]   ;;  %v5591_v54 = vld [vmem:[%s7755_s13 + $0x180] sm:$0xff]  }
  0x48   : > { %664 = vst [vmem:[%s7760_s7 + $0x3c] sm:$0xff] %v5587_v52   ;;  %v5593_v55 = vld [vmem:[%s7755_s13 + $0x188] sm:$0xf]  ;;  %668 = vst [vmem:[%s7760_s7 + $0x44] sm:$0xff] %v5589_v53   ;;  %v5596_v57 = vld [vmem:[%s7755_s13 + $0x270] sm:$0xff]  }
  0x49   : > { %672 = vst [vmem:[%s7760_s7 + $0x4c] sm:$0xff] %v5591_v54   ;;  %676 = vst [vmem:[%s7760_s7 + $0x54] sm:$0xf] %v5593_v55  ;;  %v5594_v56 = vld [vmem:[%s7755_s13 + $0x268] sm:$0xff]   ;;  %v5598_v58 = vld [vmem:[%s7755_s13 + $0x278] sm:$0xff]  }
  0x4a   : > { %678 = vst [vmem:[%s7760_s7 + $0x58] sm:$0xff] %v5594_v56   ;;  %682 = vst [vmem:[%s7760_s7 + $0x60] sm:$0xff] %v5596_v57   ;;  %v5600_v59 = vld [vmem:[%s7755_s13 + $0x280] sm:$0xff]   ;;  %v5602_v60 = vld [vmem:[%s7755_s13 + $0x288] sm:$0xff]  }
  0x4b   : > { %686 = vst [vmem:[%s7760_s7 + $0x68] sm:$0xff] %v5598_v58   ;;  %v5604_v61 = vld [vmem:[%s7755_s13 + $0x290] sm:$0xf]  ;;  %690 = vst [vmem:[%s7760_s7 + $0x70] sm:$0xff] %v5600_v59   ;;  %v5607_v63 = vld [vmem:[%s7755_s13 + $0x378] sm:$0xff]  }
  0x4c   : > { %694 = vst [vmem:[%s7760_s7 + $0x78] sm:$0xff] %v5602_v60   ;;  %698 = vst [vmem:[%s7760_s7 + $0x80] sm:$0xf] %v5604_v61  ;;  %v5605_v62 = vld [vmem:[%s7755_s13 + $0x370] sm:$0xff]   ;;  %v5609_v0 = vld [vmem:[%s7755_s13 + $0x380] sm:$0xff]  }
  0x4d   : > { %700 = vst [vmem:[%s7760_s7 + $0x84] sm:$0xff] %v5605_v62   ;;  %704 = vst [vmem:[%s7760_s7 + $0x8c] sm:$0xff] %v5607_v63   ;;  %v5611_v1 = vld [vmem:[%s7755_s13 + $0x388] sm:$0xff]   ;;  %v5613_v2 = vld [vmem:[%s7755_s13 + $0x390] sm:$0xff]  }
  0x4e   : > { %708 = vst [vmem:[%s7760_s7 + $0x94] sm:$0xff] %v5609_v0   ;;  %v5615_v3 = vld [vmem:[%s7755_s13 + $0x398] sm:$0xf]  ;;  %712 = vst [vmem:[%s7760_s7 + $0x9c] sm:$0xff] %v5611_v1  }
  0x4f   : > { %716 = vst [vmem:[%s7760_s7 + $0xa4] sm:$0xff] %v5613_v2   ;;  %720 = vst [vmem:[%s7760_s7 + $0xac] sm:$0xf] %v5615_v3 }
  0x50 PF: > { %p5616_p10 = scmp.ge.s32.totalorder %s7529_s26, 1  ;;  %p830_p11 = scmp.lt.s32.totalorder %s7529_s26, 5 }
  0x52   : > { %p831_p12 = pnand %p5616_p10, %p830_p11 }
  0x53   : > { %s837_s14 = sand.u32 (!%p831_p12), 1, %s7505_s20   ;;  %vm984_vm0 = vcmask (!%p831_p12), 261120   ;;  %v7295_v4 = vld [vmem:[%s9146_s3] sm:$0xff] (!%p831_p12)   ;;  %vm944_vm1 = vsmask.f32 (!%p831_p12), 7424  ;;  %vm1065_vm2 = vcmask (!%p831_p12), 523264  }
  0x54   : > { %834 = sbr.rel (%p831_p12) target bundleno = 1156 (0x484), region = 114  ;;  %v7296_v5 = vld [vmem:[%s9146_s3] sm:$0xff] (!%p831_p12)   ;;  %6393 = vmatprep.mubr.msk.bf16.mxu0 (!%p831_p12), %vm984_vm0, %v7295_v4  ;;  %vm1559_vm3 = vcmask (!%p831_p12), 1046528   ;;  %s844_s13 = sand.u32 (!%p831_p12), 1, %s7497_s18   ;;  %vm3179_vm4 = vcmask (!%p831_p12), 580608   ;;  %vm5443_vm5 = vcmask (!%p831_p12), 1048200  }
  0x55   : > { %s7207_s6 = smul.u32 (!%p831_p12), 352, %s837_s14  ;;  %6645 = vmatprep.mubr.msk.bf16.mxu1 (!%p831_p12), %vm984_vm0, %v7296_v5  ;;  %vm5445_vm6 = vcmask (!%p831_p12), 195584  }
  0x56   : > { %s7208_s7 = smul.u32 (!%p831_p12), 176, %s844_s13  ;;  %s5617_s13 = sshll.u32 (!%p831_p12), %s7517_s23, 1 }
  0x57   : > { %s7818_s9 = scalar_lea.vmem (!%p831_p12), [#allocation2], %s7207_s6 }
  0x58   : > { %v7821_v6 = vld [vmem:[%s7818_s9] sm:$0xff] (!%p831_p12)   ;;  %v7824_v7 = vld [vmem:[%s7818_s9 + $0x8] sm:$0xff] (!%p831_p12)   ;;  %v7834_v13 = vld [vmem:[%s7818_s9 + $0x34] sm:$0xff] (!%p831_p12)   ;;  %s8453_s14 = scalar_lea.vmem (!%p831_p12), [#allocation3], %s7208_s7  ;;  %s881_s7 = sadd.s32 (!%p831_p12), %s7513_s22, %s5617_s13 }
  0x59   : > { %v946_v8 = vshrl.u32 (!%p831_p12), %v7821_v6, 16  ;;  %v948_v9 = vshll.u32 (!%p831_p12), %v7821_v6, 16  ;;  %v953_v10 = vshll.u32 (!%p831_p12), %v7824_v7, 16  ;;  %v957_v11 = vshrl.u32 (!%p831_p12), %v7824_v7, 16  ;;  %v7831_v12 = vld [vmem:[%s7818_s9 + $0x2c] sm:$0xff] (!%p831_p12)   ;;  %v7840_v17 = vld [vmem:[%s7818_s9 + $0x3c] sm:$0xff] (!%p831_p12)  }
  0x5a   : > { %v7837_v16 = vld [vmem:[%s7818_s9 + $0x10] sm:$0xff] (!%p831_p12)   ;;  %v3235_v18 = vshrl.u32 (!%p831_p12), %v7831_v12, 16  ;;  %v3237_v19 = vshll.u32 (!%p831_p12), %v7831_v12, 16  ;;  %v3242_v20 = vshll.u32 (!%p831_p12), %v7834_v13, 16  ;;  %v3246_v21 = vshrl.u32 (!%p831_p12), %v7834_v13, 16  ;;  %v7849_v28 = vld [vmem:[%s7818_s9 + $0x18] sm:$0xff] (!%p831_p12)  }
  0x5b   : > { %v950_v14 = vrot.slane %v948_v9, 1  ;;  %v955_v15 = vrot.slane %v953_v10, 1  ;;  %v961_v24 = vshll.u32 %v7837_v16, 16  ;;  %v3250_v25 = vshll.u32 %v7840_v17, 16  ;;  %v7857_v37 = vld [vmem:[%s7818_s9 + $0x44] sm:$0xff]   ;;  %p882_p13 = scmp.lt.s32.totalorder %s881_s7, 3 }
  0x5c   : > { %v3239_v26 = vrot.slane %v3237_v19, 1  ;;  %v3244_v27 = vrot.slane %v3242_v20, 1  ;;  %v965_v29 = vshrl.u32 %v7837_v16, 16  ;;  %v969_v36 = vshll.u32 %v7849_v28, 16  ;;  %v7865_v42 = vld [vmem:[%s7818_s9 + $0x20] ss:$0 sps:$4 sm:$0xff]  }
  0x5d   : > { %v951_v22 = vor.u32 %v950_v14, %v946_v8  ;;  %v959_v23 = vor.u32 %v957_v11, %v955_v15  ;;  %v963_v31 = vrot.slane %v961_v24, 1  ;;  %v3252_v32 = vrot.slane %v3250_v25, 1  ;;  %v7873_v50 = vld [vmem:[%s7818_s9 + $0x4c] ss:$0 sps:$4 sm:$0xff]   ;;  %v7301_v20 = vld [vmem:[%s9145_s2] sm:$0xff]   ;;  %s9166_s7 = smov (!%p882_p13, %s881_s7), 3 }
  0x5e   : > { %v3240_v33 = vor.u32 %v3239_v26, %v3235_v18  ;;  %v3248_v34 = vor.u32 %v3246_v21, %v3244_v27  ;;  %v3254_v41 = vshrl.u32 %v7840_v17, 16  ;;  %v971_v45 = vrot.slane %v969_v36, 1  ;;  %v7297_v14 = vld [vmem:[%s9146_s3 + $0x8] sm:$0xff]   ;;  %v7992_v36 = vld [vmem:[%s7818_s9 + $0x94] sm:$0xff]   ;;  %s6130_s18 = sshll.u32 %s9166_s7, 6  ;;  %s7532_s22 = smov 81  }
  0x5f   : > { %v956_v30 = vsel %vm944_vm1, %v951_v22, %v955_v15  ;;  %v964_v38 = vsel %vm944_vm1, %v959_v23, %v963_v31  ;;  %v967_v44 = vor.u32 %v965_v29, %v963_v31  ;;  %v3258_v46 = vshll.u32 %v7857_v37, 16  ;;  %v7299_v15 = vld [vmem:[%s9145_s2] sm:$0xff]   ;;  %v7298_v19 = vld [vmem:[%s9146_s3 + $0x8] sm:$0xff]   ;;  %v7313_v29 = vld [vmem:[%s9145_s2 + $0x10] sm:$0xff]   ;;  %s9098_s30 = scalar_lea.vmem %s9148_s5, %s6130_s18 }
  0x60   : > { %7023 = vmatprep.subr.msk.bf16.mxu0 %vm984_vm0, %v956_v30  ;;  %v992_v35 = vsel %vm984_vm0, %v956_v30, 0  ;;  %v3245_v39 = vsel %vm944_vm1, %v3240_v33, %v3244_v27  ;;  %v3253_v40 = vsel %vm944_vm1, %v3248_v34, %v3252_v32  ;;  %v995_v47 = vsel %vm984_vm0, %v964_v38, 0  ;;  %v7302_v25 = vld [vmem:[%s7818_s9 + $0x84] sm:$0xff]   ;;  %v7314_v31 = vld [vmem:[%s9145_s2 + $0x10] sm:$0xff]  }
  0x61   : > { %6384 = vmatpush3.bf16.xpose.msra.mxu0 %v992_v35  ;;  %7113 = vmatprep.subr.msk.bf16.mxu1 %vm984_vm0, %v3245_v39  ;;  %v3280_v43 = vsel %vm984_vm0, %v3245_v39, 0  ;;  %v3256_v48 = vor.u32 %v3254_v41, %v3252_v32  ;;  %v3260_v49 = vrot.slane %v3258_v46, 1  ;;  %v972_v51 = vsel %vm944_vm1, %v967_v44, %v971_v45  ;;  %v7303_v26 = vld [vmem:[%s9145_s2 + $0x8] sm:$0xff]  }
  0x62   : > { %7024 = vmatprep.subr.msk.bf16.mxu0 %vm984_vm0, %v964_v38  ;;  %6636 = vmatpush3.bf16.xpose.msra.mxu1 %v3280_v43  ;;  %v973_v52 = vshrl.u32 %v7849_v28, 16  ;;  %v977_v53 = vshll.u32 %v7865_v42, 16  ;;  %v3283_v54 = vsel %vm984_vm0, %v3253_v40, 0  ;;  %v3262_v56 = vshrl.u32 %v7857_v37, 16  ;;  %v7304_v30 = vld [vmem:[%s9145_s2 + $0x8] sm:$0xff]   ;;  %v7998_v38 = vld [vmem:[%s7818_s9 + $0x9c] sm:$0xff]  }
  0x63   : > { %7114 = vmatprep.subr.msk.bf16.mxu1 %vm984_vm0, %v3253_v40  ;;  %v3261_v55 = vsel %vm944_vm1, %v3256_v48, %v3260_v49  ;;  %v3266_v57 = vshll.u32 %v7873_v50, 16  ;;  %v998_v60 = vsel %vm984_vm0, %v972_v51, 0  ;;  %v981_v2 = vshrl.u32 %v7865_v42, 16  ;;  %v7977_v33 = vld [vmem:[%s7818_s9 + $0x8c] sm:$0xff]  }
  0x64   : > { %v975_v58 = vor.u32 %v973_v52, %v971_v45  ;;  %v979_v59 = vrot.slane %v977_v53, 1  ;;  %v3264_v61 = vor.u32 %v3262_v56, %v3260_v49  ;;  %v3286_v0 = vsel %vm984_vm0, %v3261_v55, 0  ;;  %v7986_v35 = vld [vmem:[%s7818_s9 + $0x68] sm:$0xff]   ;;  %v8018_v49 = vld [vmem:[%s7818_s9 + $0x78] ss:$0 sps:$4 sm:$0xff]  }
  0x65   : > { %v3268_v62 = vrot.slane %v3266_v57, 1  ;;  %v3270_v3 = vshrl.u32 %v7873_v50, 16  ;;  %v1072_v18 = vsel %vm1065_vm2, %v7821_v6, 0  ;;  %v3359_v21 = vsel %vm1065_vm2, %v7831_v12, 0  ;;  %v8024_v52 = vld [vmem:[%s7818_s9 + $0xa4] ss:$0 sps:$4 sm:$0xff]  }
  0x66   : > { %v980_v63 = vsel %vm944_vm1, %v975_v58, %v979_v59  ;;  %v983_v5 = vor.u32 %v981_v2, %v979_v59  ;;  %v1076_v22 = vsel %vm1065_vm2, %v7837_v16, 0  ;;  %v3363_v23 = vsel %vm1065_vm2, %v7840_v17, 0  ;;  %v7315_v2 = vld [vmem:[%s9145_s2 + $0x18] sm:$0xff]  }
  0x67   : > { %v3269_v1 = vsel %vm944_vm1, %v3264_v61, %v3268_v62  ;;  %v1001_v4 = vsel %vm984_vm0, %v980_v63, 0  ;;  %v3272_v9 = vor.u32 %v3270_v3, %v3268_v62  ;;  %v3367_v24 = vsel %vm1065_vm2, %v7873_v50, 0 }
  0x68   : > { %v3289_v8 = vsel %vm984_vm0, %v3269_v1, 0  ;;  %v1004_v10 = vsel %vm984_vm0, %v983_v5, 0  ;;  %v3471_v32 = vsel %vm1065_vm2, %v7302_v25, 0  ;;  %v3474_v39 = vsel %vm1065_vm2, %v7977_v33, 0 }
  0x69   : > { %6386 = vmatpush3.bf16.xpose.msra.mxu0 %v995_v47  ;;  %v3292_v11 = vsel %vm984_vm0, %v3272_v9, 0  ;;  %v1192_v41 = vsel %vm1065_vm2, %v7986_v35, 0  ;;  %v3480_v44 = vsel %vm1065_vm2, %v7998_v38, 0  ;;  %v3552_v47 = vshrl.u32 %v7302_v25, 16 }
  0x6a   : > { %7025 = vmatprep.subr.msk.bf16.mxu0 %vm984_vm0, %v972_v51  ;;  %6638 = vmatpush3.bf16.xpose.msra.mxu1 %v3283_v54  ;;  %v3554_v48 = vshll.u32 %v7302_v25, 16  ;;  %v3558_v51 = vshll.u32 %v7977_v33, 16  ;;  %v1198_v56 = vsel %vm1065_vm2, %v8018_v49, 0  ;;  %v1281_v59 = vshll.u32 %v7986_v35, 16 }
  0x6b   : > { %7115 = vmatprep.subr.msk.bf16.mxu1 %vm984_vm0, %v3261_v55  ;;  %v3483_v62 = vsel %vm1065_vm2, %v8024_v52, 0 }
  0x6c   : > { %v3556_v54 = vrot.slane %v3554_v48, 1  ;;  %v3560_v57 = vrot.slane %v3558_v51, 1  ;;  %v8101_v51 = vld [vmem:[%s7818_s9 + $0x38] sm:$0xff]  }
  0x71   : > { %6388 = vmatpush3.bf16.xpose.msra.mxu0 %v998_v60  ;;  %v3557_v60 = vor.u32 %v3556_v54, %v3552_v47  ;;  %v3583_v47 = vshrl.u32 %v8024_v52, 16 }
  0x72   : > { %7026 = vmatprep.subr.msk.bf16.mxu0 %vm984_vm0, %v980_v63  ;;  %6640 = vmatpush3.bf16.xpose.msra.mxu1 %v3286_v0  ;;  %v3562_v63 = vshrl.u32 %v7977_v33, 16  ;;  %v3565_v0 = vshll.u32 %v7992_v36, 16 }
  0x73   : > { %7116 = vmatprep.subr.msk.bf16.mxu1 %vm984_vm0, %v3269_v1  ;;  %v3561_v1 = vsel %vm944_vm1, %v3557_v60, %v3560_v57 }
  0x79   : > { %6390 = vmatpush3.bf16.xpose.msra.mxu0 %v1001_v4  ;;  %v1283_v4 = vrot.slane %v1281_v59, 1  ;;  %v3716_v59 = vshll.u32 %v8101_v51, 16 }
  0x7a   : > { %7027 = vmatprep.subr.msk.bf16.mxu0 %vm984_vm0, %v983_v5  ;;  %6642 = vmatpush3.bf16.xpose.msra.mxu1 %v3289_v8  ;;  %v1285_v8 = vshrl.u32 %v7986_v35, 16 }
  0x7b   : > { %7117 = vmatprep.subr.msk.bf16.mxu1 %vm984_vm0, %v3272_v9 }
  0x81   : > { %6392 = vmatpush3.bf16.xpose.msra.mxu0 %v1004_v10  ;;  %v7317_v10 = vld [vmem:[%s9146_s3 + $0x10] sm:$0xff]  }
  0x82   : > { %7028 = vmatprep.subr.msk.bf16.mxu0 %vm1065_vm2, %v7821_v6  ;;  %6644 = vmatpush3.bf16.xpose.msra.mxu1 %v3292_v11  ;;  %v1074_v6 = vsel %vm1065_vm2, %v7824_v7, 0  ;;  %v7316_v11 = vld [vmem:[%s9145_s2 + $0x18] sm:$0xff]  }
  0x83   : > { %7118 = vmatprep.subr.msk.bf16.mxu1 %vm1065_vm2, %v7831_v12  ;;  %v3361_v12 = vsel %vm1065_vm2, %v7834_v13, 0 }
  0x88   : > { %6394 = vmatmul.mubr.msk.bf16.vlgmr.msra.gmra.mrb[0].mxu0 %vm984_vm0, %v7297_v14  ;;  %v3564_v14 = vor.u32 %v3562_v63, %v3560_v57 }
  0x89   : > { %6398 = vmatpush3.bf16.xpose.msra.mxu0 %v1072_v18  ;;  %6407 = vmatprep.mubr.msk.bf16.mxu0 %vm1065_vm2, %v7299_v15  ;;  %v3567_v15 = vrot.slane %v3565_v0, 1  ;;  %v7320_v18 = vld [vmem:[%s9146_s3 + $0x10] sm:$0xff]  }
  0x8a   : > { %7029 = vmatprep.subr.msk.bf16.mxu0 %vm1065_vm2, %v7824_v7  ;;  %6646 = vmatmul.mubr.msk.bf16.vlgmr.msra.gmra.mrb[0].mxu1 %vm984_vm0, %v7298_v19  ;;  %v1078_v7 = vsel %vm1065_vm2, %v7849_v28, 0 }
  0x8b   : > { %6650 = vmatpush3.bf16.xpose.msra.mxu1 %v3359_v21  ;;  %6659 = vmatprep.mubr.msk.bf16.mxu1 %vm1065_vm2, %v7301_v20  ;;  %v3593_v20 = vsel %vm984_vm0, %v3561_v1, 0  ;;  %v3568_v21 = vsel %vm944_vm1, %v3564_v14, %v3567_v15 }
  0x8c   : > { %7119 = vmatprep.subr.msk.bf16.mxu1 %vm1065_vm2, %v7834_v13  ;;  %v3365_v13 = vsel %vm1065_vm2, %v7857_v37, 0 }
  0x91   : > { %6400 = vmatpush3.bf16.xpose.msra.mxu0 %v1074_v6  ;;  %v3569_v6 = vshrl.u32 %v7992_v36, 16 }
  0x92   : > { %7030 = vmatprep.subr.msk.bf16.mxu0 %vm1065_vm2, %v7837_v16  ;;  %v1080_v16 = vsel %vm1065_vm2, %v7865_v42, 0 }
  0x93   : > { %6652 = vmatpush3.bf16.xpose.msra.mxu1 %v3361_v12  ;;  %v3572_v12 = vshll.u32 %v7998_v38, 16 }
  0x94   : > { %7120 = vmatprep.subr.msk.bf16.mxu1 %vm1065_vm2, %v7840_v17  ;;  %v7300_v17 = vld [vmem:[%s7818_s9 + $0x58] sm:$0xff]  }
  0x95   : > { %v1186_v27 = vsel %vm1065_vm2, %v7300_v17, 0  ;;  %v1268_v40 = vshrl.u32 %v7300_v17, 16  ;;  %v1270_v45 = vshll.u32 %v7300_v17, 16 }
  0x99   : > { %6402 = vmatpush3.bf16.xpose.msra.mxu0 %v1076_v22  ;;  %v1287_v22 = vor.u32 %v1285_v8, %v1283_v4 }
  0x9a   : > { %7031 = vmatprep.subr.msk.bf16.mxu0 %vm1065_vm2, %v7849_v28  ;;  %v7962_v28 = vld [vmem:[%s7818_s9 + $0x60] sm:$0xff]  }
  0x9b   : > { %6654 = vmatpush3.bf16.xpose.msra.mxu1 %v3363_v23  ;;  %v1189_v34 = vsel %vm1065_vm2, %v7962_v28, 0  ;;  %v1274_v46 = vshll.u32 %v7962_v28, 16  ;;  %v1278_v58 = vshrl.u32 %v7962_v28, 16 }
  0x9c   : > { %7121 = vmatprep.subr.msk.bf16.mxu1 %vm1065_vm2, %v7857_v37  ;;  %v7995_v37 = vld [vmem:[%s7818_s9 + $0x70] sm:$0xff]  }
  0x9d   : > { %v1195_v43 = vsel %vm1065_vm2, %v7995_v37, 0  ;;  %v1276_v53 = vrot.slane %v1274_v46, 1  ;;  %v1288_v9 = vshll.u32 %v7995_v37, 16 }
  0x9f   : > { %v1280_v3 = vor.u32 %v1278_v58, %v1276_v53  ;;  %v1290_v23 = vrot.slane %v1288_v9, 1 }
  0xa1   : > { %6404 = vmatpush3.bf16.xpose.msra.mxu0 %v1078_v7  ;;  %v1284_v19 = vsel %vm944_vm1, %v1280_v3, %v1283_v4 }
  0xa2   : > { %7032 = vmatprep.subr.msk.bf16.mxu0 %vm1065_vm2, %v7865_v42  ;;  %v3477_v42 = vsel %vm1065_vm2, %v7992_v36, 0  ;;  %v1312_v7 = vsel %vm984_vm0, %v1284_v19, 0 }
  0xa3   : > { %6656 = vmatpush3.bf16.xpose.msra.mxu1 %v3365_v13  ;;  %v3571_v13 = vor.u32 %v3569_v6, %v3567_v15 }
  0xa4   : > { %7122 = vmatprep.subr.msk.bf16.mxu1 %vm1065_vm2, %v7873_v50  ;;  %v1272_v50 = vrot.slane %v1270_v45, 1  ;;  %v8095_v45 = vld [vmem:[%s7818_s9 + $0xc] sm:$0xff]  }
  0xa5   : > { %v1437_v4 = vshrl.u32 %v8095_v45, 16 }
  0xa6   : > { %v1273_v55 = vor.u32 %v1272_v50, %v1268_v40  ;;  %v8087_v40 = vld [vmem:[%s7818_s9 + $0x34] sm:$0xf] }
  0xa8   : > { %v1277_v61 = vsel %vm944_vm1, %v1273_v55, %v1276_v53 }
  0xa9   : > { %6406 = vmatpush3.bf16.xpose.msra.mxu0 %v1080_v16  ;;  %v1309_v5 = vsel %vm984_vm0, %v1277_v61, 0  ;;  %v3574_v16 = vrot.slane %v3572_v12, 1 }
  0xaa   : > { %7033 = vmatprep.subr.msk.bf16.mxu0 %vm1065_vm2, %v7300_v17  ;;  %v1291_v17 = vsel %vm944_vm1, %v1287_v22, %v1290_v23  ;;  %v8135_v22 = vld [vmem:[%s7818_s9 + $0x48] sm:$0xff]  }
  0xab   : > { %6658 = vmatpush3.bf16.xpose.msra.mxu1 %v3367_v24  ;;  %v1292_v24 = vshrl.u32 %v7995_v37, 16 }
  0xac   : > { %7123 = vmatprep.subr.msk.bf16.mxu1 %vm1065_vm2, %v7302_v25  ;;  %v1295_v25 = vshll.u32 %v8018_v49, 16 }
  0xb0   : > { %6408 = vmatmul.mubr.msk.bf16.vlgmr.msra.gmra.mrb[0].mxu0 %vm1065_vm2, %v7303_v26  ;;  %v3596_v26 = vsel %vm984_vm0, %v3568_v21, 0 }
  0xb1   : > { %6412 = vmatpush3.bf16.xpose.msra.mxu0 %v1186_v27  ;;  %6421 = vmatprep.mubr.msk.bf16.mxu0 %vm1065_vm2, %v7313_v29  ;;  %v3575_v27 = vsel %vm944_vm1, %v3571_v13, %v3574_v16  ;;  %v3579_v29 = vshll.u32 %v8024_v52, 16 }
  0xb2   : > { %7034 = vmatprep.subr.msk.bf16.mxu0 %vm1065_vm2, %v7962_v28  ;;  %6660 = vmatmul.mubr.msk.bf16.vlgmr.msra.gmra.mrb[0].mxu1 %vm1065_vm2, %v7304_v30  ;;  %v3576_v28 = vshrl.u32 %v7998_v38, 16  ;;  %v1294_v30 = vor.u32 %v1292_v24, %v1290_v23  ;;  %v7324_v23 = vld [vmem:[%s9146_s3 + $0x18] sm:$0xff]   ;;  %v7333_v24 = vld [vmem:[%s9145_s2 + $0x20] sm:$0xff]  }
  0xb3   : > { %6664 = vmatpush3.bf16.xpose.msra.mxu1 %v3471_v32  ;;  %6673 = vmatprep.mubr.msk.bf16.mxu1 %vm1065_vm2, %v7314_v31  ;;  %v1297_v31 = vrot.slane %v1295_v25, 1  ;;  %v1376_v32 = vld [vmem:[%s7818_s9 + $0x4] sm:$0xf] }
  0xb4   : > { %7124 = vmatprep.subr.msk.bf16.mxu1 %vm1065_vm2, %v7977_v33  ;;  %v8079_v33 = vld [vmem:[%s7818_s9 + $0x8] sm:$0xf] }
  0xb9   : > { %6414 = vmatpush3.bf16.xpose.msra.mxu0 %v1189_v34  ;;  %v1315_v34 = vsel %vm984_vm0, %v1291_v17, 0 }
  0xba   : > { %7035 = vmatprep.subr.msk.bf16.mxu0 %vm1065_vm2, %v7986_v35  ;;  %v3578_v35 = vor.u32 %v3576_v28, %v3574_v16  ;;  %v3732_v28 = vshll.u32 %v8135_v22, 16 }
  0xbb   : > { %6666 = vmatpush3.bf16.xpose.msra.mxu1 %v3474_v39  ;;  %v5669_v39 = vcombine.low %v1376_v32, %v8079_v33  ;;  %v8160_v32 = vld [vmem:[%s7818_s9 + $0x50] sm:$0xf] }
  0xbc   : > { %7125 = vmatprep.subr.msk.bf16.mxu1 %vm1065_vm2, %v7992_v36  ;;  %v3581_v36 = vrot.slane %v3579_v29, 1 }
  0xbd   : > { %v1428_v46 = vshll.u32 %v5669_v39, 16  ;;  %v1426_v54 = vshrl.u32 %v5669_v39, 16 }
  0xbe   : > { %v3585_v57 = vor.u32 %v3583_v47, %v3581_v36 }
  0xbf   : > { %v1430_v55 = vrot.slane %v1428_v46, 1 }
  0xc0   : > { %v3605_v8 = vsel %vm984_vm0, %v3585_v57, 0 }
  0xc1   : > { %6416 = vmatpush3.bf16.xpose.msra.mxu0 %v1192_v41  ;;  %v3599_v41 = vsel %vm984_vm0, %v3575_v27, 0  ;;  %v1431_v60 = vor.u32 %v1430_v55, %v1426_v54 }
  0xc2   : > { %7036 = vmatprep.subr.msk.bf16.mxu0 %vm1065_vm2, %v7995_v37  ;;  %v1298_v37 = vsel %vm944_vm1, %v1294_v30, %v1297_v31 }
  0xc3   : > { %6668 = vmatpush3.bf16.xpose.msra.mxu1 %v3477_v42  ;;  %v3582_v42 = vsel %vm944_vm1, %v3578_v35, %v3581_v36  ;;  %v1318_v48 = vsel %vm984_vm0, %v1298_v37, 0  ;;  %v3734_v36 = vrot.slane %v3732_v28, 1 }
  0xc4   : > { %7126 = vmatprep.subr.msk.bf16.mxu1 %vm1065_vm2, %v7998_v38  ;;  %v5926_v38 = vld [vmem:[%s7818_s9 + $0x30] sm:$0xf] }
  0xc9   : > { %6418 = vmatpush3.bf16.xpose.msra.mxu0 %v1195_v43  ;;  %v1299_v43 = vshrl.u32 %v8018_v49, 16 }
  0xca   : > { %7037 = vmatprep.subr.msk.bf16.mxu0 %vm1065_vm2, %v8018_v49  ;;  %v1433_v49 = vshll.u32 %v8095_v45, 16 }
  0xcb   : > { %6670 = vmatpush3.bf16.xpose.msra.mxu1 %v3480_v44  ;;  %v5943_v44 = vcombine.low %v5926_v38, %v8087_v40  ;;  %v1301_v50 = vor.u32 %v1299_v43, %v1297_v31 }
  0xcc   : > { %7127 = vmatprep.subr.msk.bf16.mxu1 %vm1065_vm2, %v8024_v52 }
  0xcd   : > { %v3711_v53 = vshll.u32 %v5943_v44, 16  ;;  %v3709_v58 = vshrl.u32 %v5943_v44, 16  ;;  %v1321_v63 = vsel %vm984_vm0, %v1301_v50, 0  ;;  %v3736_v44 = vshrl.u32 %v8135_v22, 16 }
  0xcf   : > { %v3713_v52 = vrot.slane %v3711_v53, 1  ;;  %v3738_v53 = vor.u32 %v3736_v44, %v3734_v36  ;;  %v7344_v44 = vld [vmem:[%s9146_s3 + $0x28] sm:$0xff]  }
  0xd1   : > { %6420 = vmatpush3.bf16.xpose.msra.mxu0 %v1198_v56  ;;  %v3602_v56 = vsel %vm984_vm0, %v3582_v42, 0  ;;  %v3714_v0 = vor.u32 %v3713_v52, %v3709_v58  ;;  %v1385_v58 = vld [vmem:[%s7818_s9 + $0x4] sm:$0xe] }
  0xd2   : > { %7038 = vmatprep.subr.msk.bf16.mxu0 %vm984_vm0, %v1277_v61  ;;  %v1435_v61 = vrot.slane %v1433_v49, 1 }
  0xd3   : > { %6672 = vmatpush3.bf16.xpose.msra.mxu1 %v3483_v62  ;;  %v8108_v62 = vld [vmem:[%s7818_s9 + $0x14] sm:$0xff]  }
  0xd4   : > { %7128 = vmatprep.subr.msk.bf16.mxu1 %vm984_vm0, %v3561_v1  ;;  %v3718_v1 = vrot.slane %v3716_v59, 1  ;;  %v1436_v3 = vsel %vm944_vm1, %v1431_v60, %v1435_v61  ;;  %v1439_v14 = vor.u32 %v1437_v4, %v1435_v61  ;;  %v1445_v13 = vshrl.u32 %v8108_v62, 16 }
  0xd5   : > { %v5682_v61 = vcombine.low %v1385_v58, %v8079_v33  ;;  %v3842_v33 = vrot.slane %v8101_v51, 1  ;;  %v8290_v58 = vld [vmem:[%s7818_s9 + $0xf4] sm:$0xff]  }
  0xd6   : > { %v3719_v9 = vsel %vm944_vm1, %v3714_v0, %v3718_v1 }
  0xd7   : > { %v3754_v25 = vsel %vm1065_vm2, %v3719_v9, 0  ;;  %v1560_v4 = vrot.slane %v5682_v61, 1 }
  0xd8   : > { %6422 = vmatmul.mubr.msk.bf16.vlgmr.msra.gmra.mrb[0].mxu0 %vm1065_vm2, %v7315_v2  ;;  %v8113_v2 = vld [vmem:[%s7818_s9 + $0x40] sm:$0xff]  }
  0xd9   : > { %6426 = vmatpush3.bf16.xpose.msra.mxu0 %v1309_v5  ;;  %6435 = vmatprep.mubr.msk.bf16.mxu0 %vm984_vm0, %v7317_v10  ;;  %v1441_v5 = vshll.u32 %v8108_v62, 16  ;;  %v3720_v10 = vshrl.u32 %v8101_v51, 16  ;;  %v7339_v51 = vld [vmem:[%s9146_s3 + $0x20] sm:$0xff]  }
  0xda   : > { %7039 = vmatprep.subr.msk.bf16.mxu0 %vm984_vm0, %v1284_v19  ;;  %6674 = vmatmul.mubr.msk.bf16.vlgmr.msra.gmra.mrb[0].mxu1 %vm1065_vm2, %v7316_v11  ;;  %v3724_v11 = vshll.u32 %v8113_v2, 16  ;;  %v7323_v19 = vld [vmem:[%s9146_s3 + $0x18] sm:$0xff]  }
  0xdb   : > { %6678 = vmatpush3.bf16.xpose.msra.mxu1 %v3593_v20  ;;  %6687 = vmatprep.mubr.msk.bf16.mxu1 %vm984_vm0, %v7320_v18  ;;  %v1443_v15 = vrot.slane %v1441_v5, 1  ;;  %v8124_v18 = vld [vmem:[%s7818_s9 + $0x1c] sm:$0xff]   ;;  %v3722_v6 = vor.u32 %v3720_v10, %v3718_v1  ;;  %v1561_v5 = vrot.slane %v8095_v45, 1  ;;  %v1563_v45 = vrot.slane %v8108_v62, 1  ;;  %v7336_v62 = vld [vmem:[%s9145_s2 + $0x28] sm:$0xff]  }
  0xdc   : > { %7129 = vmatprep.subr.msk.bf16.mxu1 %vm984_vm0, %v3568_v21  ;;  %v7331_v20 = vld [vmem:[%s9145_s2 + $0x20] sm:$0xff]   ;;  %v1471_v21 = vsel %vm1065_vm2, %v1436_v3, 0  ;;  %v3726_v12 = vrot.slane %v3724_v11, 1  ;;  %v1449_v16 = vshll.u32 %v8124_v18, 16  ;;  %v1453_v38 = vshrl.u32 %v8124_v18, 16 }
  0xdd   : > { %v1447_v29 = vor.u32 %v1445_v13, %v1443_v15  ;;  %v1562_v10 = vsel %vm1559_vm3, %v1560_v4, %v1561_v5  ;;  %v3846_v13 = vrot.slane %v8135_v22, 1  ;;  %v8304_v4 = vld [vmem:[%s7818_s9 + $0xfc] ss:$0 sps:$4 sm:$0xff]  }
  0xde   : > { %v1451_v30 = vrot.slane %v1449_v16, 1 }
  0xe0   : > { %v1452_v39 = vsel %vm944_vm1, %v1447_v29, %v1451_v30  ;;  %v1455_v47 = vor.u32 %v1453_v38, %v1451_v30  ;;  %v7343_v38 = vld [vmem:[%s9146_s3 + $0x28] sm:$0xff]  }
  0xe1   : > { %6428 = vmatpush3.bf16.xpose.msra.mxu0 %v1312_v7  ;;  %v1444_v7 = vsel %vm944_vm1, %v1439_v14, %v1443_v15  ;;  %v7335_v14 = vld [vmem:[%s9145_s2 + $0x28] sm:$0xff]   ;;  %v1576_v15 = vsel %vm984_vm0, %v1562_v10, 0 }
  0xe2   : > { %7040 = vmatprep.subr.msk.bf16.mxu0 %vm984_vm0, %v1291_v17  ;;  %v8145_v17 = vld [vmem:[%s7818_s9 + $0x24] sm:$0xf] }
  0xe3   : > { %6680 = vmatpush3.bf16.xpose.msra.mxu1 %v3596_v26  ;;  %v3727_v26 = vsel %vm944_vm1, %v3722_v6, %v3726_v12  ;;  %v5673_v31 = vcombine.low %v8145_v17, %v8145_v17 }
  0xe4   : > { %7130 = vmatprep.subr.msk.bf16.mxu1 %vm984_vm0, %v3575_v27  ;;  %v3728_v27 = vshrl.u32 %v8113_v2, 16 }
  0xe6   : > { %v3730_v35 = vor.u32 %v3728_v27, %v3726_v12  ;;  %v1565_v12 = vrot.slane %v8124_v18, 1 }
  0xe8   : > { %v3735_v43 = vsel %vm944_vm1, %v3730_v35, %v3734_v36  ;;  %v1566_v16 = vsel %vm1559_vm3, %v1563_v45, %v1565_v12  ;;  %v7340_v36 = vld [vmem:[%s7818_s9 + $0xb0] sm:$0xff]  }
  0xe9   : > { %6430 = vmatpush3.bf16.xpose.msra.mxu0 %v1315_v34  ;;  %v1474_v34 = vsel %vm1065_vm2, %v1444_v7, 0  ;;  %v3760_v49 = vsel %vm1065_vm2, %v3735_v43, 0  ;;  %v1582_v22 = vsel %vm984_vm0, %v1566_v16, 0 }
  0xea   : > { %7041 = vmatprep.subr.msk.bf16.mxu0 %vm984_vm0, %v1298_v37  ;;  %v5947_v37 = vcombine.low %v8160_v32, %v8160_v32 }
  0xeb   : > { %6682 = vmatpush3.bf16.xpose.msra.mxu1 %v3599_v41  ;;  %v1457_v41 = vshll.u32 %v5673_v31, 16 }
  0xec   : > { %7131 = vmatprep.subr.msk.bf16.mxu1 %vm984_vm0, %v3582_v42  ;;  %v3757_v42 = vsel %vm1065_vm2, %v3727_v26, 0  ;;  %v3740_v46 = vshll.u32 %v5947_v37, 16  ;;  %v3744_v52 = vshrl.u32 %v5947_v37, 16 }
  0xee   : > { %v3742_v54 = vrot.slane %v3740_v46, 1  ;;  %v7354_v46 = vld [vmem:[%s9145_s2 + $0x30] sm:$0xff]  }
  0xf0   : > { %v3746_v1 = vor.u32 %v3744_v52, %v3742_v54  ;;  %v1782_v52 = vshll.u32 %v7340_v36, 16 }
  0xf1   : > { %6432 = vmatpush3.bf16.xpose.msra.mxu0 %v1318_v48  ;;  %v1459_v48 = vrot.slane %v1457_v41, 1  ;;  %v7353_v41 = vld [vmem:[%s9145_s2 + $0x30] sm:$0xff]  }
  0xf2   : > { %7042 = vmatprep.subr.msk.bf16.mxu0 %vm984_vm0, %v1301_v50  ;;  %v1477_v50 = vsel %vm1065_vm2, %v1452_v39, 0  ;;  %v3766_v11 = vsel %vm1065_vm2, %v3746_v1, 0 }
  0xf3   : > { %6684 = vmatpush3.bf16.xpose.msra.mxu1 %v3602_v56  ;;  %v1460_v55 = vsel %vm944_vm1, %v1455_v47, %v1459_v48  ;;  %v3743_v56 = vsel %vm944_vm1, %v3738_v53, %v3742_v54  ;;  %v8272_v53 = vld [vmem:[%s7818_s9 + $0xc0] sm:$0xff]  }
  0xf4   : > { %7132 = vmatprep.subr.msk.bf16.mxu1 %vm984_vm0, %v3585_v57  ;;  %v1461_v57 = vshrl.u32 %v5673_v31, 16  ;;  %v1480_v59 = vsel %vm1065_vm2, %v1460_v55, 0  ;;  %v3763_v0 = vsel %vm1065_vm2, %v3743_v56, 0 }
  0xf6   : > { %v1463_v60 = vor.u32 %v1461_v57, %v1459_v48  ;;  %v7346_v48 = vld [vmem:[%s7818_s9 + $0xe4] sm:$0xff]  }
  0xf7   : > { %v3981_v54 = vsel %vm1065_vm2, %v7346_v48, 0 }
  0xf9   : > { %6434 = vmatpush3.bf16.xpose.msra.mxu0 %v1321_v63  ;;  %v5935_v63 = vld [vmem:[%s7818_s9 + $0x30] sm:$0xe] }
  0xfa   : > { %7043 = vmatprep.subr.msk.bf16.mxu0 %vm1065_vm2, %v1436_v3  ;;  %v5956_v3 = vcombine.low %v5935_v63, %v8087_v40  ;;  %v1780_v63 = vshrl.u32 %v7340_v36, 16 }
  0xfb   : > { %6686 = vmatpush3.bf16.xpose.msra.mxu1 %v3605_v8  ;;  %v1483_v8 = vsel %vm1065_vm2, %v1463_v60, 0 }
  0xfc   : > { %7133 = vmatprep.subr.msk.bf16.mxu1 %vm1065_vm2, %v3719_v9  ;;  %v3841_v9 = vrot.slane %v5956_v3, 1  ;;  %v3987_v3 = vsel %vm1065_vm2, %v8290_v58, 0 }
  0xfe   : > { %v3843_v40 = vsel %vm1559_vm3, %v3841_v9, %v3842_v33  ;;  %v4065_v9 = vshll.u32 %v7346_v48, 16 }
  0xff   : > { %v3857_v6 = vsel %vm984_vm0, %v3843_v40, 0 }
 0x100   : > { %6436 = vmatmul.mubr.msk.bf16.vlgmr.msra.gmra.mrb[0].mxu0 %vm984_vm0, %v7323_v19  ;;  %v3844_v19 = vrot.slane %v8113_v2, 1 }
 0x101   : > { %6440 = vmatpush3.bf16.xpose.msra.mxu0 %v1471_v21  ;;  %6449 = vmatprep.mubr.msk.bf16.mxu0 %vm1065_vm2, %v7331_v20  ;;  %v1564_v20 = vsel %vm1559_vm3, %v1561_v5, %v1563_v45  ;;  %v7341_v21 = vld [vmem:[%s9146_s3 + $0x20] sm:$0xff]   ;;  %v4067_v45 = vrot.slane %v4065_v9, 1 }
 0x102   : > { %7044 = vmatprep.subr.msk.bf16.mxu0 %vm1065_vm2, %v1444_v7  ;;  %6688 = vmatmul.mubr.msk.bf16.vlgmr.msra.gmra.mrb[0].mxu1 %vm984_vm0, %v7324_v23  ;;  %v3845_v2 = vsel %vm1559_vm3, %v3842_v33, %v3844_v19  ;;  %v1386_v23 = vld [vmem:[%s7818_s9 + $0x28] sm:$0x1]  ;;  %v1579_v7 = vsel %vm984_vm0, %v1564_v20, 0  ;;  %v3847_v18 = vsel %vm1559_vm3, %v3844_v19, %v3846_v13  ;;  %v3990_v19 = vsel %vm1065_vm2, %v8304_v4, 0  ;;  %v7372_v9 = vld [vmem:[%s9145_s2 + $0x40] sm:$0xff]  }
 0x103   : > { %6692 = vmatpush3.bf16.xpose.msra.mxu1 %v3754_v25  ;;  %6701 = vmatprep.mubr.msk.bf16.mxu1 %vm1065_vm2, %v7333_v24  ;;  %v5683_v24 = vcombine.low %v8145_v17, %v1386_v23  ;;  %v5936_v25 = vld [vmem:[%s7818_s9 + $0x54] sm:$0x1]  ;;  %v3863_v30 = vsel %vm984_vm0, %v3847_v18, 0 }
 0x104   : > { %7134 = vmatprep.subr.msk.bf16.mxu1 %vm1065_vm2, %v3727_v26  ;;  %v3860_v26 = vsel %vm984_vm0, %v3845_v2, 0  ;;  %v5957_v27 = vcombine.low %v8160_v32, %v5936_v25  ;;  %v7357_v23 = vld [vmem:[%s9146_s3 + $0x30] sm:$0xff]  }
 0x105   : > { %v1567_v28 = vrot.slane %v5683_v24, 1  ;;  %v7356_v24 = vld [vmem:[%s9145_s2 + $0x38] sm:$0xff]  }
 0x106   : > { %v3848_v29 = vrot.slane %v5957_v27, 1  ;;  %v7359_v27 = vld [vmem:[%s9146_s3 + $0x30] sm:$0xff]  }
 0x107   : > { %v1568_v17 = vsel %vm1559_vm3, %v1565_v12, %v1567_v28  ;;  %v1588_v35 = vsel %vm984_vm0, %v1567_v28, 0  ;;  %v7355_v12 = vld [vmem:[%s9145_s2 + $0x38] sm:$0xff]  }
 0x108   : > { %v3849_v31 = vsel %vm1559_vm3, %v3846_v13, %v3848_v29  ;;  %v1585_v32 = vsel %vm984_vm0, %v1568_v17, 0  ;;  %v3869_v37 = vsel %vm984_vm0, %v3848_v29, 0 }
 0x109   : > { %6442 = vmatpush3.bf16.xpose.msra.mxu0 %v1474_v34  ;;  %v3866_v34 = vsel %vm984_vm0, %v3849_v31, 0 }
 0x10a   : > { %7045 = vmatprep.subr.msk.bf16.mxu0 %vm1065_vm2, %v1452_v39  ;;  %v7342_v39 = vld [vmem:[%s7818_s9 + $0xdc] sm:$0xff]  }
 0x10b   : > { %6694 = vmatpush3.bf16.xpose.msra.mxu1 %v3757_v42  ;;  %v1698_v42 = vsel %vm1065_vm2, %v7340_v36, 0  ;;  %v3978_v47 = vsel %vm1065_vm2, %v7342_v39, 0  ;;  %v4061_v61 = vshll.u32 %v7342_v39, 16  ;;  %v4059_v5 = vshrl.u32 %v7342_v39, 16 }
 0x10c   : > { %7135 = vmatprep.subr.msk.bf16.mxu1 %vm1065_vm2, %v3735_v43  ;;  %v7345_v43 = vld [vmem:[%s7818_s9 + $0xb8] sm:$0xff]  }
 0x111   : > { %6444 = vmatpush3.bf16.xpose.msra.mxu0 %v1477_v50  ;;  %v1701_v50 = vsel %vm1065_vm2, %v7345_v43, 0 }
 0x112   : > { %7046 = vmatprep.subr.msk.bf16.mxu0 %vm1065_vm2, %v1460_v55  ;;  %v8276_v55 = vld [vmem:[%s7818_s9 + $0xec] sm:$0xff]  }
 0x113   : > { %6696 = vmatpush3.bf16.xpose.msra.mxu1 %v3760_v49  ;;  %v1704_v49 = vsel %vm1065_vm2, %v8272_v53, 0  ;;  %v3984_v57 = vsel %vm1065_vm2, %v8276_v55, 0 }
 0x114   : > { %7136 = vmatprep.subr.msk.bf16.mxu1 %vm1065_vm2, %v3743_v56  ;;  %v8285_v56 = vld [vmem:[%s7818_s9 + $0xc8] sm:$0xff]  }
 0x119   : > { %6446 = vmatpush3.bf16.xpose.msra.mxu0 %v1480_v59  ;;  %v1707_v59 = vsel %vm1065_vm2, %v8285_v56, 0 }
 0x11a   : > { %7047 = vmatprep.subr.msk.bf16.mxu0 %vm1065_vm2, %v1463_v60  ;;  %v8299_v60 = vld [vmem:[%s7818_s9 + $0xd0] ss:$0 sps:$4 sm:$0xff]  }
 0x11b   : > { %6698 = vmatpush3.bf16.xpose.msra.mxu1 %v3763_v0  ;;  %v1784_v0 = vrot.slane %v1782_v52, 1 }
 0x11c   : > { %7137 = vmatprep.subr.msk.bf16.mxu1 %vm1065_vm2, %v3746_v1  ;;  %v1786_v1 = vshll.u32 %v7345_v43, 16 }
 0x11d   : > { %v1785_v33 = vor.u32 %v1784_v0, %v1780_v63  ;;  %v7360_v0 = vld [vmem:[%s7818_s9 + $0x134] sm:$0xff]  }
 0x121   : > { %6448 = vmatpush3.bf16.xpose.msra.mxu0 %v1483_v8  ;;  %v4063_v8 = vrot.slane %v4061_v61, 1  ;;  %v7358_v61 = vld [vmem:[%s7818_s9 + $0x108] sm:$0xff]  }
 0x122   : > { %7048 = vmatprep.subr.msk.bf16.mxu0 %vm984_vm0, %v1562_v10  ;;  %v1788_v10 = vrot.slane %v1786_v1, 1  ;;  %v7361_v1 = vld [vmem:[%s9146_s3 + $0x38] sm:$0xff]  }
 0x123   : > { %6700 = vmatpush3.bf16.xpose.msra.mxu1 %v3766_v11  ;;  %v1710_v11 = vsel %vm1065_vm2, %v8299_v60, 0 }
 0x124   : > { %7138 = vmatprep.subr.msk.bf16.mxu1 %vm984_vm0, %v3843_v40  ;;  %v4064_v40 = vor.u32 %v4063_v8, %v4059_v5  ;;  %v8382_v5 = vld [vmem:[%s7818_s9 + $0x110] sm:$0xff]   ;;  %v7362_v8 = vld [vmem:[%s9146_s3 + $0x38] sm:$0xff]  }
 0x128   : > { %6450 = vmatmul.mubr.msk.bf16.vlgmr.msra.gmra.mrb[0].mxu0 %vm1065_vm2, %v7335_v14  ;;  %v1789_v14 = vsel %vm944_vm1, %v1785_v33, %v1788_v10  ;;  %v4221_v33 = vsel %vm1065_vm2, %v7360_v0, 0 }
 0x129   : > { %6454 = vmatpush3.bf16.xpose.msra.mxu0 %v1576_v15  ;;  %6463 = vmatprep.mubr.msk.bf16.mxu0 %vm984_vm0, %v7339_v51  ;;  %v1790_v51 = vshrl.u32 %v7345_v43, 16  ;;  %v1793_v15 = vshll.u32 %v8272_v53, 16 }
 0x12a   : > { %7049 = vmatprep.subr.msk.bf16.mxu0 %vm984_vm0, %v1564_v20  ;;  %6702 = vmatmul.mubr.msk.bf16.vlgmr.msra.gmra.mrb[0].mxu1 %vm1065_vm2, %v7336_v62  ;;  %v4068_v62 = vsel %vm944_vm1, %v4064_v40, %v4067_v45  ;;  %v4069_v20 = vshrl.u32 %v7346_v48, 16  ;;  %v8405_v40 = vld [vmem:[%s7818_s9 + $0x118] sm:$0xff]  }
 0x12b   : > { %6706 = vmatpush3.bf16.xpose.msra.mxu1 %v3857_v6  ;;  %6715 = vmatprep.mubr.msk.bf16.mxu1 %vm984_vm0, %v7341_v21  ;;  %v4072_v21 = vshll.u32 %v8276_v55, 16  ;;  %v1792_v6 = vor.u32 %v1790_v51, %v1788_v10  ;;  %v8393_v10 = vld [vmem:[%s7818_s9 + $0x13c] sm:$0xff]   ;;  %v1949_v51 = vsel %vm1065_vm2, %v8405_v40, 0 }
 0x12c   : > { %7139 = vmatprep.subr.msk.bf16.mxu1 %vm984_vm0, %v3845_v2  ;;  %v1795_v2 = vrot.slane %v1793_v15, 1  ;;  %v4071_v13 = vor.u32 %v4069_v20, %v4067_v45  ;;  %v4224_v45 = vsel %vm1065_vm2, %v8393_v10, 0  ;;  %v8419_v15 = vld [vmem:[%s7818_s9 + $0x120] sm:$0xff]   ;;  %v2027_v20 = vshll.u32 %v7358_v61, 16 }
 0x12e   : > { %v1796_v25 = vsel %vm944_vm1, %v1792_v6, %v1795_v2  ;;  %v8433_v6 = vld [vmem:[%s7818_s9 + $0x128] ss:$0 sps:$4 sm:$0xff]  }
 0x131   : > { %6456 = vmatpush3.bf16.xpose.msra.mxu0 %v1579_v7  ;;  %v1821_v7 = vsel %vm984_vm0, %v1789_v14, 0 }
 0x132   : > { %7050 = vmatprep.subr.msk.bf16.mxu0 %vm984_vm0, %v1566_v16  ;;  %v4074_v16 = vrot.slane %v4072_v21, 1  ;;  %v1952_v21 = vsel %vm1065_vm2, %v8419_v15, 0 }
 0x133   : > { %6708 = vmatpush3.bf16.xpose.msra.mxu1 %v3860_v26  ;;  %v1797_v26 = vshrl.u32 %v8272_v53, 16 }
 0x134   : > { %7140 = vmatprep.subr.msk.bf16.mxu1 %vm984_vm0, %v3847_v18  ;;  %v1800_v18 = vshll.u32 %v8285_v56, 16 }
 0x139   : > { %6458 = vmatpush3.bf16.xpose.msra.mxu0 %v1582_v22  ;;  %v4075_v22 = vsel %vm944_vm1, %v4071_v13, %v4074_v16 }
 0x13a   : > { %7051 = vmatprep.subr.msk.bf16.mxu0 %vm984_vm0, %v1568_v17  ;;  %v4079_v17 = vshll.u32 %v8290_v58, 16 }
 0x13b   : > { %6710 = vmatpush3.bf16.xpose.msra.mxu1 %v3863_v30  ;;  %v1799_v30 = vor.u32 %v1797_v26, %v1795_v2  ;;  %v4304_v2 = vshll.u32 %v7360_v0, 16  ;;  %v4308_v26 = vshll.u32 %v8393_v10, 16 }
 0x13c   : > { %7141 = vmatprep.subr.msk.bf16.mxu1 %vm984_vm0, %v3849_v31  ;;  %v1802_v31 = vrot.slane %v1800_v18, 1 }
 0x141   : > { %6460 = vmatpush3.bf16.xpose.msra.mxu0 %v1585_v32  ;;  %v1824_v32 = vsel %vm984_vm0, %v1796_v25, 0 }
 0x142   : > { %7052 = vmatprep.subr.msk.bf16.mxu0 %vm984_vm0, %v1567_v28  ;;  %v4100_v28 = vsel %vm984_vm0, %v4068_v62, 0 }
 0x143   : > { %6712 = vmatpush3.bf16.xpose.msra.mxu1 %v3866_v34 }
 0x144   : > { %7142 = vmatprep.subr.msk.bf16.mxu1 %vm984_vm0, %v3848_v29  ;;  %v4076_v29 = vshrl.u32 %v8276_v55, 16 }
 0x146   : > { %v4078_v34 = vor.u32 %v4076_v29, %v4074_v16  ;;  %v8439_v16 = vld [vmem:[%s7818_s9 + $0x154] ss:$0 sps:$4 sm:$0xff]   ;;  %v4310_v29 = vrot.slane %v4308_v26, 1 }
 0x149   : > { %6462 = vmatpush3.bf16.xpose.msra.mxu0 %v1588_v35  ;;  %v4081_v35 = vrot.slane %v4079_v17, 1 }
 0x14a   : > { %7053 = vmatprep.subr.msk.bf16.mxu0 %vm1065_vm2, %v7340_v36  ;;  %v1803_v36 = vsel %vm944_vm1, %v1799_v30, %v1802_v31  ;;  %v2035_v30 = vshrl.u32 %v8382_v5, 16 }
 0x14b   : > { %6714 = vmatpush3.bf16.xpose.msra.mxu1 %v3869_v37  ;;  %v1804_v37 = vshrl.u32 %v8285_v56, 16 }
 0x14c   : > { %7143 = vmatprep.subr.msk.bf16.mxu1 %vm1065_vm2, %v7342_v39  ;;  %v1807_v39 = vshll.u32 %v8299_v60, 16 }
 0x150   : > { %6464 = vmatmul.mubr.msk.bf16.vlgmr.msra.gmra.mrb[0].mxu0 %vm984_vm0, %v7343_v38  ;;  %v4103_v38 = vsel %vm984_vm0, %v4075_v22, 0 }
 0x151   : > { %6468 = vmatpush3.bf16.xpose.msra.mxu0 %v1698_v42  ;;  %6477 = vmatprep.mubr.msk.bf16.mxu0 %vm1065_vm2, %v7353_v41  ;;  %v4082_v41 = vsel %vm944_vm1, %v4078_v34, %v4081_v35  ;;  %v4083_v42 = vshrl.u32 %v8290_v58, 16  ;;  %v4233_v34 = vsel %vm1065_vm2, %v8439_v16, 0 }
 0x152   : > { %7054 = vmatprep.subr.msk.bf16.mxu0 %vm1065_vm2, %v7345_v43  ;;  %6716 = vmatmul.mubr.msk.bf16.vlgmr.msra.gmra.mrb[0].mxu1 %vm984_vm0, %v7344_v44  ;;  %v4086_v43 = vshll.u32 %v8304_v4, 16  ;;  %v1806_v44 = vor.u32 %v1804_v37, %v1802_v31  ;;  %v2038_v31 = vshll.u32 %v8405_v40, 16  ;;  %v7373_v37 = vld [vmem:[%s9145_s2 + $0x48] sm:$0xff]  }
 0x153   : > { %6720 = vmatpush3.bf16.xpose.msra.mxu1 %v3978_v47  ;;  %6729 = vmatprep.mubr.msk.bf16.mxu1 %vm1065_vm2, %v7354_v46  ;;  %v1809_v46 = vrot.slane %v1807_v39, 1  ;;  %v1827_v47 = vsel %vm984_vm0, %v1803_v36, 0 }
 0x154   : > { %7144 = vmatprep.subr.msk.bf16.mxu1 %vm1065_vm2, %v7346_v48  ;;  %v4085_v48 = vor.u32 %v4083_v42, %v4081_v35  ;;  %v4312_v35 = vshrl.u32 %v8393_v10, 16 }
 0x159   : > { %6470 = vmatpush3.bf16.xpose.msra.mxu0 %v1701_v50  ;;  %v4088_v50 = vrot.slane %v4086_v43, 1  ;;  %v2042_v43 = vshrl.u32 %v8405_v40, 16 }
 0x15a   : > { %7055 = vmatprep.subr.msk.bf16.mxu0 %vm1065_vm2, %v8272_v53  ;;  %v1810_v53 = vsel %vm944_vm1, %v1806_v44, %v1809_v46  ;;  %v7375_v44 = vld [vmem:[%s9146_s3 + $0x40] sm:$0xff]  }
 0x15b   : > { %6722 = vmatpush3.bf16.xpose.msra.mxu1 %v3981_v54  ;;  %v4106_v54 = vsel %vm984_vm0, %v4082_v41, 0 }
 0x15c   : > { %7145 = vmatprep.subr.msk.bf16.mxu1 %vm1065_vm2, %v8276_v55  ;;  %v4089_v55 = vsel %vm944_vm1, %v4085_v48, %v4088_v50  ;;  %v2045_v48 = vshll.u32 %v8419_v15, 16 }
 0x15d   : > { %v4109_v52 = vsel %vm984_vm0, %v4089_v55, 0 }
 0x161   : > { %6472 = vmatpush3.bf16.xpose.msra.mxu0 %v1704_v49  ;;  %v1811_v49 = vshrl.u32 %v8299_v60, 16 }
 0x162   : > { %7056 = vmatprep.subr.msk.bf16.mxu0 %vm1065_vm2, %v8285_v56  ;;  %v4090_v56 = vshrl.u32 %v8304_v4, 16 }
 0x163   : > { %6724 = vmatpush3.bf16.xpose.msra.mxu1 %v3984_v57  ;;  %v1830_v57 = vsel %vm984_vm0, %v1810_v53, 0 }
 0x164   : > { %7146 = vmatprep.subr.msk.bf16.mxu1 %vm1065_vm2, %v8290_v58  ;;  %v1813_v58 = vor.u32 %v1811_v49, %v1809_v46  ;;  %v7374_v46 = vld [vmem:[%s9145_s2 + $0x48] sm:$0xff]  }
 0x169   : > { %6474 = vmatpush3.bf16.xpose.msra.mxu0 %v1707_v59  ;;  %v4092_v59 = vor.u32 %v4090_v56, %v4088_v50  ;;  %v7378_v50 = vld [vmem:[%s9146_s3 + $0x40] sm:$0xff]  }
 0x16a   : > { %7057 = vmatprep.subr.msk.bf16.mxu0 %vm1065_vm2, %v8299_v60  ;;  %v1833_v60 = vsel %vm984_vm0, %v1813_v58, 0 }
 0x16b   : > { %6726 = vmatpush3.bf16.xpose.msra.mxu1 %v3987_v3  ;;  %v4112_v63 = vsel %vm984_vm0, %v4092_v59, 0  ;;  %v7371_v3 = vld [vmem:[%s9145_s2 + $0x40] sm:$0xff]  }
 0x16c   : > { %7147 = vmatprep.subr.msk.bf16.mxu1 %vm1065_vm2, %v8304_v4  ;;  %v1943_v4 = vsel %vm1065_vm2, %v7358_v61, 0 }
 0x171   : > { %6476 = vmatpush3.bf16.xpose.msra.mxu0 %v1710_v11  ;;  %v1946_v11 = vsel %vm1065_vm2, %v8382_v5, 0 }
 0x172   : > { %7058 = vmatprep.subr.msk.bf16.mxu0 %vm984_vm0, %v1789_v14  ;;  %v8410_v14 = vld [vmem:[%s7818_s9 + $0x144] sm:$0xff]  }
 0x173   : > { %6728 = vmatpush3.bf16.xpose.msra.mxu1 %v3990_v19  ;;  %v4227_v19 = vsel %vm1065_vm2, %v8410_v14, 0  ;;  %v4319_v49 = vshrl.u32 %v8410_v14, 16 }
 0x174   : > { %7148 = vmatprep.subr.msk.bf16.mxu1 %vm984_vm0, %v4068_v62  ;;  %v8424_v62 = vld [vmem:[%s7818_s9 + $0x14c] sm:$0xff]  }
 0x175   : > { %v4230_v13 = vsel %vm1065_vm2, %v8424_v62, 0  ;;  %v4322_v56 = vshll.u32 %v8424_v62, 16 }
 0x178   : > { %6478 = vmatmul.mubr.msk.bf16.vlgmr.msra.gmra.mrb[0].mxu0 %vm1065_vm2, %v7355_v12  ;;  %v2025_v12 = vshrl.u32 %v7358_v61, 16 }
 0x179   : > { %6482 = vmatpush3.bf16.xpose.msra.mxu0 %v1821_v7  ;;  %6491 = vmatprep.mubr.msk.bf16.mxu0 %vm984_vm0, %v7357_v23  ;;  %v2029_v23 = vrot.slane %v2027_v20, 1  ;;  %v2031_v7 = vshll.u32 %v8382_v5, 16 }
 0x17a   : > { %7059 = vmatprep.subr.msk.bf16.mxu0 %vm984_vm0, %v1796_v25  ;;  %6730 = vmatmul.mubr.msk.bf16.vlgmr.msra.gmra.mrb[0].mxu1 %vm1065_vm2, %v7356_v24  ;;  %v4302_v24 = vshrl.u32 %v7360_v0, 16  ;;  %v4306_v25 = vrot.slane %v4304_v2, 1 }
 0x17b   : > { %6734 = vmatpush3.bf16.xpose.msra.mxu1 %v4100_v28  ;;  %6743 = vmatprep.mubr.msk.bf16.mxu1 %vm984_vm0, %v7359_v27  ;;  %v2030_v18 = vor.u32 %v2029_v23, %v2025_v12  ;;  %v2033_v27 = vrot.slane %v2031_v7, 1  ;;  %v1955_v28 = vsel %vm1065_vm2, %v8433_v6, 0  ;;  %v8514_v12 = vld [vmem:[%s7818_s9 + $0xbc] sm:$0xff]   ;;  %v4333_v7 = vshrl.u32 %v8439_v16, 16 }
 0x17c   : > { %7149 = vmatprep.subr.msk.bf16.mxu1 %vm984_vm0, %v4075_v22  ;;  %v4307_v22 = vor.u32 %v4306_v25, %v4302_v24  ;;  %v8520_v25 = vld [vmem:[%s7818_s9 + $0xe8] sm:$0xff]  }
 0x17d   : > { %v2034_v17 = vsel %vm944_vm1, %v2030_v18, %v2033_v27  ;;  %v2037_v39 = vor.u32 %v2035_v30, %v2033_v27 }
 0x181   : > { %6484 = vmatpush3.bf16.xpose.msra.mxu0 %v1824_v32  ;;  %v4315_v32 = vshll.u32 %v8410_v14, 16 }
 0x182   : > { %7060 = vmatprep.subr.msk.bf16.mxu0 %vm984_vm0, %v1803_v36  ;;  %v4311_v36 = vsel %vm944_vm1, %v4307_v22, %v4310_v29 }
 0x183   : > { %6736 = vmatpush3.bf16.xpose.msra.mxu1 %v4103_v38  ;;  %v2040_v38 = vrot.slane %v2038_v31, 1  ;;  %v4317_v42 = vrot.slane %v4315_v32, 1  ;;  %v8527_v32 = vld [vmem:[%s7818_s9 + $0xc4] sm:$0xff]  }
 0x184   : > { %7150 = vmatprep.subr.msk.bf16.mxu1 %vm984_vm0, %v4082_v41  ;;  %v2066_v41 = vsel %vm984_vm0, %v2034_v17, 0 }
 0x189   : > { %6486 = vmatpush3.bf16.xpose.msra.mxu0 %v1827_v47  ;;  %v4314_v47 = vor.u32 %v4312_v35, %v4310_v29 }
 0x18a   : > { %7061 = vmatprep.subr.msk.bf16.mxu0 %vm984_vm0, %v1810_v53  ;;  %v2041_v53 = vsel %vm944_vm1, %v2037_v39, %v2040_v38 }
 0x18b   : > { %6738 = vmatpush3.bf16.xpose.msra.mxu1 %v4106_v54  ;;  %v4343_v54 = vsel %vm984_vm0, %v4311_v36, 0 }
 0x18c   : > { %7151 = vmatprep.subr.msk.bf16.mxu1 %vm984_vm0, %v4089_v55  ;;  %v4318_v55 = vsel %vm944_vm1, %v4314_v47, %v4317_v42 }
 0x191   : > { %6488 = vmatpush3.bf16.xpose.msra.mxu0 %v1830_v57  ;;  %v2044_v57 = vor.u32 %v2042_v43, %v2040_v38  ;;  %v2194_v38 = vshrl.u32 %v8514_v12, 16 }
 0x192   : > { %7062 = vmatprep.subr.msk.bf16.mxu0 %vm984_vm0, %v1813_v58  ;;  %v2047_v58 = vrot.slane %v2045_v48, 1 }
 0x193   : > { %6740 = vmatpush3.bf16.xpose.msra.mxu1 %v4109_v52  ;;  %v2069_v52 = vsel %vm984_vm0, %v2041_v53, 0 }
 0x194   : > { %7152 = vmatprep.subr.msk.bf16.mxu1 %vm984_vm0, %v4092_v59  ;;  %v4321_v59 = vor.u32 %v4319_v49, %v4317_v42 }
 0x199   : > { %6490 = vmatpush3.bf16.xpose.msra.mxu0 %v1833_v60  ;;  %v4324_v60 = vrot.slane %v4322_v56, 1 }
 0x19a   : > { %7063 = vmatprep.subr.msk.bf16.mxu0 %vm1065_vm2, %v7358_v61  ;;  %v2048_v61 = vsel %vm944_vm1, %v2044_v57, %v2047_v58  ;;  %v8554_v57 = vld [vmem:[%s7818_s9 + $0xf8] sm:$0xff]  }
 0x19b   : > { %6742 = vmatpush3.bf16.xpose.msra.mxu1 %v4112_v63  ;;  %v2049_v63 = vshrl.u32 %v8419_v15, 16 }
 0x19c   : > { %7153 = vmatprep.subr.msk.bf16.mxu1 %vm1065_vm2, %v7360_v0  ;;  %v2052_v0 = vshll.u32 %v8433_v6, 16 }
 0x1a0   : > { %6492 = vmatmul.mubr.msk.bf16.vlgmr.msra.gmra.mrb[0].mxu0 %vm984_vm0, %v7361_v1  ;;  %v4346_v1 = vsel %vm984_vm0, %v4318_v55, 0 }
 0x1a1   : > { %6496 = vmatpush3.bf16.xpose.msra.mxu0 %v1943_v4  ;;  %6505 = vmatprep.mubr.msk.bf16.mxu0 %vm1065_vm2, %v7371_v3  ;;  %v4325_v3 = vsel %vm944_vm1, %v4321_v59, %v4324_v60  ;;  %v4326_v4 = vshrl.u32 %v8424_v62, 16  ;;  %v2202_v59 = vshrl.u32 %v8527_v32, 16 }
 0x1a2   : > { %7064 = vmatprep.subr.msk.bf16.mxu0 %vm1065_vm2, %v8382_v5  ;;  %6744 = vmatmul.mubr.msk.bf16.vlgmr.msra.gmra.mrb[0].mxu1 %vm984_vm0, %v7362_v8  ;;  %v4329_v5 = vshll.u32 %v8439_v16, 16  ;;  %v2051_v8 = vor.u32 %v2049_v63, %v2047_v58  ;;  %v7382_v58 = vld [vmem:[%s9146_s3 + $0x48] sm:$0xff]   ;;  %v7391_v63 = vld [vmem:[%s9145_s2 + $0x50] sm:$0xff]  }
 0x1a3   : > { %6748 = vmatpush3.bf16.xpose.msra.mxu1 %v4221_v33  ;;  %6757 = vmatprep.mubr.msk.bf16.mxu1 %vm1065_vm2, %v7372_v9  ;;  %v2054_v9 = vrot.slane %v2052_v0, 1  ;;  %v5746_v33 = vld [vmem:[%s7818_s9 + $0xb4] sm:$0xf] }
 0x1a4   : > { %7154 = vmatprep.subr.msk.bf16.mxu1 %vm1065_vm2, %v8393_v10  ;;  %v8498_v10 = vld [vmem:[%s7818_s9 + $0xb8] sm:$0xf] }
 0x1a9   : > { %6498 = vmatpush3.bf16.xpose.msra.mxu0 %v1946_v11  ;;  %v2072_v11 = vsel %vm984_vm0, %v2048_v61, 0 }
 0x1aa   : > { %7065 = vmatprep.subr.msk.bf16.mxu0 %vm1065_vm2, %v8405_v40  ;;  %v4328_v40 = vor.u32 %v4326_v4, %v4324_v60  ;;  %v4482_v4 = vshll.u32 %v8554_v57, 16 }
 0x1ab   : > { %6750 = vmatpush3.bf16.xpose.msra.mxu1 %v4224_v45  ;;  %v4331_v45 = vrot.slane %v4329_v5, 1 }
 0x1ac   : > { %7155 = vmatprep.subr.msk.bf16.mxu1 %vm1065_vm2, %v8410_v14  ;;  %v2055_v14 = vsel %vm944_vm1, %v2051_v8, %v2054_v9 }
 0x1ad   : > { %v4332_v20 = vsel %vm944_vm1, %v4328_v40, %v4331_v45  ;;  %v4335_v22 = vor.u32 %v4333_v7, %v4331_v45  ;;  %v4484_v45 = vrot.slane %v4482_v4, 1 }
 0x1af   : > { %v4355_v42 = vsel %vm984_vm0, %v4335_v22, 0 }
 0x1b1   : > { %6500 = vmatpush3.bf16.xpose.msra.mxu0 %v1949_v51  ;;  %v5763_v51 = vcombine.low %v5746_v33, %v8498_v10  ;;  %v8579_v33 = vld [vmem:[%s7818_s9 + $0x100] sm:$0xf] }
 0x1b2   : > { %7066 = vmatprep.subr.msk.bf16.mxu0 %vm1065_vm2, %v8419_v15  ;;  %v6020_v15 = vld [vmem:[%s7818_s9 + $0xe0] sm:$0xf] }
 0x1b3   : > { %6752 = vmatpush3.bf16.xpose.msra.mxu1 %v4227_v19  ;;  %v8506_v19 = vld [vmem:[%s7818_s9 + $0xe4] sm:$0xf]  ;;  %v2185_v23 = vshll.u32 %v5763_v51, 16  ;;  %v2183_v18 = vshrl.u32 %v5763_v51, 16 }
 0x1b4   : > { %7156 = vmatprep.subr.msk.bf16.mxu1 %vm1065_vm2, %v8424_v62  ;;  %v4349_v62 = vsel %vm984_vm0, %v4325_v3, 0  ;;  %v6037_v2 = vcombine.low %v6020_v15, %v8506_v19 }
 0x1b5   : > { %v2187_v27 = vrot.slane %v2185_v23, 1 }
 0x1b6   : > { %v4461_v26 = vshll.u32 %v6037_v2, 16  ;;  %v4459_v29 = vshrl.u32 %v6037_v2, 16  ;;  %v4486_v2 = vshrl.u32 %v8554_v57, 16 }
 0x1b7   : > { %v2188_v30 = vor.u32 %v2187_v27, %v2183_v18 }
 0x1b9   : > { %6502 = vmatpush3.bf16.xpose.msra.mxu0 %v1952_v21  ;;  %v2056_v21 = vshrl.u32 %v8433_v6, 16 }
 0x1ba   : > { %7067 = vmatprep.subr.msk.bf16.mxu0 %vm1065_vm2, %v8433_v6  ;;  %v2190_v6 = vshll.u32 %v8514_v12, 16 }
 0x1bb   : > { %6754 = vmatpush3.bf16.xpose.msra.mxu1 %v4230_v13  ;;  %v2075_v13 = vsel %vm984_vm0, %v2055_v14, 0  ;;  %v2058_v24 = vor.u32 %v2056_v21, %v2054_v9 }
 0x1bc   : > { %7157 = vmatprep.subr.msk.bf16.mxu1 %vm1065_vm2, %v8439_v16  ;;  %v4463_v16 = vrot.slane %v4461_v26, 1  ;;  %v2192_v31 = vrot.slane %v2190_v6, 1  ;;  %v4488_v26 = vor.u32 %v4486_v2, %v4484_v45  ;;  %v7402_v2 = vld [vmem:[%s9146_s3 + $0x58] sm:$0xff]  }
 0x1be   : > { %v4464_v35 = vor.u32 %v4463_v16, %v4459_v29  ;;  %v2193_v39 = vsel %vm944_vm1, %v2188_v30, %v2192_v31  ;;  %v2196_v47 = vor.u32 %v2194_v38, %v2192_v31  ;;  %v5755_v29 = vld [vmem:[%s7818_s9 + $0xb4] sm:$0xe] }
 0x1bf   : > { %v5776_v31 = vcombine.low %v5755_v29, %v8498_v10  ;;  %v4592_v10 = vrot.slane %v8520_v25, 1  ;;  %v8709_v29 = vld [vmem:[%s8453_s14 + $0x18] sm:$0xff]  }
 0x1c1   : > { %6504 = vmatpush3.bf16.xpose.msra.mxu0 %v1955_v28  ;;  %v4352_v28 = vsel %vm984_vm0, %v4332_v20, 0  ;;  %v2316_v38 = vrot.slane %v5776_v31, 1 }
 0x1c2   : > { %7068 = vmatprep.subr.msk.bf16.mxu0 %vm984_vm0, %v2034_v17  ;;  %v4466_v17 = vshll.u32 %v8520_v25, 16 }
 0x1c3   : > { %6756 = vmatpush3.bf16.xpose.msra.mxu1 %v4233_v34  ;;  %v2078_v34 = vsel %vm984_vm0, %v2058_v24, 0 }
 0x1c4   : > { %7158 = vmatprep.subr.msk.bf16.mxu1 %vm984_vm0, %v4311_v36  ;;  %v4468_v36 = vrot.slane %v4466_v17, 1 }
 0x1c6   : > { %v4469_v43 = vsel %vm944_vm1, %v4464_v35, %v4468_v36 }
 0x1c7   : > { %v4504_v0 = vsel %vm1065_vm2, %v4469_v43, 0 }
 0x1c8   : > { %6506 = vmatmul.mubr.msk.bf16.vlgmr.msra.gmra.mrb[0].mxu0 %vm1065_vm2, %v7373_v37  ;;  %v8532_v37 = vld [vmem:[%s7818_s9 + $0xf0] sm:$0xff]  }
 0x1c9   : > { %6510 = vmatpush3.bf16.xpose.msra.mxu0 %v2066_v41  ;;  %6519 = vmatprep.mubr.msk.bf16.mxu0 %vm984_vm0, %v7375_v44  ;;  %v2198_v41 = vshll.u32 %v8527_v32, 16  ;;  %v4470_v44 = vshrl.u32 %v8520_v25, 16  ;;  %v7397_v25 = vld [vmem:[%s9146_s3 + $0x50] sm:$0xff]  }
 0x1ca   : > { %7069 = vmatprep.subr.msk.bf16.mxu0 %vm984_vm0, %v2041_v53  ;;  %6758 = vmatmul.mubr.msk.bf16.vlgmr.msra.gmra.mrb[0].mxu1 %vm1065_vm2, %v7374_v46  ;;  %v4474_v46 = vshll.u32 %v8532_v37, 16  ;;  %v7381_v53 = vld [vmem:[%s9146_s3 + $0x48] sm:$0xff]  }
 0x1cb   : > { %6762 = vmatpush3.bf16.xpose.msra.mxu1 %v4343_v54  ;;  %6771 = vmatprep.mubr.msk.bf16.mxu1 %vm984_vm0, %v7378_v50  ;;  %v2200_v48 = vrot.slane %v2198_v41, 1  ;;  %v8543_v50 = vld [vmem:[%s7818_s9 + $0xcc] sm:$0xff]   ;;  %v4472_v49 = vor.u32 %v4470_v44, %v4468_v36  ;;  %v2317_v41 = vrot.slane %v8514_v12, 1  ;;  %v7393_v12 = vld [vmem:[%s9145_s2 + $0x58] sm:$0xff]  }
 0x1cc   : > { %7159 = vmatprep.subr.msk.bf16.mxu1 %vm984_vm0, %v4318_v55  ;;  %v7389_v54 = vld [vmem:[%s9145_s2 + $0x50] sm:$0xff]   ;;  %v2228_v55 = vsel %vm1065_vm2, %v2193_v39, 0  ;;  %v4476_v56 = vrot.slane %v4474_v46, 1  ;;  %v2206_v60 = vshll.u32 %v8543_v50, 16  ;;  %v2210_v15 = vshrl.u32 %v8543_v50, 16 }
 0x1cd   : > { %v2204_v5 = vor.u32 %v2202_v59, %v2200_v48  ;;  %v2318_v44 = vsel %vm1559_vm3, %v2316_v38, %v2317_v41  ;;  %v4596_v59 = vrot.slane %v8554_v57, 1  ;;  %v8723_v38 = vld [vmem:[%s8453_s14 + $0x20] ss:$0 sps:$4 sm:$0xff]  }
 0x1ce   : > { %v2208_v8 = vrot.slane %v2206_v60, 1 }
 0x1d0   : > { %v2209_v51 = vsel %vm944_vm1, %v2204_v5, %v2208_v8  ;;  %v2212_v7 = vor.u32 %v2210_v15, %v2208_v8  ;;  %v7401_v15 = vld [vmem:[%s9146_s3 + $0x58] sm:$0xff]  }
 0x1d1   : > { %6512 = vmatpush3.bf16.xpose.msra.mxu0 %v2069_v52  ;;  %v2201_v52 = vsel %vm944_vm1, %v2196_v47, %v2200_v48  ;;  %v2319_v47 = vrot.slane %v8527_v32, 1  ;;  %v2332_v48 = vsel %vm984_vm0, %v2318_v44, 0  ;;  %v7394_v32 = vld [vmem:[%s9145_s2 + $0x58] sm:$0xff]  }
 0x1d2   : > { %7070 = vmatprep.subr.msk.bf16.mxu0 %vm984_vm0, %v2048_v61  ;;  %v8564_v61 = vld [vmem:[%s7818_s9 + $0xd4] sm:$0xf] }
 0x1d3   : > { %6764 = vmatpush3.bf16.xpose.msra.mxu1 %v4346_v1  ;;  %v4477_v1 = vsel %vm944_vm1, %v4472_v49, %v4476_v56  ;;  %v5767_v9 = vcombine.low %v8564_v61, %v8564_v61 }
 0x1d4   : > { %7160 = vmatprep.subr.msk.bf16.mxu1 %vm984_vm0, %v4325_v3  ;;  %v4478_v3 = vshrl.u32 %v8532_v37, 16 }
 0x1d6   : > { %v4480_v40 = vor.u32 %v4478_v3, %v4476_v56  ;;  %v2321_v56 = vrot.slane %v8543_v50, 1 }
 0x1d8   : > { %v4485_v21 = vsel %vm944_vm1, %v4480_v40, %v4484_v45  ;;  %v2322_v60 = vsel %vm1559_vm3, %v2319_v47, %v2321_v56  ;;  %v7398_v45 = vld [vmem:[%s7818_s9 + $0x2c] sm:$0xff]  }
 0x1d9   : > { %6514 = vmatpush3.bf16.xpose.msra.mxu0 %v2072_v11  ;;  %v2231_v11 = vsel %vm1065_vm2, %v2201_v52, 0  ;;  %v4510_v6 = vsel %vm1065_vm2, %v4485_v21, 0  ;;  %v2338_v57 = vsel %vm984_vm0, %v2322_v60, 0 }
 0x1da   : > { %7071 = vmatprep.subr.msk.bf16.mxu0 %vm984_vm0, %v2055_v14  ;;  %v6041_v14 = vcombine.low %v8579_v33, %v8579_v33 }
 0x1db   : > { %6766 = vmatpush3.bf16.xpose.msra.mxu1 %v4349_v62  ;;  %v2214_v62 = vshll.u32 %v5767_v9, 16 }
 0x1dc   : > { %7161 = vmatprep.subr.msk.bf16.mxu1 %vm984_vm0, %v4332_v20  ;;  %v4507_v20 = vsel %vm1065_vm2, %v4477_v1, 0  ;;  %v4490_v23 = vshll.u32 %v6041_v14, 16  ;;  %v4494_v16 = vshrl.u32 %v6041_v14, 16 }
 0x1de   : > { %v4492_v18 = vrot.slane %v4490_v23, 1  ;;  %v7412_v23 = vld [vmem:[%s9145_s2 + $0x60] sm:$0xff]  }
 0x1e0   : > { %v4496_v36 = vor.u32 %v4494_v16, %v4492_v18  ;;  %v2538_v16 = vshll.u32 %v7398_v45, 16 }
 0x1e1   : > { %6516 = vmatpush3.bf16.xpose.msra.mxu0 %v2075_v13  ;;  %v2216_v13 = vrot.slane %v2214_v62, 1  ;;  %v7411_v62 = vld [vmem:[%s9145_s2 + $0x60] sm:$0xff]  }
 0x1e2   : > { %7072 = vmatprep.subr.msk.bf16.mxu0 %vm984_vm0, %v2058_v24  ;;  %v2234_v24 = vsel %vm1065_vm2, %v2209_v51, 0  ;;  %v4516_v46 = vsel %vm1065_vm2, %v4496_v36, 0 }
 0x1e3   : > { %6768 = vmatpush3.bf16.xpose.msra.mxu1 %v4352_v28  ;;  %v2217_v27 = vsel %vm944_vm1, %v2212_v7, %v2216_v13  ;;  %v4493_v28 = vsel %vm944_vm1, %v4488_v26, %v4492_v18  ;;  %v8691_v26 = vld [vmem:[%s7818_s9 + $0x3c] sm:$0xff]  }
 0x1e4   : > { %7162 = vmatprep.subr.msk.bf16.mxu1 %vm984_vm0, %v4335_v22  ;;  %v2218_v22 = vshrl.u32 %v5767_v9, 16  ;;  %v2237_v17 = vsel %vm1065_vm2, %v2217_v27, 0  ;;  %v4513_v35 = vsel %vm1065_vm2, %v4493_v28, 0 }
 0x1e6   : > { %v2220_v30 = vor.u32 %v2218_v22, %v2216_v13  ;;  %v7404_v13 = vld [vmem:[%s8453_s14 + $0x8] sm:$0xff]  }
 0x1e7   : > { %v4730_v18 = vsel %vm1065_vm2, %v7404_v13, 0 }
 0x1e9   : > { %6518 = vmatpush3.bf16.xpose.msra.mxu0 %v2078_v34  ;;  %v6029_v34 = vld [vmem:[%s7818_s9 + $0xe0] sm:$0xe] }
 0x1ea   : > { %7073 = vmatprep.subr.msk.bf16.mxu0 %vm1065_vm2, %v2193_v39  ;;  %v6050_v39 = vcombine.low %v6029_v34, %v8506_v19  ;;  %v2536_v34 = vshrl.u32 %v7398_v45, 16 }
 0x1eb   : > { %6770 = vmatpush3.bf16.xpose.msra.mxu1 %v4355_v42  ;;  %v2240_v42 = vsel %vm1065_vm2, %v2220_v30, 0 }
 0x1ec   : > { %7163 = vmatprep.subr.msk.bf16.mxu1 %vm1065_vm2, %v4469_v43  ;;  %v4591_v43 = vrot.slane %v6050_v39, 1  ;;  %v4736_v39 = vsel %vm1065_vm2, %v8709_v29, 0 }
 0x1ee   : > { %v4593_v19 = vsel %vm1559_vm3, %v4591_v43, %v4592_v10  ;;  %v4814_v43 = vshll.u32 %v7404_v13, 16 }
 0x1ef   : > { %v4607_v49 = vsel %vm984_vm0, %v4593_v19, 0 }
 0x1f0   : > { %6520 = vmatmul.mubr.msk.bf16.vlgmr.msra.gmra.mrb[0].mxu0 %vm984_vm0, %v7381_v53  ;;  %v4594_v53 = vrot.slane %v8532_v37, 1 }
 0x1f1   : > { %6524 = vmatpush3.bf16.xpose.msra.mxu0 %v2228_v55  ;;  %6533 = vmatprep.mubr.msk.bf16.mxu0 %vm1065_vm2, %v7389_v54  ;;  %v2320_v54 = vsel %vm1559_vm3, %v2317_v41, %v2319_v47  ;;  %v7399_v55 = vld [vmem:[%s9146_s3 + $0x50] sm:$0xff]   ;;  %v4816_v47 = vrot.slane %v4814_v43, 1 }
 0x1f2   : > { %7074 = vmatprep.subr.msk.bf16.mxu0 %vm1065_vm2, %v2201_v52  ;;  %6772 = vmatmul.mubr.msk.bf16.vlgmr.msra.gmra.mrb[0].mxu1 %vm984_vm0, %v7382_v58  ;;  %v4595_v37 = vsel %vm1559_vm3, %v4592_v10, %v4594_v53  ;;  %v5756_v58 = vld [vmem:[%s7818_s9 + $0xd8] sm:$0x1]  ;;  %v2335_v52 = vsel %vm984_vm0, %v2320_v54, 0  ;;  %v4597_v50 = vsel %vm1559_vm3, %v4594_v53, %v4596_v59  ;;  %v4739_v53 = vsel %vm1065_vm2, %v8723_v38, 0  ;;  %v7430_v43 = vld [vmem:[%s9145_s2 + $0x70] sm:$0xff]  }
 0x1f3   : > { %6776 = vmatpush3.bf16.xpose.msra.mxu1 %v4504_v0  ;;  %6785 = vmatprep.mubr.msk.bf16.mxu1 %vm1065_vm2, %v7391_v63  ;;  %v5777_v63 = vcombine.low %v8564_v61, %v5756_v58  ;;  %v6030_v0 = vld [vmem:[%s7818_s9 + $0x104] sm:$0x1]  ;;  %v4613_v8 = vsel %vm984_vm0, %v4597_v50, 0 }
 0x1f4   : > { %7164 = vmatprep.subr.msk.bf16.mxu1 %vm1065_vm2, %v4477_v1  ;;  %v4610_v1 = vsel %vm984_vm0, %v4595_v37, 0  ;;  %v6051_v3 = vcombine.low %v8579_v33, %v6030_v0  ;;  %v7415_v58 = vld [vmem:[%s9146_s3 + $0x60] sm:$0xff]  }
 0x1f5   : > { %v2323_v4 = vrot.slane %v5777_v63, 1  ;;  %v7414_v63 = vld [vmem:[%s9145_s2 + $0x68] sm:$0xff]  }
 0x1f6   : > { %v4598_v5 = vrot.slane %v6051_v3, 1  ;;  %v7417_v3 = vld [vmem:[%s9146_s3 + $0x60] sm:$0xff]  }
 0x1f7   : > { %v2324_v61 = vsel %vm1559_vm3, %v2321_v56, %v2323_v4  ;;  %v2344_v40 = vsel %vm984_vm0, %v2323_v4, 0  ;;  %v7413_v56 = vld [vmem:[%s9145_s2 + $0x68] sm:$0xff]  }
 0x1f8   : > { %v4599_v9 = vsel %vm1559_vm3, %v4596_v59, %v4598_v5  ;;  %v2341_v33 = vsel %vm984_vm0, %v2324_v61, 0  ;;  %v4619_v14 = vsel %vm984_vm0, %v4598_v5, 0 }
 0x1f9   : > { %6526 = vmatpush3.bf16.xpose.msra.mxu0 %v2231_v11  ;;  %v4616_v11 = vsel %vm984_vm0, %v4599_v9, 0 }
 0x1fa   : > { %7075 = vmatprep.subr.msk.bf16.mxu0 %vm1065_vm2, %v2209_v51  ;;  %v7400_v51 = vld [vmem:[%s8453_s14] sm:$0xff]  }
 0x1fb   : > { %6778 = vmatpush3.bf16.xpose.msra.mxu1 %v4507_v20  ;;  %v2454_v20 = vsel %vm1065_vm2, %v7398_v45, 0  ;;  %v4727_v7 = vsel %vm1065_vm2, %v7400_v51, 0  ;;  %v4810_v31 = vshll.u32 %v7400_v51, 16  ;;  %v4808_v41 = vshrl.u32 %v7400_v51, 16 }
 0x1fc   : > { %7165 = vmatprep.subr.msk.bf16.mxu1 %vm1065_vm2, %v4485_v21  ;;  %v7403_v21 = vld [vmem:[%s7818_s9 + $0x34] sm:$0xff]  }
 0x201   : > { %6528 = vmatpush3.bf16.xpose.msra.mxu0 %v2234_v24  ;;  %v2457_v24 = vsel %vm1065_vm2, %v7403_v21, 0 }
 0x202   : > { %7076 = vmatprep.subr.msk.bf16.mxu0 %vm1065_vm2, %v2217_v27  ;;  %v8695_v27 = vld [vmem:[%s8453_s14 + $0x10] sm:$0xff]  }
 0x203   : > { %6780 = vmatpush3.bf16.xpose.msra.mxu1 %v4510_v6  ;;  %v2460_v6 = vsel %vm1065_vm2, %v8691_v26, 0  ;;  %v4733_v22 = vsel %vm1065_vm2, %v8695_v27, 0 }
 0x204   : > { %7166 = vmatprep.subr.msk.bf16.mxu1 %vm1065_vm2, %v4493_v28  ;;  %v8704_v28 = vld [vmem:[%s7818_s9 + $0x44] sm:$0xff]  }
 0x209   : > { %6530 = vmatpush3.bf16.xpose.msra.mxu0 %v2237_v17  ;;  %v2463_v17 = vsel %vm1065_vm2, %v8704_v28, 0 }
 0x20a   : > { %7077 = vmatprep.subr.msk.bf16.mxu0 %vm1065_vm2, %v2220_v30  ;;  %v8718_v30 = vld [vmem:[%s7818_s9 + $0x4c] ss:$0 sps:$4 sm:$0xff]  }
 0x20b   : > { %6782 = vmatpush3.bf16.xpose.msra.mxu1 %v4513_v35  ;;  %v2540_v35 = vrot.slane %v2538_v16, 1 }
 0x20c   : > { %7167 = vmatprep.subr.msk.bf16.mxu1 %vm1065_vm2, %v4496_v36  ;;  %v2542_v36 = vshll.u32 %v7403_v21, 16 }
 0x20d   : > { %v2541_v10 = vor.u32 %v2540_v35, %v2536_v34  ;;  %v7418_v35 = vld [vmem:[%s8453_s14 + $0x2c] sm:$0xff]  }
 0x211   : > { %6532 = vmatpush3.bf16.xpose.msra.mxu0 %v2240_v42  ;;  %v4812_v42 = vrot.slane %v4810_v31, 1  ;;  %v7416_v31 = vld [vmem:[%s7818_s9 + $0x84] sm:$0xff]  }
 0x212   : > { %7078 = vmatprep.subr.msk.bf16.mxu0 %vm984_vm0, %v2318_v44  ;;  %v2544_v44 = vrot.slane %v2542_v36, 1  ;;  %v7419_v36 = vld [vmem:[%s9146_s3 + $0x68] sm:$0xff]  }
 0x213   : > { %6784 = vmatpush3.bf16.xpose.msra.mxu1 %v4516_v46  ;;  %v2466_v46 = vsel %vm1065_vm2, %v8718_v30, 0 }
 0x214   : > { %7168 = vmatprep.subr.msk.bf16.mxu1 %vm984_vm0, %v4593_v19  ;;  %v4813_v19 = vor.u32 %v4812_v42, %v4808_v41  ;;  %v7421_v41 = vld [vmem:[%s7818_s9 + $0x8c] sm:$0xff]  }
 0x215   : > { %v7420_v42 = vld [vmem:[%s9146_s3 + $0x68] sm:$0xff]  }
 0x218   : > { %6534 = vmatmul.mubr.msk.bf16.vlgmr.msra.gmra.mrb[0].mxu0 %vm1065_vm2, %v7393_v12  ;;  %v2545_v12 = vsel %vm944_vm1, %v2541_v10, %v2544_v44  ;;  %v4970_v10 = vsel %vm1065_vm2, %v7418_v35, 0 }
 0x219   : > { %6538 = vmatpush3.bf16.xpose.msra.mxu0 %v2332_v48  ;;  %6547 = vmatprep.mubr.msk.bf16.mxu0 %vm984_vm0, %v7397_v25  ;;  %v2546_v25 = vshrl.u32 %v7403_v21, 16  ;;  %v2549_v48 = vshll.u32 %v8691_v26, 16 }
 0x21a   : > { %7079 = vmatprep.subr.msk.bf16.mxu0 %vm984_vm0, %v2320_v54  ;;  %6786 = vmatmul.mubr.msk.bf16.vlgmr.msra.gmra.mrb[0].mxu1 %vm1065_vm2, %v7394_v32  ;;  %v4817_v32 = vsel %vm944_vm1, %v4813_v19, %v4816_v47  ;;  %v4818_v54 = vshrl.u32 %v7404_v13, 16  ;;  %v8820_v19 = vld [vmem:[%s7818_s9 + $0x94] sm:$0xff]  }
 0x21b   : > { %6790 = vmatpush3.bf16.xpose.msra.mxu1 %v4607_v49  ;;  %6799 = vmatprep.mubr.msk.bf16.mxu1 %vm984_vm0, %v7399_v55  ;;  %v4821_v55 = vshll.u32 %v8695_v27, 16  ;;  %v2548_v49 = vor.u32 %v2546_v25, %v2544_v44  ;;  %v8810_v44 = vld [vmem:[%s8453_s14 + $0x34] sm:$0xff]   ;;  %v2705_v25 = vsel %vm1065_vm2, %v8820_v19, 0 }
 0x21c   : > { %7169 = vmatprep.subr.msk.bf16.mxu1 %vm984_vm0, %v4595_v37  ;;  %v2551_v37 = vrot.slane %v2549_v48, 1  ;;  %v4820_v59 = vor.u32 %v4818_v54, %v4816_v47  ;;  %v4973_v47 = vsel %vm1065_vm2, %v8810_v44, 0  ;;  %v8834_v48 = vld [vmem:[%s7818_s9 + $0x9c] sm:$0xff]   ;;  %v2783_v54 = vshll.u32 %v7416_v31, 16 }
 0x21e   : > { %v2552_v0 = vsel %vm944_vm1, %v2548_v49, %v2551_v37  ;;  %v8848_v49 = vld [vmem:[%s7818_s9 + $0xa4] ss:$0 sps:$4 sm:$0xff]  }
 0x221   : > { %6540 = vmatpush3.bf16.xpose.msra.mxu0 %v2335_v52  ;;  %v2577_v52 = vsel %vm984_vm0, %v2545_v12, 0 }
 0x222   : > { %7080 = vmatprep.subr.msk.bf16.mxu0 %vm984_vm0, %v2322_v60  ;;  %v4823_v60 = vrot.slane %v4821_v55, 1  ;;  %v2708_v55 = vsel %vm1065_vm2, %v8834_v48, 0 }
 0x223   : > { %6792 = vmatpush3.bf16.xpose.msra.mxu1 %v4610_v1  ;;  %v2553_v1 = vshrl.u32 %v8691_v26, 16 }
 0x224   : > { %7170 = vmatprep.subr.msk.bf16.mxu1 %vm984_vm0, %v4597_v50  ;;  %v2556_v50 = vshll.u32 %v8704_v28, 16 }
 0x229   : > { %6542 = vmatpush3.bf16.xpose.msra.mxu0 %v2338_v57  ;;  %v4824_v57 = vsel %vm944_vm1, %v4820_v59, %v4823_v60 }
 0x22a   : > { %7081 = vmatprep.subr.msk.bf16.mxu0 %vm984_vm0, %v2324_v61  ;;  %v4828_v61 = vshll.u32 %v8709_v29, 16 }
 0x22b   : > { %6794 = vmatpush3.bf16.xpose.msra.mxu1 %v4613_v8  ;;  %v2555_v8 = vor.u32 %v2553_v1, %v2551_v37  ;;  %v5053_v37 = vshll.u32 %v7418_v35, 16  ;;  %v5057_v1 = vshll.u32 %v8810_v44, 16 }
 0x22c   : > { %7171 = vmatprep.subr.msk.bf16.mxu1 %vm984_vm0, %v4599_v9  ;;  %v2558_v9 = vrot.slane %v2556_v50, 1 }
 0x231   : > { %6544 = vmatpush3.bf16.xpose.msra.mxu0 %v2341_v33  ;;  %v2580_v33 = vsel %vm984_vm0, %v2552_v0, 0 }
 0x232   : > { %7082 = vmatprep.subr.msk.bf16.mxu0 %vm984_vm0, %v2323_v4  ;;  %v4849_v4 = vsel %vm984_vm0, %v4817_v32, 0 }
 0x233   : > { %6796 = vmatpush3.bf16.xpose.msra.mxu1 %v4616_v11 }
 0x234   : > { %7172 = vmatprep.subr.msk.bf16.mxu1 %vm984_vm0, %v4598_v5  ;;  %v4825_v5 = vshrl.u32 %v8695_v27, 16 }
 0x236   : > { %v4827_v11 = vor.u32 %v4825_v5, %v4823_v60  ;;  %v8853_v60 = vld [vmem:[%s8453_s14 + $0x4c] ss:$0 sps:$4 sm:$0xff]   ;;  %v5059_v5 = vrot.slane %v5057_v1, 1 }
 0x239   : > { %6546 = vmatpush3.bf16.xpose.msra.mxu0 %v2344_v40  ;;  %v4830_v40 = vrot.slane %v4828_v61, 1 }
 0x23a   : > { %7083 = vmatprep.subr.msk.bf16.mxu0 %vm1065_vm2, %v7398_v45  ;;  %v2559_v45 = vsel %vm944_vm1, %v2555_v8, %v2558_v9  ;;  %v2791_v8 = vshrl.u32 %v7421_v41, 16 }
 0x23b   : > { %6798 = vmatpush3.bf16.xpose.msra.mxu1 %v4619_v14  ;;  %v2560_v14 = vshrl.u32 %v8704_v28, 16 }
 0x23c   : > { %7173 = vmatprep.subr.msk.bf16.mxu1 %vm1065_vm2, %v7400_v51  ;;  %v2563_v51 = vshll.u32 %v8718_v30, 16 }
 0x240   : > { %6548 = vmatmul.mubr.msk.bf16.vlgmr.msra.gmra.mrb[0].mxu0 %vm984_vm0, %v7401_v15  ;;  %v4852_v15 = vsel %vm984_vm0, %v4824_v57, 0 }
 0x241   : > { %6552 = vmatpush3.bf16.xpose.msra.mxu0 %v2454_v20  ;;  %6561 = vmatprep.mubr.msk.bf16.mxu0 %vm1065_vm2, %v7411_v62  ;;  %v4831_v62 = vsel %vm944_vm1, %v4827_v11, %v4830_v40  ;;  %v4832_v20 = vshrl.u32 %v8709_v29, 16 }
 0x242   : > { %7084 = vmatprep.subr.msk.bf16.mxu0 %vm1065_vm2, %v7403_v21  ;;  %6800 = vmatmul.mubr.msk.bf16.vlgmr.msra.gmra.mrb[0].mxu1 %vm984_vm0, %v7402_v2  ;;  %v4835_v21 = vshll.u32 %v8723_v38, 16  ;;  %v2562_v2 = vor.u32 %v2560_v14, %v2558_v9  ;;  %v2794_v9 = vshll.u32 %v8820_v19, 16 }
 0x243   : > { %6804 = vmatpush3.bf16.xpose.msra.mxu1 %v4727_v7  ;;  %6813 = vmatprep.mubr.msk.bf16.mxu1 %vm1065_vm2, %v7412_v23  ;;  %v2565_v23 = vrot.slane %v2563_v51, 1  ;;  %v2583_v7 = vsel %vm984_vm0, %v2559_v45, 0 }
 0x244   : > { %7174 = vmatprep.subr.msk.bf16.mxu1 %vm1065_vm2, %v7404_v13  ;;  %v4834_v13 = vor.u32 %v4832_v20, %v4830_v40  ;;  %v5061_v40 = vshrl.u32 %v8810_v44, 16  ;;  %v2796_v51 = vrot.slane %v2794_v9, 1  ;;  %v7531_v20 = vmov 0  }
 0x245   : > { %7283 = vset.pattern.permute.xlu0 %v7531_v20  ;;  %7284 = vset.pattern.permute.xlu1 %v7531_v20 }
 0x249   : > { %6554 = vmatpush3.bf16.xpose.msra.mxu0 %v2457_v24  ;;  %v4837_v24 = vrot.slane %v4835_v21, 1  ;;  %v892_v21 = vld [vmem:[%s9147_s4 + $0x10] sm:$0xff] }
 0x24a   : > { %7085 = vmatprep.subr.msk.bf16.mxu0 %vm1065_vm2, %v8691_v26  ;;  %v2566_v26 = vsel %vm944_vm1, %v2562_v2, %v2565_v23  ;;  %v7433_v2 = vld [vmem:[%s9146_s3 + $0x70] sm:$0xff]   ;;  %3167 = vperm.xlu1 %7284, %v892_v21  }
 0x24b   : > { %6806 = vmatpush3.bf16.xpose.msra.mxu1 %v4730_v18  ;;  %v4855_v18 = vsel %vm984_vm0, %v4831_v62, 0  ;;  %v8954_v21 = vld [vmem:[%s8453_s14 + $0x14] sm:$0xff]  }
 0x24c   : > { %7175 = vmatprep.subr.msk.bf16.mxu1 %vm1065_vm2, %v8695_v27  ;;  %v4838_v27 = vsel %vm944_vm1, %v4834_v13, %v4837_v24 }
 0x24d   : > { %v4858_v16 = vsel %vm984_vm0, %v4838_v27, 0 }
 0x251   : > { %6556 = vmatpush3.bf16.xpose.msra.mxu0 %v2460_v6  ;;  %v2567_v6 = vshrl.u32 %v8718_v30, 16 }
 0x252   : > { %7086 = vmatprep.subr.msk.bf16.mxu0 %vm1065_vm2, %v8704_v28  ;;  %v4839_v28 = vshrl.u32 %v8723_v38, 16 }
 0x253   : > { %6808 = vmatpush3.bf16.xpose.msra.mxu1 %v4733_v22  ;;  %v2586_v22 = vsel %vm984_vm0, %v2566_v26, 0 }
 0x254   : > { %7176 = vmatprep.subr.msk.bf16.mxu1 %vm1065_vm2, %v8709_v29  ;;  %v2569_v29 = vor.u32 %v2567_v6, %v2565_v23  ;;  %v891_v6 = vld [vmem:[%s9147_s4 + $0x8] sm:$0xff] }
 0x259   : > { %6558 = vmatpush3.bf16.xpose.msra.mxu0 %v2463_v17  ;;  %v4841_v17 = vor.u32 %v4839_v28, %v4837_v24  ;;  %v7432_v24 = vld [vmem:[%s9145_s2 + $0x78] sm:$0xff]   ;;  %v7436_v28 = vld [vmem:[%s9146_s3 + $0x70] sm:$0xff]  }
 0x25a   : > { %7087 = vmatprep.subr.msk.bf16.mxu0 %vm1065_vm2, %v8718_v30  ;;  %v2589_v30 = vsel %vm984_vm0, %v2569_v29, 0 }
 0x25b   : > { %6810 = vmatpush3.bf16.xpose.msra.mxu1 %v4736_v39  ;;  %v4861_v34 = vsel %vm984_vm0, %v4841_v17, 0  ;;  %v7429_v39 = vld [vmem:[%s9145_s2 + $0x70] sm:$0xff]  }
 0x25c   : > { %7177 = vmatprep.subr.msk.bf16.mxu1 %vm1065_vm2, %v8723_v38  ;;  %v2699_v38 = vsel %vm1065_vm2, %v7416_v31, 0 }
 0x261   : > { %6560 = vmatpush3.bf16.xpose.msra.mxu0 %v2466_v46  ;;  %v2702_v46 = vsel %vm1065_vm2, %v7421_v41, 0 }
 0x262   : > { %7088 = vmatprep.subr.msk.bf16.mxu0 %vm984_vm0, %v2545_v12  ;;  %v8825_v12 = vld [vmem:[%s8453_s14 + $0x3c] sm:$0xff]  }
 0x263   : > { %6812 = vmatpush3.bf16.xpose.msra.mxu1 %v4739_v53  ;;  %v4976_v53 = vsel %vm1065_vm2, %v8825_v12, 0 }
 0x264   : > { %7178 = vmatprep.subr.msk.bf16.mxu1 %vm984_vm0, %v4817_v32  ;;  %v8839_v32 = vld [vmem:[%s8453_s14 + $0x44] sm:$0xff]  }
 0x265   : > { %v4979_v59 = vsel %vm1065_vm2, %v8839_v32, 0 }
 0x268   : > { %6562 = vmatmul.mubr.msk.bf16.vlgmr.msra.gmra.mrb[0].mxu0 %vm1065_vm2, %v7413_v56  ;;  %v2781_v56 = vshrl.u32 %v7416_v31, 16 }
 0x269   : > { %6566 = vmatpush3.bf16.xpose.msra.mxu0 %v2577_v52  ;;  %6575 = vmatprep.mubr.msk.bf16.mxu0 %vm984_vm0, %v7415_v58  ;;  %v2785_v58 = vrot.slane %v2783_v54, 1  ;;  %v2787_v52 = vshll.u32 %v7421_v41, 16 }
 0x26a   : > { %7089 = vmatprep.subr.msk.bf16.mxu0 %vm984_vm0, %v2552_v0  ;;  %6814 = vmatmul.mubr.msk.bf16.vlgmr.msra.gmra.mrb[0].mxu1 %vm1065_vm2, %v7414_v63  ;;  %v5051_v63 = vshrl.u32 %v7418_v35, 16  ;;  %v5055_v0 = vrot.slane %v5053_v37, 1 }
 0x26b   : > { %6818 = vmatpush3.bf16.xpose.msra.mxu1 %v4849_v4  ;;  %6827 = vmatprep.mubr.msk.bf16.mxu1 %vm984_vm0, %v7417_v3  ;;  %v2786_v50 = vor.u32 %v2785_v58, %v2781_v56  ;;  %v2789_v3 = vrot.slane %v2787_v52, 1  ;;  %v2711_v4 = vsel %vm1065_vm2, %v8848_v49, 0  ;;  %v8928_v56 = vld [vmem:[%s8453_s14 + $0x8] sm:$0xf] }
 0x26c   : > { %7179 = vmatprep.subr.msk.bf16.mxu1 %vm984_vm0, %v4824_v57  ;;  %v5056_v57 = vor.u32 %v5055_v0, %v5051_v63  ;;  %v8936_v0 = vld [vmem:[%s7818_s9 + $0x38] sm:$0xff]  }
 0x26d   : > { %v2790_v61 = vsel %vm944_vm1, %v2786_v50, %v2789_v3  ;;  %v2793_v14 = vor.u32 %v2791_v8, %v2789_v3  ;;  %v5082_v50 = vshrl.u32 %v8853_v60, 16 }
 0x26e   : > { %v5060_v11 = vsel %vm944_vm1, %v5056_v57, %v5059_v5  ;;  %v2822_v23 = vsel %vm984_vm0, %v2790_v61, 0  ;;  %v8942_v57 = vld [vmem:[%s8453_s14 + $0xc] sm:$0xff]  }
 0x271   : > { %6568 = vmatpush3.bf16.xpose.msra.mxu0 %v2580_v33  ;;  %v4982_v33 = vsel %vm1065_vm2, %v8853_v60, 0 }
 0x272   : > { %7090 = vmatprep.subr.msk.bf16.mxu0 %vm984_vm0, %v2559_v45  ;;  %v5064_v45 = vshll.u32 %v8825_v12, 16 }
 0x273   : > { %6820 = vmatpush3.bf16.xpose.msra.mxu1 %v4852_v15  ;;  %v890_v15 = vld [vmem:[%s9147_s4] sm:$0xff] }
 0x274   : > { %7180 = vmatprep.subr.msk.bf16.mxu1 %vm984_vm0, %v4831_v62  ;;  %v7431_v62 = vld [vmem:[%s9145_s2 + $0x78] sm:$0xff]   ;;  %3157 = vperm.xlu0 %7283, %v890_v15   ;;  %v5066_v13 = vrot.slane %v5064_v45, 1 }
 0x278   : > { %3162 = vperm.xlu0 %7283, %v891_v6  }
 0x279   : > { %6570 = vmatpush3.bf16.xpose.msra.mxu0 %v2583_v7  ;;  %v5063_v7 = vor.u32 %v5061_v40, %v5059_v5  ;;  %v5215_v40 = vshll.u32 %v8942_v57, 16 }
 0x27a   : > { %7091 = vmatprep.subr.msk.bf16.mxu0 %vm984_vm0, %v2566_v26  ;;  %v2797_v26 = vsel %vm944_vm1, %v2793_v14, %v2796_v51 }
 0x27b   : > { %6822 = vmatpush3.bf16.xpose.msra.mxu1 %v4855_v18  ;;  %v2798_v18 = vshrl.u32 %v8820_v19, 16  ;;  %v5217_v20 = vrot.slane %v5215_v40, 1 }
 0x27c   : > { %7181 = vmatprep.subr.msk.bf16.mxu1 %vm984_vm0, %v4838_v27  ;;  %v2801_v27 = vshll.u32 %v8834_v48, 16 }
 0x281   : > { %6572 = vmatpush3.bf16.xpose.msra.mxu0 %v2586_v22  ;;  %v893_v22 = vld [vmem:[%s9147_s4 + $0x18] sm:$0xff] }
 0x282   : > { %7092 = vmatprep.subr.msk.bf16.mxu0 %vm984_vm0, %v2569_v29  ;;  %v5092_v29 = vsel %vm984_vm0, %v5060_v11, 0  ;;  %3172 = vperm.xlu1 %7284, %v893_v22   ;;  %v7439_v22 = vld [vmem:[%s9146_s3 + $0x78] sm:$0xff]  }
 0x283   : > { %6824 = vmatpush3.bf16.xpose.msra.mxu1 %v4858_v16  ;;  %v5067_v16 = vsel %vm944_vm1, %v5063_v7, %v5066_v13 }
 0x284   : > { %7182 = vmatprep.subr.msk.bf16.mxu1 %vm984_vm0, %v4841_v17  ;;  %v5068_v17 = vshrl.u32 %v8825_v12, 16 }
 0x289   : > { %6574 = vmatpush3.bf16.xpose.msra.mxu0 %v2589_v30  ;;  %v5071_v30 = vshll.u32 %v8839_v32, 16 }
 0x28a   : > { %7093 = vmatprep.subr.msk.bf16.mxu0 %vm1065_vm2, %v7416_v31  ;;  %v2800_v31 = vor.u32 %v2798_v18, %v2796_v51  ;;  %v8949_v51 = vld [vmem:[%s7818_s9 + $0x40] sm:$0xff]   ;;  %v5223_v18 = vshll.u32 %v8954_v21, 16 }
 0x28b   : > { %6826 = vmatpush3.bf16.xpose.msra.mxu1 %v4861_v34  ;;  %v2803_v34 = vrot.slane %v2801_v27, 1  ;;  %v2954_v7 = vshll.u32 %v8949_v51, 16 }
 0x28c   : > { %7183 = vmatprep.subr.msk.bf16.mxu1 %vm1065_vm2, %v7418_v35  ;;  %v2825_v35 = vsel %vm984_vm0, %v2797_v26, 0 }
 0x28d   : > { %v2956_v6 = vrot.slane %v2954_v7, 1  ;;  %v3073_v7 = vrot.slane %v8936_v0, 1 }
 0x290   : > { %6576 = vmatmul.mubr.msk.bf16.vlgmr.msra.gmra.mrb[0].mxu0 %vm984_vm0, %v7419_v36  ;;  %v5070_v36 = vor.u32 %v5068_v17, %v5066_v13 }
 0x291   : > { %6580 = vmatpush3.bf16.xpose.msra.mxu0 %v2699_v38  ;;  %6589 = vmatprep.mubr.msk.bf16.mxu0 %vm1065_vm2, %v7429_v39  ;;  %v5073_v39 = vrot.slane %v5071_v30, 1  ;;  %v2804_v38 = vsel %vm944_vm1, %v2800_v31, %v2803_v34  ;;  %v5225_v30 = vrot.slane %v5223_v18, 1  ;;  %v8976_v31 = vld [vmem:[%s8453_s14 + $0x1c] sm:$0xff]  }
 0x292   : > { %7094 = vmatprep.subr.msk.bf16.mxu0 %vm1065_vm2, %v7421_v41  ;;  %6828 = vmatmul.mubr.msk.bf16.vlgmr.msra.gmra.mrb[0].mxu1 %vm984_vm0, %v7420_v42  ;;  %v2805_v41 = vshrl.u32 %v8834_v48, 16  ;;  %v2808_v42 = vshll.u32 %v8848_v49, 16 }
 0x293   : > { %6832 = vmatpush3.bf16.xpose.msra.mxu1 %v4970_v10  ;;  %6841 = vmatprep.mubr.msk.bf16.mxu1 %vm1065_vm2, %v7430_v43  ;;  %v5095_v43 = vsel %vm984_vm0, %v5067_v16, 0  ;;  %v5074_v10 = vsel %vm944_vm1, %v5070_v36, %v5073_v39  ;;  %v2958_v36 = vshrl.u32 %v8949_v51, 16 }
 0x294   : > { %7184 = vmatprep.subr.msk.bf16.mxu1 %vm1065_vm2, %v8810_v44  ;;  %v5075_v44 = vshrl.u32 %v8839_v32, 16  ;;  %v5098_v58 = vsel %vm984_vm0, %v5074_v10, 0 }
 0x299   : > { %6582 = vmatpush3.bf16.xpose.msra.mxu0 %v2702_v46  ;;  %v5078_v46 = vshll.u32 %v8853_v60, 16 }
 0x29a   : > { %7095 = vmatprep.subr.msk.bf16.mxu0 %vm1065_vm2, %v8820_v19  ;;  %v2807_v19 = vor.u32 %v2805_v41, %v2803_v34  ;;  %v7440_v34 = vld [vmem:[%s9146_s3 + $0x78] sm:$0xff]   ;;  %v7449_v41 = vld [vmem:[%s9145_s2 + $0x80] sm:$0xff]  }
 0x29b   : > { %6834 = vmatpush3.bf16.xpose.msra.mxu1 %v4973_v47  ;;  %v2810_v47 = vrot.slane %v2808_v42, 1  ;;  %v5080_v54 = vrot.slane %v5078_v46, 1  ;;  %v2960_v46 = vor.u32 %v2958_v36, %v2956_v6  ;;  %v5345_v36 = vrot.slane %v8976_v31, 1 }
 0x29c   : > { %7185 = vmatprep.subr.msk.bf16.mxu1 %vm1065_vm2, %v8825_v12  ;;  %v5840_v12 = vld [vmem:[%s7818_s9 + $0x30] sm:$0xf] }
 0x2a1   : > { %6584 = vmatpush3.bf16.xpose.msra.mxu0 %v2705_v25  ;;  %v8920_v25 = vld [vmem:[%s7818_s9 + $0x34] sm:$0xf] }
 0x2a2   : > { %7096 = vmatprep.subr.msk.bf16.mxu0 %vm1065_vm2, %v8834_v48  ;;  %v2828_v48 = vsel %vm984_vm0, %v2804_v38, 0  ;;  %v5857_v37 = vcombine.low %v5840_v12, %v8920_v25  ;;  %v9001_v12 = vld [vmem:[%s8453_s14 + $0x24] sm:$0xf] }
 0x2a3   : > { %6836 = vmatpush3.bf16.xpose.msra.mxu1 %v4976_v53  ;;  %v5077_v53 = vor.u32 %v5075_v44, %v5073_v39  ;;  %v5231_v44 = vshll.u32 %v8976_v31, 16 }
 0x2a4   : > { %7186 = vmatprep.subr.msk.bf16.mxu1 %vm1065_vm2, %v8839_v32  ;;  %v5159_v32 = vld [vmem:[%s8453_s14 + $0x4] sm:$0xf]  ;;  %v2941_v1 = vshll.u32 %v5857_v37, 16 }
 0x2a5   : > { %v5081_v52 = vsel %vm944_vm1, %v5077_v53, %v5080_v54  ;;  %v6111_v63 = vcombine.low %v5159_v32, %v8928_v56 }
 0x2a6   : > { %v2943_v8 = vrot.slane %v2941_v1, 1  ;;  %v5101_v9 = vsel %vm984_vm0, %v5081_v52, 0 }
 0x2a7   : > { %v5210_v5 = vshll.u32 %v6111_v63, 16 }
 0x2a9   : > { %6586 = vmatpush3.bf16.xpose.msra.mxu0 %v2708_v55  ;;  %v2811_v55 = vsel %vm944_vm1, %v2807_v19, %v2810_v47 }
 0x2aa   : > { %7097 = vmatprep.subr.msk.bf16.mxu0 %vm1065_vm2, %v8848_v49  ;;  %v2831_v3 = vsel %vm984_vm0, %v2811_v55, 0 }
 0x2ab   : > { %6838 = vmatpush3.bf16.xpose.msra.mxu1 %v4979_v59  ;;  %v2812_v59 = vshrl.u32 %v8848_v49, 16  ;;  %v2946_v49 = vshll.u32 %v8936_v0, 16 }
 0x2ac   : > { %7187 = vmatprep.subr.msk.bf16.mxu1 %vm1065_vm2, %v8853_v60  ;;  %v5212_v60 = vrot.slane %v5210_v5, 1 }
 0x2ad   : > { %v2948_v14 = vrot.slane %v2946_v49, 1 }
 0x2b1   : > { %6588 = vmatpush3.bf16.xpose.msra.mxu0 %v2711_v4  ;;  %v2814_v4 = vor.u32 %v2812_v59, %v2810_v47 }
 0x2b2   : > { %7098 = vmatprep.subr.msk.bf16.mxu0 %vm984_vm0, %v2790_v61  ;;  %v2939_v61 = vshrl.u32 %v5857_v37, 16 }
 0x2b3   : > { %6840 = vmatpush3.bf16.xpose.msra.mxu1 %v4982_v33  ;;  %v5084_v33 = vor.u32 %v5082_v50, %v5080_v54  ;;  %v2834_v15 = vsel %vm984_vm0, %v2814_v4, 0  ;;  %v5233_v54 = vrot.slane %v5231_v44, 1 }
 0x2b4   : > { %7188 = vmatprep.subr.msk.bf16.mxu1 %vm984_vm0, %v5060_v11  ;;  %v5208_v11 = vshrl.u32 %v6111_v63, 16  ;;  %v2944_v45 = vor.u32 %v2943_v8, %v2939_v61  ;;  %v5235_v63 = vshrl.u32 %v8976_v31, 16 }
 0x2b5   : > { %v5104_v13 = vsel %vm984_vm0, %v5084_v33, 0 }
 0x2b6   : > { %v5237_v5 = vor.u32 %v5235_v63, %v5233_v54 }
 0x2b8   : > { %6590 = vmatmul.mubr.msk.bf16.vlgmr.msra.gmra.mrb[0].mxu0 %vm1065_vm2, %v7431_v62  ;;  %v5213_v62 = vor.u32 %v5212_v60, %v5208_v11  ;;  %v5849_v11 = vld [vmem:[%s7818_s9 + $0x30] sm:$0xe] }
 0x2b9   : > { %6594 = vmatpush3.bf16.xpose.msra.mxu0 %v2822_v23  ;;  %6603 = vmatprep.mubr.msk.bf16.mxu0 %vm984_vm0, %v7433_v2  ;;  %v2949_v2 = vsel %vm944_vm1, %v2944_v45, %v2948_v14  ;;  %v2950_v23 = vshrl.u32 %v8936_v0, 16  ;;  %v7451_v0 = vld [vmem:[%s9145_s2 + $0x88] sm:$0xff]  }
 0x2ba   : > { %7099 = vmatprep.subr.msk.bf16.mxu0 %vm984_vm0, %v2797_v26  ;;  %6842 = vmatmul.mubr.msk.bf16.vlgmr.msra.gmra.mrb[0].mxu1 %vm1065_vm2, %v7432_v24  ;;  %v5218_v24 = vsel %vm944_vm1, %v5213_v62, %v5217_v20  ;;  %v5219_v26 = vshrl.u32 %v8942_v57, 16 }
 0x2bb   : > { %6846 = vmatpush3.bf16.xpose.msra.mxu1 %v5092_v29  ;;  %6855 = vmatprep.mubr.msk.bf16.mxu1 %vm984_vm0, %v7436_v28  ;;  %v2952_v27 = vor.u32 %v2950_v23, %v2948_v14  ;;  %v8965_v28 = vld [vmem:[%s7818_s9 + $0x48] sm:$0xff]   ;;  %v7447_v29 = vld [vmem:[%s9145_s2 + $0x80] sm:$0xff]   ;;  %v5253_v42 = vsel %vm1065_vm2, %v5218_v24, 0  ;;  %v5870_v14 = vcombine.low %v5849_v11, %v8920_v25  ;;  %v5341_v25 = vrot.slane %v8942_v57, 1 }
 0x2bc   : > { %7189 = vmatprep.subr.msk.bf16.mxu1 %vm984_vm0, %v5067_v16  ;;  %v2984_v16 = vsel %vm1065_vm2, %v2949_v2, 0  ;;  %v5221_v17 = vor.u32 %v5219_v26, %v5217_v20  ;;  %v2962_v39 = vshll.u32 %v8965_v28, 16  ;;  %v2966_v32 = vshrl.u32 %v8965_v28, 16  ;;  %v7455_v57 = vld [vmem:[%s9146_s3 + $0x80] sm:$0xff]  }
 0x2bd   : > { %v3072_v23 = vrot.slane %v5870_v14, 1 }
 0x2be   : > { %v2964_v19 = vrot.slane %v2962_v39, 1 }
 0x2bf   : > { %v3074_v26 = vsel %vm1559_vm3, %v3072_v23, %v3073_v7 }
 0x2c0   : > { %v2965_v37 = vsel %vm944_vm1, %v2960_v46, %v2964_v19  ;;  %v2968_v50 = vor.u32 %v2966_v32, %v2964_v19 }
 0x2c1   : > { %6596 = vmatpush3.bf16.xpose.msra.mxu0 %v2825_v35  ;;  %v2957_v35 = vsel %vm944_vm1, %v2952_v27, %v2956_v6  ;;  %v3075_v27 = vrot.slane %v8949_v51, 1  ;;  %v3088_v6 = vsel %vm984_vm0, %v3074_v26, 0  ;;  %v7452_v51 = vld [vmem:[%s9145_s2 + $0x88] sm:$0xff]  }
 0x2c2   : > { %7100 = vmatprep.subr.msk.bf16.mxu0 %vm984_vm0, %v2804_v38  ;;  %v8986_v38 = vld [vmem:[%s7818_s9 + $0x50] sm:$0xf] }
 0x2c3   : > { %6848 = vmatpush3.bf16.xpose.msra.mxu1 %v5095_v43  ;;  %v5226_v43 = vsel %vm944_vm1, %v5221_v17, %v5225_v30  ;;  %v5861_v47 = vcombine.low %v8986_v38, %v8986_v38 }
 0x2c4   : > { %7190 = vmatprep.subr.msk.bf16.mxu1 %vm984_vm0, %v5074_v10  ;;  %v5227_v10 = vshrl.u32 %v8954_v21, 16 }
 0x2c6   : > { %v5229_v53 = vor.u32 %v5227_v10, %v5225_v30  ;;  %v3077_v30 = vrot.slane %v8965_v28, 1 }
 0x2c8   : > { %v5234_v59 = vsel %vm944_vm1, %v5229_v53, %v5233_v54  ;;  %v3078_v39 = vsel %vm1559_vm3, %v3075_v27, %v3077_v30 }
 0x2c9   : > { %6598 = vmatpush3.bf16.xpose.msra.mxu0 %v2828_v48  ;;  %v2987_v48 = vsel %vm1065_vm2, %v2957_v35, 0  ;;  %v5259_v49 = vsel %vm1065_vm2, %v5234_v59, 0  ;;  %v3094_v31 = vsel %vm984_vm0, %v3078_v39, 0  ;;  %v3168_v32 = vpop.permute.xlu1 %3167 }
 0x2ca   : > { %7101 = vmatprep.subr.msk.bf16.mxu0 %vm984_vm0, %v2811_v55  ;;  %v6115_v55 = vcombine.low %v9001_v12, %v9001_v12 }
 0x2cb   : > { %6850 = vmatpush3.bf16.xpose.msra.mxu1 %v5098_v58  ;;  %v2970_v58 = vshll.u32 %v5861_v47, 16 }
 0x2cc   : > { %7191 = vmatprep.subr.msk.bf16.mxu1 %vm984_vm0, %v5081_v52  ;;  %v5256_v52 = vsel %vm1065_vm2, %v5226_v43, 0  ;;  %v5239_v1 = vshll.u32 %v6115_v55, 16  ;;  %v5243_v60 = vshrl.u32 %v6115_v55, 16  ;;  %v7457_v55 = vld [vmem:[%s9146_s3 + $0x88] sm:$0xff]  }
 0x2ce   : > { %v5241_v61 = vrot.slane %v5239_v1, 1 }
 0x2d0   : > { %v5245_v20 = vor.u32 %v5243_v60, %v5241_v61 }
 0x2d1   : > { %6600 = vmatpush3.bf16.xpose.msra.mxu0 %v2831_v3  ;;  %v2972_v3 = vrot.slane %v2970_v58, 1 }
 0x2d2   : > { %7102 = vmatprep.subr.msk.bf16.mxu0 %vm984_vm0, %v2814_v4  ;;  %v2990_v4 = vsel %vm1065_vm2, %v2965_v37, 0  ;;  %v5265_v18 = vsel %vm1065_vm2, %v5245_v20, 0 }
 0x2d3   : > { %6852 = vmatpush3.bf16.xpose.msra.mxu1 %v5101_v9  ;;  %v2973_v8 = vsel %vm944_vm1, %v2968_v50, %v2972_v3  ;;  %v5242_v9 = vsel %vm944_vm1, %v5237_v5, %v5241_v61 }
 0x2d4   : > { %7192 = vmatprep.subr.msk.bf16.mxu1 %vm984_vm0, %v5084_v33  ;;  %v2974_v33 = vshrl.u32 %v5861_v47, 16  ;;  %v2993_v40 = vsel %vm1065_vm2, %v2973_v8, 0  ;;  %v5262_v62 = vsel %vm1065_vm2, %v5242_v9, 0 }
 0x2d6   : > { %v2976_v45 = vor.u32 %v2974_v33, %v2972_v3 }
 0x2d9   : > { %6602 = vmatpush3.bf16.xpose.msra.mxu0 %v2834_v15  ;;  %v5168_v15 = vld [vmem:[%s8453_s14 + $0x4] sm:$0xe] }
 0x2da   : > { %7103 = vmatprep.subr.msk.bf16.mxu0 %vm1065_vm2, %v2949_v2  ;;  %v6124_v2 = vcombine.low %v5168_v15, %v8928_v56 }
 0x2db   : > { %6854 = vmatpush3.bf16.xpose.msra.mxu1 %v5104_v13  ;;  %v2996_v13 = vsel %vm1065_vm2, %v2976_v45, 0 }
 0x2dc   : > { %7193 = vmatprep.subr.msk.bf16.mxu1 %vm1065_vm2, %v5218_v24  ;;  %v5340_v24 = vrot.slane %v6124_v2, 1 }
 0x2de   : > { %v5342_v56 = vsel %vm1559_vm3, %v5340_v24, %v5341_v25 }
 0x2df   : > { %v5356_v17 = vsel %vm984_vm0, %v5342_v56, 0 }
 0x2e0   : > { %6604 = vmatmul.mubr.msk.bf16.vlgmr.msra.gmra.mrb[0].mxu0 %vm984_vm0, %v7439_v22  ;;  %v5343_v22 = vrot.slane %v8954_v21, 1 }
 0x2e1   : > { %6608 = vmatpush3.bf16.xpose.msra.mxu0 %v2984_v16  ;;  %6617 = vmatprep.mubr.msk.bf16.mxu0 %vm1065_vm2, %v7447_v29  ;;  %v3076_v29 = vsel %vm1559_vm3, %v3073_v7, %v3075_v27  ;;  %v7456_v16 = vld [vmem:[%s9146_s3 + $0x80] sm:$0xff]  }
 0x2e2   : > { %7104 = vmatprep.subr.msk.bf16.mxu0 %vm1065_vm2, %v2957_v35  ;;  %6856 = vmatmul.mubr.msk.bf16.vlgmr.msra.gmra.mrb[0].mxu1 %vm984_vm0, %v7440_v34  ;;  %v5344_v21 = vsel %vm1559_vm3, %v5341_v25, %v5343_v22  ;;  %v5850_v34 = vld [vmem:[%s7818_s9 + $0x54] sm:$0x1]  ;;  %v3091_v35 = vsel %vm984_vm0, %v3076_v29, 0  ;;  %v5346_v28 = vsel %vm1559_vm3, %v5343_v22, %v5345_v36 }
 0x2e3   : > { %6860 = vmatpush3.bf16.xpose.msra.mxu1 %v5253_v42  ;;  %6869 = vmatprep.mubr.msk.bf16.mxu1 %vm1065_vm2, %v7449_v41  ;;  %v5871_v41 = vcombine.low %v8986_v38, %v5850_v34  ;;  %v5169_v42 = vld [vmem:[%s8453_s14 + $0x28] sm:$0x1]  ;;  %v5362_v38 = vsel %vm984_vm0, %v5346_v28, 0 }
 0x2e4   : > { %7194 = vmatprep.subr.msk.bf16.mxu1 %vm1065_vm2, %v5226_v43  ;;  %v5359_v43 = vsel %vm984_vm0, %v5344_v21, 0  ;;  %v6125_v10 = vcombine.low %v9001_v12, %v5169_v42 }
 0x2e5   : > { %v3079_v44 = vrot.slane %v5871_v41, 1 }
 0x2e6   : > { %v5347_v46 = vrot.slane %v6125_v10, 1 }
 0x2e7   : > { %v3080_v19 = vsel %vm1559_vm3, %v3077_v30, %v3079_v44  ;;  %v3100_v53 = vsel %vm984_vm0, %v3079_v44, 0 }
 0x2e8   : > { %v5348_v47 = vsel %vm1559_vm3, %v5345_v36, %v5347_v46  ;;  %v3097_v12 = vsel %vm984_vm0, %v3080_v19, 0  ;;  %v5368_v54 = vsel %vm984_vm0, %v5347_v46, 0 }
 0x2e9   : > { %6610 = vmatpush3.bf16.xpose.msra.mxu0 %v2987_v48  ;;  %v5365_v48 = vsel %vm984_vm0, %v5348_v47, 0 }
 0x2ea   : > { %7105 = vmatprep.subr.msk.bf16.mxu0 %vm1065_vm2, %v2965_v37  ;;  %v7458_v37 = vld [vmem:[%s9146_s3 + $0x88] sm:$0xff]  }
 0x2eb   : > { %6862 = vmatpush3.bf16.xpose.msra.mxu1 %v5256_v52 }
 0x2ec   : > { %7195 = vmatprep.subr.msk.bf16.mxu1 %vm1065_vm2, %v5234_v59 }
 0x2f1   : > { %6612 = vmatpush3.bf16.xpose.msra.mxu0 %v2990_v4 }
 0x2f2   : > { %7106 = vmatprep.subr.msk.bf16.mxu0 %vm1065_vm2, %v2973_v8 }
 0x2f3   : > { %6864 = vmatpush3.bf16.xpose.msra.mxu1 %v5259_v49  ;;  %v3158_v58 = vpop.permute.xlu0 %3157 }
 0x2f4   : > { %7196 = vmatprep.subr.msk.bf16.mxu1 %vm1065_vm2, %v5242_v9 }
 0x2f7   : > { %v3163_v50 = vpop.permute.xlu0 %3162 }
 0x2f9   : > { %6614 = vmatpush3.bf16.xpose.msra.mxu0 %v2993_v40 }
 0x2fa   : > { %7107 = vmatprep.subr.msk.bf16.mxu0 %vm1065_vm2, %v2976_v45 }
 0x2fb   : > { %6866 = vmatpush3.bf16.xpose.msra.mxu1 %v5262_v62 }
 0x2fc   : > { %7197 = vmatprep.subr.msk.bf16.mxu1 %vm1065_vm2, %v5245_v20 }
 0x301   : > { %6616 = vmatpush3.bf16.xpose.msra.mxu0 %v2996_v13  ;;  %v3173_v59 = vpop.permute.xlu1 %3172 }
 0x302   : > { %7108 = vmatprep.subr.msk.bf16.mxu0 %vm984_vm0, %v3074_v26 }
 0x303   : > { %6868 = vmatpush3.bf16.xpose.msra.mxu1 %v5265_v18 }
 0x304   : > { %7198 = vmatprep.subr.msk.bf16.mxu1 %vm984_vm0, %v5342_v56 }
 0x308   : > { %6618 = vmatmul.mubr.msk.bf16.vlgmr.msra.gmra.mrb[0].mxu0 %vm1065_vm2, %v7451_v0 }
 0x309   : > { %6622 = vmatpush3.bf16.xpose.msra.mxu0 %v3088_v6  ;;  %6631 = vmatprep.mubr.msk.bf16.mxu0 %vm984_vm0, %v7455_v57 }
 0x30a   : > { %7109 = vmatprep.subr.msk.bf16.mxu0 %vm984_vm0, %v3076_v29  ;;  %6870 = vmatmul.mubr.msk.bf16.vlgmr.msra.gmra.mrb[0].mxu1 %vm1065_vm2, %v7452_v51 }
 0x30b   : > { %6874 = vmatpush3.bf16.xpose.msra.mxu1 %v5356_v17  ;;  %6883 = vmatprep.mubr.msk.bf16.mxu1 %vm984_vm0, %v7456_v16 }
 0x30c   : > { %7199 = vmatprep.subr.msk.bf16.mxu1 %vm984_vm0, %v5344_v21 }
 0x311   : > { %6624 = vmatpush3.bf16.xpose.msra.mxu0 %v3091_v35 }
 0x312   : > { %7110 = vmatprep.subr.msk.bf16.mxu0 %vm984_vm0, %v3078_v39 }
 0x313   : > { %6876 = vmatpush3.bf16.xpose.msra.mxu1 %v5359_v43 }
 0x314   : > { %7200 = vmatprep.subr.msk.bf16.mxu1 %vm984_vm0, %v5346_v28 }
 0x319   : > { %6626 = vmatpush3.bf16.xpose.msra.mxu0 %v3094_v31 }
 0x31a   : > { %7111 = vmatprep.subr.msk.bf16.mxu0 %vm984_vm0, %v3080_v19 }
 0x31b   : > { %6878 = vmatpush3.bf16.xpose.msra.mxu1 %v5362_v38 }
 0x31c   : > { %7201 = vmatprep.subr.msk.bf16.mxu1 %vm984_vm0, %v5348_v47 }
 0x321   : > { %6628 = vmatpush3.bf16.xpose.msra.mxu0 %v3097_v12 }
 0x322   : > { %7112 = vmatprep.subr.msk.bf16.mxu0 %vm984_vm0, %v3079_v44 }
 0x323   : > { %6880 = vmatpush3.bf16.xpose.msra.mxu1 %v5365_v48 }
 0x324   : > { %7202 = vmatprep.subr.msk.bf16.mxu1 %vm984_vm0, %v5347_v46 }
 0x329   : > { %6630 = vmatpush3.bf16.xpose.msra.mxu0 %v3100_v53 }
 0x32b   : > { %6882 = vmatpush3.bf16.xpose.msra.mxu1 %v5368_v54 }
 0x330   : > { %6632 = vmatmul.mubr.msk.bf16.vlgmr.msra.gmra.mrb[0].mxu0 %vm984_vm0, %v7457_v55 }
 0x332   : > { %6884 = vmatmul.mubr.msk.bf16.vlgmr.msra.gmra.mrb[0].mxu1 %vm984_vm0, %v7458_v37 }
 0x403   : > { %v6633_v52 = vpop.f32.mrb[0].mxu0 }
 0x404   : > { %v3177_v63 = vadd.f32 %v6633_v52, %v3168_v32  ;;  %v3136_v1 = vpop.f32.mrb[1].mxu0 }
 0x405   : > { %v3175_v3 = vadd.f32 %v3158_v58, %v3136_v1  ;;  %v6634_v4 = vpop.f32.mrb[2].mxu0  ;;  %v6885_v5 = vpop.f32.mrb[0].mxu1 }
 0x406   : > { %3182 = vst.msk [vmem:[%s9098_s30 + $0x20] sm:$0xff] %vm3179_vm4, %v3177_v63  ;;  %v3178_v61 = vadd.f32 %v6634_v4, %v3173_v59  ;;  %v3139_v8 = vpop.f32.mrb[3].mxu0  ;;  %v5404_v49 = vpop.f32.mrb[1].mxu1  ;;  %v5425_v45 = vadd.f32 %v6885_v5, %v3168_v32 }
 0x407   : > { %3180 = vst.msk [vmem:[%s9098_s30] sm:$0xff] %vm3179_vm4, %v3175_v3  ;;  %v3176_v9 = vadd.f32 %v3163_v50, %v3139_v8  ;;  %v5423_v33 = vadd.f32 %v5404_v49, %v3158_v58  ;;  %v6886_v11 = vpop.f32.mrb[2].mxu1 }
 0x408   : > { %3183 = vst.msk [vmem:[%s9098_s30 + $0x30] sm:$0xff] %vm3179_vm4, %v3178_v61  ;;  %v5407_v60 = vpop.f32.mrb[3].mxu1  ;;  %v5426_v14 = vadd.f32 %v6886_v11, %v3173_v59 }
 0x409   : > { %3181 = vst.msk [vmem:[%s9098_s30 + $0x10] sm:$0xff] %vm3179_vm4, %v3176_v9  ;;  %v5424_v40 = vadd.f32 %v5407_v60, %v3163_v50  ;;  %5431 = vrot.lane.b32.xlu0 %v5423_v33, %s7532_s22 }
 0x40b   : > { %5433 = vrot.lane.b32.xlu1 %v5424_v40, %s7532_s22 }
 0x40d   : > { %5435 = vrot.lane.b32.xlu0 %v5425_v45, %s7532_s22 }
 0x40f   : > { %5437 = vrot.lane.b32.xlu1 %v5426_v14, %s7532_s22 }
 0x47b   : > { %v5432_v15 = vpop.permute.xlu0 %5431 }
 0x47c   : > { %5444 = vst.msk [vmem:[%s9098_s30] sm:$0xff] %vm5443_vm5, %v5432_v15 }
 0x47d   : > { %5446 = vst.msk [vmem:[%s9098_s30 + $0x8] sm:$0xff] %vm5445_vm6, %v5432_v15  ;;  %v5434_v62 = vpop.permute.xlu1 %5433 }
 0x47e   : > { %5447 = vst.msk [vmem:[%s9098_s30 + $0x10] sm:$0xff] %vm5443_vm5, %v5434_v62 }
 0x47f   : > { %5448 = vst.msk [vmem:[%s9098_s30 + $0x18] sm:$0xff] %vm5445_vm6, %v5434_v62  ;;  %v5436_v20 = vpop.permute.xlu0 %5435 }
 0x480   : > { %5449 = vst.msk [vmem:[%s9098_s30 + $0x20] sm:$0xff] %vm5443_vm5, %v5436_v20 }
 0x481   : > { %5450 = vst.msk [vmem:[%s9098_s30 + $0x28] sm:$0xff] %vm5445_vm6, %v5436_v20  ;;  %v5438_v2 = vpop.permute.xlu1 %5437 }
 0x482   : > { %5451 = vst.msk [vmem:[%s9098_s30 + $0x30] sm:$0xff] %vm5443_vm5, %v5438_v2 }
 0x483   : > { %5452 = vst.msk [vmem:[%s9098_s30 + $0x38] sm:$0xff] %vm5445_vm6, %v5438_v2 }
 0x484 PF: > { %s15_s26 = sadd.s32 1, %s7529_s26   ;;  %s9151_s18 = smov %s7501_s19 }
 0x485   : > { %p12_p0 = scmp.ge.s32.totalorder %s15_s26, 6   ;;  %s9152_s19 = smov %s7638_s17 }
 0x486   : > { %s9153_s20 = smov %s7509_s21  ;;  %s9154_s21 = smov %s7635_s16 }
 0x487   : > { %s9155_s22 = smov %s7521_s24  ;;  %s9156_s23 = smov %s7525_s25 }
 0x488   : > { %s9157_s24 = smov %s9160_s27  ;;  %s9158_s25 = smov %s9164_s28 }
 0x489   :  { %14 = sbr.rel (!%p12_p0) target bundleno = 5 (0x5), region = 189 }

</bundles_post_ra>
